<compile_context>
chip_gen: v7x
topology: tpu7x:2x2x1
jax: 0.10.0
libtpu: 0.0.40
codegen_flags: <defaults>
</compile_context>

<pallas_src>
import functools
import jax
import jax.numpy as jnp
from jax.experimental import pallas as pl
from jax.experimental.pallas import tpu as pltpu


def _layer_norm(x, g, b, eps=1e-5):
    mu = jnp.mean(x, axis=-1, keepdims=True)
    var = jnp.mean((x - mu) ** 2, axis=-1, keepdims=True)
    return (x - mu) * jax.lax.rsqrt(var + eps) * g + b


def mata_forward_kernel(x_ref, we_ref, be_ref, ln1g_ref, ln1b_ref,
                        m_ref, wvo_ref, ln2g_ref, ln2b_ref,
                        w1_ref, b1_ref, w2_ref, b2_ref, wc_ref, bc_ref,
                        out_ref,
                        tn_ref, vp_ref, attn_ref,
                        *, heads, seq, tq):
    f32 = jnp.float32
    bf16 = jnp.bfloat16
    D = we_ref.shape[1]
    nq = seq // tq

    x = x_ref[0]                                                  # (S, C) bf16

    # --- spectral embedding (1x1 conv == per-token matmul) ---
    t = jnp.dot(x, we_ref[...], preferred_element_type=f32) + be_ref[...]   # (S, D) f32

    # --- pre-LN (f32 stats), store normalized tokens for reuse/tiling ---
    tn_ref[...] = _layer_norm(t, ln1g_ref[...], ln1b_ref[...]).astype(bf16)
    tn_all = tn_ref[...]                                          # (S, D) bf16 (keys)

    # --- per-head value projections with Wo pre-folded: vp[h] = tn @ (Wv_h Wo_h) ---
    def vp_body(h, carry):
        vp_ref[h] = jnp.dot(tn_all, wvo_ref[h],
                            preferred_element_type=f32).astype(bf16)        # (S, D)
        return carry
    jax.lax.fori_loop(0, heads, vp_body, 0)

    # --- attention: query-row tiles (outer) x heads (inner, vreg accumulator) ---
    def q_tile_body(qi, carry):
        q0 = pl.multiple_of(qi * tq, tq)
        tn_t = tn_ref[pl.ds(q0, tq), :]                           # (TQ, D) bf16

        def head_body(h, acc):
            # scores via host-folded bilinear form: s = (tn_t @ M_h) @ tn^T
            qm = jnp.dot(tn_t, m_ref[h], preferred_element_type=f32).astype(bf16)
            s = jax.lax.dot_general(qm, tn_all, (((1,), (1,)), ((), ())),
                                    preferred_element_type=f32)   # (TQ, S) f32
            s = s - jnp.max(s, axis=-1, keepdims=True)
            e = jnp.exp(s)                                        # f32 (portable: v5e)
            inv_l = pl.reciprocal(jnp.sum(e, axis=-1, keepdims=True), approx=True)
            p = (e * inv_l).astype(bf16)
            # full-depth (K=S) value matmul, Wo already folded in
            return acc + jnp.dot(p, vp_ref[h], preferred_element_type=f32)  # (TQ, D)

        acc = jax.lax.fori_loop(0, heads, head_body, jnp.zeros((tq, D), f32))
        attn_ref[pl.ds(q0, tq), :] = acc
        return carry
    jax.lax.fori_loop(0, nq, q_tile_body, 0)

    a = t + attn_ref[...]                                         # (S, D) f32 residual

    # --- feed-forward (pre-LN) ---
    an = _layer_norm(a, ln2g_ref[...], ln2b_ref[...]).astype(bf16)
    h1 = jnp.dot(an, w1_ref[...], preferred_element_type=f32) + b1_ref[...]
    h1 = jax.nn.gelu(h1, approximate=True).astype(bf16)
    y = a + jnp.dot(h1, w2_ref[...], preferred_element_type=f32) + b2_ref[...]

    # --- mean-pool over tokens + classification head (lane-padded output) ---
    pooled = jnp.mean(y, axis=0, keepdims=True)                   # (1, D) f32
    logits = jnp.dot(pooled.astype(bf16), wc_ref[...],
                     preferred_element_type=f32) + bc_ref[...]    # (1, ncls_pad)
    out_ref[0] = logits


def mata_forward(x_nchw, params, heads, tq=128):
    B, C, H, W = x_nchw.shape
    S = H * W
    D = params['we'].shape[1]
    hid = params['w1'].shape[1]
    ncls = params['wc'].shape[1]
    assert D % heads == 0, "dim must be divisible by heads"
    dh = D // heads
    TQ = min(tq, S)
    assert S % 8 == 0 and S % TQ == 0, "token count must tile cleanly"
    ncls_pad = max(128, ((ncls + 127) // 128) * 128)              # lane-dense output

    # NCHW -> NHWC -> (B, S, C) token rows; bf16 matmul operand.
    x_tok = (jnp.transpose(x_nchw, (0, 2, 3, 1))
             .reshape(B, S, C).astype(jnp.bfloat16))

    # ---- host-side weight refolding (all in f32, cast to bf16 once) ----
    scale = 1.0 / (dh ** 0.5)
    wq_s = params['wq'].astype(jnp.float32) * jnp.float32(scale)  # fold attn scale
    wk, wv, wo = params['wk'], params['wv'], params['wo']
    # bilinear score weights: M_h = Wq_h(scaled) @ Wk_h^T   -> (heads, D, D)
    m_stack = jnp.stack(
        [wq_s[:, h * dh:(h + 1) * dh] @ wk[:, h * dh:(h + 1) * dh].T
         for h in range(heads)], axis=0)
    # value+output folded weights: Wvo_h = Wv_h @ Wo_h       -> (heads, D, D)
    wvo_stack = jnp.stack(
        [wv[:, h * dh:(h + 1) * dh] @ wo[h * dh:(h + 1) * dh, :]
         for h in range(heads)], axis=0)

    wc_pad = jnp.zeros((D, ncls_pad), jnp.float32).at[:, :ncls].set(params['wc'])
    bc_pad = jnp.zeros((1, ncls_pad), jnp.float32).at[:, :ncls].set(params['bc'])

    bf = lambda w: w.astype(jnp.bfloat16)
    weights = [
        bf(params['we']), params['be'],
        params['ln1g'], params['ln1b'],
        bf(m_stack), bf(wvo_stack),
        params['ln2g'], params['ln2b'],
        bf(params['w1']), params['b1'], bf(params['w2']), params['b2'],
        bf(wc_pad), bc_pad,
    ]

    const2 = lambda b: (0, 0)
    const3 = lambda b: (0, 0, 0)
    in_specs = [
        pl.BlockSpec((1, S, C), lambda b: (b, 0, 0)),             # x tokens (per-sample)
        pl.BlockSpec((C, D), const2),                             # we
        pl.BlockSpec((1, D), const2),                             # be
        pl.BlockSpec((1, D), const2),                             # ln1g
        pl.BlockSpec((1, D), const2),                             # ln1b
        pl.BlockSpec((heads, D, D), const3),                      # M_h   (Wq·Wk^T)
        pl.BlockSpec((heads, D, D), const3),                      # Wvo_h (Wv·Wo)
        pl.BlockSpec((1, D), const2),                             # ln2g
        pl.BlockSpec((1, D), const2),                             # ln2b
        pl.BlockSpec((D, hid), const2),                           # w1
        pl.BlockSpec((1, hid), const2),                           # b1
        pl.BlockSpec((hid, D), const2),                           # w2
        pl.BlockSpec((1, D), const2),                             # b2
        pl.BlockSpec((D, ncls_pad), const2),                      # wc (padded)
        pl.BlockSpec((1, ncls_pad), const2),                      # bc (padded)
    ]

    # Advisory cost estimate (scheduling hint only).
    flops = B * (2 * S * C * D
                 + heads * (2 * S * D * D + 2 * S * D * D
                            + 2 * S * S * D + 2 * S * S * D)
                 + 2 * S * D * hid + 2 * S * hid * D
                 + 2 * D * ncls_pad)
    transcendentals = B * heads * S * S
    nbytes = lambda a: int(a.size) * a.dtype.itemsize
    bytes_accessed = nbytes(x_tok) + sum(nbytes(w) for w in weights) + B * ncls_pad * 4

    kernel = functools.partial(mata_forward_kernel, heads=heads, seq=S, tq=TQ)
    out = pl.pallas_call(
        kernel,
        out_shape=jax.ShapeDtypeStruct((B, 1, ncls_pad), jnp.float32),
        grid_spec=pltpu.PrefetchScalarGridSpec(
            num_scalar_prefetch=0,
            grid=(B,),
            in_specs=in_specs,
            out_specs=pl.BlockSpec((1, 1, ncls_pad), lambda b: (b, 0, 0)),
            scratch_shapes=[
                pltpu.VMEM((S, D), jnp.bfloat16),                 # tn (normalized tokens)
                pltpu.VMEM((heads, S, D), jnp.bfloat16),          # per-head value proj
                pltpu.VMEM((S, D), jnp.float32),                  # attention output
            ]),
        compiler_params=pltpu.CompilerParams(
            dimension_semantics=("parallel",)),                   # v7x: 1 sample / TC
        cost_estimate=pl.CostEstimate(flops=flops,
                                      transcendentals=transcendentals,
                                      bytes_accessed=bytes_accessed),
    )(x_tok, *weights)
    return out[:, 0, :ncls]


def mata_forward_ref(x_nchw, params, heads):
    """Pure-JAX f32 reference (original un-folded formulation), for checking."""
    B, C, H, W = x_nchw.shape
    S = H * W
    x = jnp.transpose(x_nchw, (0, 2, 3, 1)).reshape(B, S, C).astype(jnp.float32)

    def per_sample(xs):
        t = xs @ params['we'] + params['be']
        D = t.shape[-1]
        dh = D // heads
        tn = _layer_norm(t, params['ln1g'], params['ln1b'])
        q = tn @ params['wq']
        k = tn @ params['wk']
        v = tn @ params['wv']
        scale = 1.0 / (dh ** 0.5)
        outs = []
        for h in range(heads):
            qh, kh, vh = (q[:, h * dh:(h + 1) * dh],
                          k[:, h * dh:(h + 1) * dh],
                          v[:, h * dh:(h + 1) * dh])
            s = qh @ kh.T * scale
            s = s - jnp.max(s, axis=-1, keepdims=True)
            e = jnp.exp(s)
            p = e / jnp.sum(e, axis=-1, keepdims=True)
            outs.append(p @ vh)
        a = t + jnp.concatenate(outs, axis=-1) @ params['wo']
        an = _layer_norm(a, params['ln2g'], params['ln2b'])
        h1 = jax.nn.gelu(an @ params['w1'] + params['b1'], approximate=True)
        y = a + h1 @ params['w2'] + params['b2']
        pooled = jnp.mean(y, axis=0, keepdims=True)
        return (pooled @ params['wc'] + params['bc'])[0]

    return jax.vmap(per_sample)(x)


def init_params(key, inputdim, dim, class_num, mlp_ratio=4):
    ks = jax.random.split(key, 10)
    hidden = dim * mlp_ratio
    sc = lambda fan_in: 1.0 / jnp.sqrt(jnp.float32(fan_in))
    return {
        'we': jax.random.normal(ks[0], (inputdim, dim), jnp.float32) * sc(inputdim),
        'be': jnp.zeros((1, dim), jnp.float32),
        'wq': jax.random.normal(ks[1], (dim, dim), jnp.float32) * sc(dim),
        'wk': jax.random.normal(ks[2], (dim, dim), jnp.float32) * sc(dim),
        'wv': jax.random.normal(ks[3], (dim, dim), jnp.float32) * sc(dim),
        'wo': jax.random.normal(ks[4], (dim, dim), jnp.float32) * sc(dim),
        'ln1g': jnp.ones((1, dim), jnp.float32),
        'ln1b': jnp.zeros((1, dim), jnp.float32),
        'ln2g': jnp.ones((1, dim), jnp.float32),
        'ln2b': jnp.zeros((1, dim), jnp.float32),
        'w1': jax.random.normal(ks[5], (dim, hidden), jnp.float32) * sc(dim),
        'b1': jnp.zeros((1, hidden), jnp.float32),
        'w2': jax.random.normal(ks[6], (hidden, dim), jnp.float32) * sc(hidden),
        'b2': jnp.zeros((1, dim), jnp.float32),
        'wc': jax.random.normal(ks[7], (dim, class_num), jnp.float32) * sc(dim),
        'bc': jnp.zeros((1, class_num), jnp.float32),
    }


if __name__ == "__main__":
    # hyperparameters implied by the module's __init__
    B, inputdim, H, W = 2, 4, 16, 16      # x_2D: NCHW
    dim, class_num, heads = 32, 8, 4

    key = jax.random.PRNGKey(0)
    kx, kp = jax.random.split(key)
    x_2D = jax.random.normal(kx, (B, inputdim, H, W), jnp.float32)
    params = init_params(kp, inputdim, dim, class_num)

    y_pred = mata_forward(x_2D, params, heads)
    y_pred = jax.block_until_ready(y_pred)

    y_ref = mata_forward_ref(x_2D, params, heads)
    assert y_pred.shape == (B, class_num)
    # bf16 MXU operands, host-folded (Wq·Wk^T, Wv·Wo) weights, approx reciprocal
    # softmax vs the f32 reference.
    assert jnp.allclose(y_pred, y_ref, rtol=5e-2, atol=5e-2), "mismatch vs reference"

    print("KERNEL_OK")
</pallas_src>

<mosaic_0001>
module attributes {stable_mosaic.version = 11 : i64} {
  func.func @mata_forward_kernel(%arg0: i32, %arg1: memref<1x256x4xbf16, #tpu.memory_space<vmem>>, %arg2: memref<4x32xbf16, #tpu.memory_space<vmem>>, %arg3: memref<1x32xf32, #tpu.memory_space<vmem>>, %arg4: memref<1x32xf32, #tpu.memory_space<vmem>>, %arg5: memref<1x32xf32, #tpu.memory_space<vmem>>, %arg6: memref<4x32x32xbf16, #tpu.memory_space<vmem>>, %arg7: memref<4x32x32xbf16, #tpu.memory_space<vmem>>, %arg8: memref<1x32xf32, #tpu.memory_space<vmem>>, %arg9: memref<1x32xf32, #tpu.memory_space<vmem>>, %arg10: memref<32x128xbf16, #tpu.memory_space<vmem>>, %arg11: memref<1x128xf32, #tpu.memory_space<vmem>>, %arg12: memref<128x32xbf16, #tpu.memory_space<vmem>>, %arg13: memref<1x32xf32, #tpu.memory_space<vmem>>, %arg14: memref<32x128xbf16, #tpu.memory_space<vmem>>, %arg15: memref<1x128xf32, #tpu.memory_space<vmem>>, %arg16: memref<1x1x128xf32, #tpu.memory_space<vmem>>, %arg17: memref<256x32xbf16, #tpu.memory_space<vmem>>, %arg18: memref<4x256x32xbf16, #tpu.memory_space<vmem>>, %arg19: memref<256x32xf32, #tpu.memory_space<vmem>>) attributes {dimension_semantics = [#tpu.dimension_semantics<parallel>], iteration_bounds = array<i64: 2>, scalar_prefetch = 0 : i64, scratch_operands = 3 : i64, tpu.core_type = #tpu.core_type<tc>, window_params = [{transform_indices = @transform_0, window_bounds = array<i64: 1, 256, 4>}, {pipeline_mode = #tpu.pipeline_mode<synchronous>, transform_indices = @transform_1, window_bounds = array<i64: 4, 32>}, {pipeline_mode = #tpu.pipeline_mode<synchronous>, transform_indices = @transform_2, window_bounds = array<i64: 1, 32>}, {pipeline_mode = #tpu.pipeline_mode<synchronous>, transform_indices = @transform_3, window_bounds = array<i64: 1, 32>}, {pipeline_mode = #tpu.pipeline_mode<synchronous>, transform_indices = @transform_4, window_bounds = array<i64: 1, 32>}, {pipeline_mode = #tpu.pipeline_mode<synchronous>, transform_indices = @transform_5, window_bounds = array<i64: 4, 32, 32>}, {pipeline_mode = #tpu.pipeline_mode<synchronous>, transform_indices = @transform_6, window_bounds = array<i64: 4, 32, 32>}, {pipeline_mode = #tpu.pipeline_mode<synchronous>, transform_indices = @transform_7, window_bounds = array<i64: 1, 32>}, {pipeline_mode = #tpu.pipeline_mode<synchronous>, transform_indices = @transform_8, window_bounds = array<i64: 1, 32>}, {pipeline_mode = #tpu.pipeline_mode<synchronous>, transform_indices = @transform_9, window_bounds = array<i64: 32, 128>}, {pipeline_mode = #tpu.pipeline_mode<synchronous>, transform_indices = @transform_10, window_bounds = array<i64: 1, 128>}, {pipeline_mode = #tpu.pipeline_mode<synchronous>, transform_indices = @transform_11, window_bounds = array<i64: 128, 32>}, {pipeline_mode = #tpu.pipeline_mode<synchronous>, transform_indices = @transform_12, window_bounds = array<i64: 1, 32>}, {pipeline_mode = #tpu.pipeline_mode<synchronous>, transform_indices = @transform_13, window_bounds = array<i64: 32, 128>}, {pipeline_mode = #tpu.pipeline_mode<synchronous>, transform_indices = @transform_14, window_bounds = array<i64: 1, 128>}, {transform_indices = @transform_15, window_bounds = array<i64: 1, 1, 128>}]} {
    %c0 = arith.constant 0 : index
    %c0_0 = arith.constant 0 : index
    %c0_1 = arith.constant 0 : index
    %0 = vector.load %arg1[%c0, %c0_0, %c0_1] : memref<1x256x4xbf16, #tpu.memory_space<vmem>>, vector<1x256x4xbf16>
    %1 = vector.shape_cast %0 : vector<1x256x4xbf16> to vector<256x4xbf16>
    %c0_2 = arith.constant 0 : index
    %c0_3 = arith.constant 0 : index
    %2 = vector.load %arg2[%c0_2, %c0_3] : memref<4x32xbf16, #tpu.memory_space<vmem>>, vector<4x32xbf16>
    %cst = arith.constant dense<0.000000e+00> : vector<256x32xf32>
    %3 = tpu.matmul %1, %2, %cst {dimension_numbers = #tpu.dot_dimension_numbers<[1], [0], [0], [1], [0, 0, 1, 1], [], []>} : vector<256x4xbf16>, vector<4x32xbf16>, vector<256x32xf32> -> vector<256x32xf32>
    %c0_4 = arith.constant 0 : index
    %c0_5 = arith.constant 0 : index
    %4 = vector.load %arg3[%c0_4, %c0_5] : memref<1x32xf32, #tpu.memory_space<vmem>>, vector<1x32xf32>
    %5 = vector.broadcast %4 : vector<1x32xf32> to vector<256x32xf32>
    %6 = arith.addf %3, %5 : vector<256x32xf32>
    %c0_6 = arith.constant 0 : index
    %c0_7 = arith.constant 0 : index
    %7 = vector.load %arg4[%c0_6, %c0_7] : memref<1x32xf32, #tpu.memory_space<vmem>>, vector<1x32xf32>
    %c0_8 = arith.constant 0 : index
    %c0_9 = arith.constant 0 : index
    %8 = vector.load %arg5[%c0_8, %c0_9] : memref<1x32xf32, #tpu.memory_space<vmem>>, vector<1x32xf32>
    %cst_10 = arith.constant dense<0.000000e+00> : vector<256xf32>
    %9 = vector.multi_reduction <add>, %6, %cst_10 [1] : vector<256x32xf32> to vector<256xf32>
    %10 = vector.shape_cast %9 : vector<256xf32> to vector<256x1xf32>
    %cst_11 = arith.constant 3.200000e+01 : f32
    %11 = vector.broadcast %cst_11 : f32 to vector<256x1xf32>
    %12 = arith.divf %10, %11 : vector<256x1xf32>
    %13 = vector.broadcast %12 : vector<256x1xf32> to vector<256x32xf32>
    %14 = arith.subf %6, %13 : vector<256x32xf32>
    %15 = arith.mulf %14, %14 : vector<256x32xf32>
    %cst_12 = arith.constant dense<0.000000e+00> : vector<256xf32>
    %16 = vector.multi_reduction <add>, %15, %cst_12 [1] : vector<256x32xf32> to vector<256xf32>
    %17 = vector.shape_cast %16 : vector<256xf32> to vector<256x1xf32>
    %cst_13 = arith.constant 3.200000e+01 : f32
    %18 = vector.broadcast %cst_13 : f32 to vector<256x1xf32>
    %19 = arith.divf %17, %18 : vector<256x1xf32>
    %20 = vector.broadcast %12 : vector<256x1xf32> to vector<256x32xf32>
    %21 = arith.subf %6, %20 : vector<256x32xf32>
    %cst_14 = arith.constant 9.99999974E-6 : f32
    %22 = vector.broadcast %cst_14 : f32 to vector<256x1xf32>
    %23 = arith.addf %19, %22 : vector<256x1xf32>
    %24 = math.rsqrt %23 : vector<256x1xf32>
    %25 = vector.broadcast %24 : vector<256x1xf32> to vector<256x32xf32>
    %26 = arith.mulf %21, %25 : vector<256x32xf32>
    %27 = vector.broadcast %7 : vector<1x32xf32> to vector<256x32xf32>
    %28 = arith.mulf %26, %27 : vector<256x32xf32>
    %29 = vector.broadcast %8 : vector<1x32xf32> to vector<256x32xf32>
    %30 = arith.addf %28, %29 : vector<256x32xf32>
    %31 = arith.truncf %30 : vector<256x32xf32> to vector<256x32xbf16>
    %c0_15 = arith.constant 0 : index
    %c0_16 = arith.constant 0 : index
    %32 = vector.load %arg17[%c0_15, %c0_16] : memref<256x32xbf16, #tpu.memory_space<vmem>>, vector<256x32xbf16>
    tpu.vector_store %arg17[%c0_15, %c0_16], %31 {strides = array<i32>} : memref<256x32xbf16, #tpu.memory_space<vmem>>, vector<256x32xbf16>,
    %c0_17 = arith.constant 0 : index
    %c0_18 = arith.constant 0 : index
    %33 = vector.load %arg17[%c0_17, %c0_18] : memref<256x32xbf16, #tpu.memory_space<vmem>>, vector<256x32xbf16>
    %c0_i32 = arith.constant 0 : i32
    %c4_i32 = arith.constant 4 : i32
    %34 = arith.addi %c0_i32, %c4_i32 : i32
    %c1_i32 = arith.constant 1 : i32
    scf.for %arg20 = %c0_i32 to %34 step %c1_i32  : i32 {
      %100 = arith.index_cast %arg20 : i32 to index
      %c0_58 = arith.constant 0 : index
      %c0_59 = arith.constant 0 : index
      %101 = vector.load %arg7[%100, %c0_58, %c0_59] : memref<4x32x32xbf16, #tpu.memory_space<vmem>>, vector<1x32x32xbf16>
      %102 = vector.shape_cast %101 : vector<1x32x32xbf16> to vector<32x32xbf16>
      %cst_60 = arith.constant dense<0.000000e+00> : vector<256x32xf32>
      %103 = tpu.matmul %33, %102, %cst_60 {dimension_numbers = #tpu.dot_dimension_numbers<[1], [0], [0], [1], [0, 0, 1, 1], [], []>} : vector<256x32xbf16>, vector<32x32xbf16>, vector<256x32xf32> -> vector<256x32xf32>
      %104 = arith.truncf %103 : vector<256x32xf32> to vector<256x32xbf16>
      %105 = arith.index_cast %arg20 : i32 to index
      %c0_61 = arith.constant 0 : index
      %c0_62 = arith.constant 0 : index
      %106 = vector.load %arg18[%105, %c0_61, %c0_62] : memref<4x256x32xbf16, #tpu.memory_space<vmem>>, vector<1x256x32xbf16>
      %107 = vector.shape_cast %106 : vector<1x256x32xbf16> to vector<256x32xbf16>
      %108 = vector.shape_cast %104 : vector<256x32xbf16> to vector<1x256x32xbf16>
      tpu.vector_store %arg18[%105, %c0_61, %c0_62], %108 {strides = array<i32>} : memref<4x256x32xbf16, #tpu.memory_space<vmem>>, vector<1x256x32xbf16>,
    }
    %c4_i32_19 = arith.constant 4 : i32
    %c0_i32_20 = arith.constant 0 : i32
    %c2_i32 = arith.constant 2 : i32
    %35 = arith.addi %c0_i32_20, %c2_i32 : i32
    %c1_i32_21 = arith.constant 1 : i32
    scf.for %arg20 = %c0_i32_20 to %35 step %c1_i32_21  : i32 {
      %c128_i32 = arith.constant 128 : i32
      %100 = arith.muli %arg20, %c128_i32 : i32
      %101 = tpu.assume_multiple %100, 128 : i32
      %102 = arith.index_cast %101 : i32 to index
      %c0_58 = arith.constant 0 : index
      %103 = vector.load %arg17[%102, %c0_58] : memref<256x32xbf16, #tpu.memory_space<vmem>>, vector<128x32xbf16>
      %cst_59 = arith.constant 0.000000e+00 : f32
      %104 = vector.broadcast %cst_59 : f32 to vector<128x32xf32>
      %c0_i32_60 = arith.constant 0 : i32
      %c4_i32_61 = arith.constant 4 : i32
      %105 = arith.addi %c0_i32_60, %c4_i32_61 : i32
      %c1_i32_62 = arith.constant 1 : i32
      %106 = scf.for %arg21 = %c0_i32_60 to %105 step %c1_i32_62 iter_args(%arg22 = %104) -> (vector<128x32xf32>)  : i32 {
        %109 = arith.index_cast %arg21 : i32 to index
        %c0_65 = arith.constant 0 : index
        %c0_66 = arith.constant 0 : index
        %110 = vector.load %arg6[%109, %c0_65, %c0_66] : memref<4x32x32xbf16, #tpu.memory_space<vmem>>, vector<1x32x32xbf16>
        %111 = vector.shape_cast %110 : vector<1x32x32xbf16> to vector<32x32xbf16>
        %cst_67 = arith.constant dense<0.000000e+00> : vector<128x32xf32>
        %112 = tpu.matmul %103, %111, %cst_67 {dimension_numbers = #tpu.dot_dimension_numbers<[1], [0], [0], [1], [0, 0, 1, 1], [], []>} : vector<128x32xbf16>, vector<32x32xbf16>, vector<128x32xf32> -> vector<128x32xf32>
        %113 = arith.truncf %112 : vector<128x32xf32> to vector<128x32xbf16>
        %cst_68 = arith.constant dense<0.000000e+00> : vector<128x256xf32>
        %114 = tpu.matmul %113, %33, %cst_68 {dimension_numbers = #tpu.dot_dimension_numbers<[1], [1], [0], [0], [0, 0, 1, 0], [], []>} : vector<128x32xbf16>, vector<256x32xbf16>, vector<128x256xf32> -> vector<128x256xf32>
        %cst_69 = arith.constant dense<0xFF800000> : vector<128xf32>
        %115 = vector.multi_reduction <maximumf>, %114, %cst_69 [1] : vector<128x256xf32> to vector<128xf32>
        %116 = vector.shape_cast %115 : vector<128xf32> to vector<128x1xf32>
        %117 = vector.broadcast %116 : vector<128x1xf32> to vector<128x256xf32>
        %118 = arith.subf %114, %117 : vector<128x256xf32>
        %119 = math.exp %118 : vector<128x256xf32>
        %cst_70 = arith.constant dense<0.000000e+00> : vector<128xf32>
        %120 = vector.multi_reduction <add>, %119, %cst_70 [1] : vector<128x256xf32> to vector<128xf32>
        %121 = vector.shape_cast %120 : vector<128xf32> to vector<128x1xf32>
        %122 = tpu.reciprocal %121 {approx = true} : vector<128x1xf32> -> vector<128x1xf32>
        %123 = vector.broadcast %122 : vector<128x1xf32> to vector<128x256xf32>
        %124 = arith.mulf %119, %123 : vector<128x256xf32>
        %125 = arith.truncf %124 : vector<128x256xf32> to vector<128x256xbf16>
        %126 = arith.index_cast %arg21 : i32 to index
        %c0_71 = arith.constant 0 : index
        %c0_72 = arith.constant 0 : index
        %127 = vector.load %arg18[%126, %c0_71, %c0_72] : memref<4x256x32xbf16, #tpu.memory_space<vmem>>, vector<1x256x32xbf16>
        %128 = vector.shape_cast %127 : vector<1x256x32xbf16> to vector<256x32xbf16>
        %cst_73 = arith.constant dense<0.000000e+00> : vector<128x32xf32>
        %129 = tpu.matmul %125, %128, %cst_73 {dimension_numbers = #tpu.dot_dimension_numbers<[1], [0], [0], [1], [0, 0, 1, 1], [], []>} : vector<128x256xbf16>, vector<256x32xbf16>, vector<128x32xf32> -> vector<128x32xf32>
        %130 = arith.addf %arg22, %129 : vector<128x32xf32>
        scf.yield %130 : vector<128x32xf32>
      }
      %c4_i32_63 = arith.constant 4 : i32
      %107 = arith.index_cast %101 : i32 to index
      %c0_64 = arith.constant 0 : index
      %108 = vector.load %arg19[%107, %c0_64] : memref<256x32xf32, #tpu.memory_space<vmem>>, vector<128x32xf32>
      tpu.vector_store %arg19[%107, %c0_64], %106 {strides = array<i32>} : memref<256x32xf32, #tpu.memory_space<vmem>>, vector<128x32xf32>,
    }
    %c2_i32_22 = arith.constant 2 : i32
    %c0_23 = arith.constant 0 : index
    %c0_24 = arith.constant 0 : index
    %36 = vector.load %arg19[%c0_23, %c0_24] : memref<256x32xf32, #tpu.memory_space<vmem>>, vector<256x32xf32>
    %37 = arith.addf %6, %36 : vector<256x32xf32>
    %c0_25 = arith.constant 0 : index
    %c0_26 = arith.constant 0 : index
    %38 = vector.load %arg8[%c0_25, %c0_26] : memref<1x32xf32, #tpu.memory_space<vmem>>, vector<1x32xf32>
    %c0_27 = arith.constant 0 : index
    %c0_28 = arith.constant 0 : index
    %39 = vector.load %arg9[%c0_27, %c0_28] : memref<1x32xf32, #tpu.memory_space<vmem>>, vector<1x32xf32>
    %cst_29 = arith.constant dense<0.000000e+00> : vector<256xf32>
    %40 = vector.multi_reduction <add>, %37, %cst_29 [1] : vector<256x32xf32> to vector<256xf32>
    %41 = vector.shape_cast %40 : vector<256xf32> to vector<256x1xf32>
    %cst_30 = arith.constant 3.200000e+01 : f32
    %42 = vector.broadcast %cst_30 : f32 to vector<256x1xf32>
    %43 = arith.divf %41, %42 : vector<256x1xf32>
    %44 = vector.broadcast %43 : vector<256x1xf32> to vector<256x32xf32>
    %45 = arith.subf %37, %44 : vector<256x32xf32>
    %46 = arith.mulf %45, %45 : vector<256x32xf32>
    %cst_31 = arith.constant dense<0.000000e+00> : vector<256xf32>
    %47 = vector.multi_reduction <add>, %46, %cst_31 [1] : vector<256x32xf32> to vector<256xf32>
    %48 = vector.shape_cast %47 : vector<256xf32> to vector<256x1xf32>
    %cst_32 = arith.constant 3.200000e+01 : f32
    %49 = vector.broadcast %cst_32 : f32 to vector<256x1xf32>
    %50 = arith.divf %48, %49 : vector<256x1xf32>
    %51 = vector.broadcast %43 : vector<256x1xf32> to vector<256x32xf32>
    %52 = arith.subf %37, %51 : vector<256x32xf32>
    %cst_33 = arith.constant 9.99999974E-6 : f32
    %53 = vector.broadcast %cst_33 : f32 to vector<256x1xf32>
    %54 = arith.addf %50, %53 : vector<256x1xf32>
    %55 = math.rsqrt %54 : vector<256x1xf32>
    %56 = vector.broadcast %55 : vector<256x1xf32> to vector<256x32xf32>
    %57 = arith.mulf %52, %56 : vector<256x32xf32>
    %58 = vector.broadcast %38 : vector<1x32xf32> to vector<256x32xf32>
    %59 = arith.mulf %57, %58 : vector<256x32xf32>
    %60 = vector.broadcast %39 : vector<1x32xf32> to vector<256x32xf32>
    %61 = arith.addf %59, %60 : vector<256x32xf32>
    %62 = arith.truncf %61 : vector<256x32xf32> to vector<256x32xbf16>
    %c0_34 = arith.constant 0 : index
    %c0_35 = arith.constant 0 : index
    %63 = vector.load %arg10[%c0_34, %c0_35] : memref<32x128xbf16, #tpu.memory_space<vmem>>, vector<32x128xbf16>
    %cst_36 = arith.constant dense<0.000000e+00> : vector<256x128xf32>
    %64 = tpu.matmul %62, %63, %cst_36 {dimension_numbers = #tpu.dot_dimension_numbers<[1], [0], [0], [1], [0, 0, 1, 1], [], []>} : vector<256x32xbf16>, vector<32x128xbf16>, vector<256x128xf32> -> vector<256x128xf32>
    %c0_37 = arith.constant 0 : index
    %c0_38 = arith.constant 0 : index
    %65 = vector.load %arg11[%c0_37, %c0_38] : memref<1x128xf32, #tpu.memory_space<vmem>>, vector<1x128xf32>
    %66 = vector.broadcast %65 : vector<1x128xf32> to vector<256x128xf32>
    %67 = arith.addf %64, %66 : vector<256x128xf32>
    %68 = arith.mulf %67, %67 : vector<256x128xf32>
    %69 = arith.mulf %67, %68 : vector<256x128xf32>
    %cst_39 = arith.constant 4.471500e-02 : f32
    %70 = vector.broadcast %cst_39 : f32 to vector<256x128xf32>
    %71 = arith.mulf %70, %69 : vector<256x128xf32>
    %72 = arith.addf %67, %71 : vector<256x128xf32>
    %cst_40 = arith.constant 0.797884583 : f32
    %73 = vector.broadcast %cst_40 : f32 to vector<256x128xf32>
    %74 = arith.mulf %73, %72 : vector<256x128xf32>
    %75 = math.tanh %74 : vector<256x128xf32>
    %cst_41 = arith.constant 1.000000e+00 : f32
    %76 = vector.broadcast %cst_41 : f32 to vector<256x128xf32>
    %77 = arith.addf %76, %75 : vector<256x128xf32>
    %cst_42 = arith.constant 5.000000e-01 : f32
    %78 = vector.broadcast %cst_42 : f32 to vector<256x128xf32>
    %79 = arith.mulf %78, %77 : vector<256x128xf32>
    %80 = arith.mulf %67, %79 : vector<256x128xf32>
    %81 = arith.truncf %80 : vector<256x128xf32> to vector<256x128xbf16>
    %c0_43 = arith.constant 0 : index
    %c0_44 = arith.constant 0 : index
    %82 = vector.load %arg12[%c0_43, %c0_44] : memref<128x32xbf16, #tpu.memory_space<vmem>>, vector<128x32xbf16>
    %cst_45 = arith.constant dense<0.000000e+00> : vector<256x32xf32>
    %83 = tpu.matmul %81, %82, %cst_45 {dimension_numbers = #tpu.dot_dimension_numbers<[1], [0], [0], [1], [0, 0, 1, 1], [], []>} : vector<256x128xbf16>, vector<128x32xbf16>, vector<256x32xf32> -> vector<256x32xf32>
    %84 = arith.addf %37, %83 : vector<256x32xf32>
    %c0_46 = arith.constant 0 : index
    %c0_47 = arith.constant 0 : index
    %85 = vector.load %arg13[%c0_46, %c0_47] : memref<1x32xf32, #tpu.memory_space<vmem>>, vector<1x32xf32>
    %86 = vector.broadcast %85 : vector<1x32xf32> to vector<256x32xf32>
    %87 = arith.addf %84, %86 : vector<256x32xf32>
    %cst_48 = arith.constant dense<0.000000e+00> : vector<32xf32>
    %88 = vector.multi_reduction <add>, %87, %cst_48 [0] : vector<256x32xf32> to vector<32xf32>
    %89 = vector.shape_cast %88 : vector<32xf32> to vector<1x32xf32>
    %cst_49 = arith.constant 2.560000e+02 : f32
    %90 = vector.broadcast %cst_49 : f32 to vector<1x32xf32>
    %91 = arith.divf %89, %90 : vector<1x32xf32>
    %92 = arith.truncf %91 : vector<1x32xf32> to vector<1x32xbf16>
    %c0_50 = arith.constant 0 : index
    %c0_51 = arith.constant 0 : index
    %93 = vector.load %arg14[%c0_50, %c0_51] : memref<32x128xbf16, #tpu.memory_space<vmem>>, vector<32x128xbf16>
    %cst_52 = arith.constant dense<0.000000e+00> : vector<1x128xf32>
    %94 = tpu.matmul %92, %93, %cst_52 {dimension_numbers = #tpu.dot_dimension_numbers<[1], [0], [0], [1], [0, 0, 1, 1], [], []>} : vector<1x32xbf16>, vector<32x128xbf16>, vector<1x128xf32> -> vector<1x128xf32>
    %c0_53 = arith.constant 0 : index
    %c0_54 = arith.constant 0 : index
    %95 = vector.load %arg15[%c0_53, %c0_54] : memref<1x128xf32, #tpu.memory_space<vmem>>, vector<1x128xf32>
    %96 = arith.addf %94, %95 : vector<1x128xf32>
    %c0_55 = arith.constant 0 : index
    %c0_56 = arith.constant 0 : index
    %c0_57 = arith.constant 0 : index
    %97 = vector.load %arg16[%c0_55, %c0_56, %c0_57] : memref<1x1x128xf32, #tpu.memory_space<vmem>>, vector<1x1x128xf32>
    %98 = vector.shape_cast %97 : vector<1x1x128xf32> to vector<1x128xf32>
    %99 = vector.shape_cast %96 : vector<1x128xf32> to vector<1x1x128xf32>
    tpu.vector_store %arg16[%c0_55, %c0_56, %c0_57], %99 {strides = array<i32>} : memref<1x1x128xf32, #tpu.memory_space<vmem>>, vector<1x1x128xf32>,
    return
  }
  func.func @transform_0(%arg0: i32) -> (i32, i32, i32) {
    %c0_i32 = arith.constant 0 : i32
    %c0_i32_0 = arith.constant 0 : i32
    %c0_i32_1 = arith.constant 0 : i32
    return %arg0, %c0_i32, %c0_i32_0 : i32, i32, i32
  }
  func.func @transform_1(%arg0: i32) -> (i32, i32) {
    %c0_i32 = arith.constant 0 : i32
    %c0_i32_0 = arith.constant 0 : i32
    %c0_i32_1 = arith.constant 0 : i32
    return %c0_i32, %c0_i32_0 : i32, i32
  }
  func.func @transform_2(%arg0: i32) -> (i32, i32) {
    %c0_i32 = arith.constant 0 : i32
    %c0_i32_0 = arith.constant 0 : i32
    %c0_i32_1 = arith.constant 0 : i32
    return %c0_i32, %c0_i32_0 : i32, i32
  }
  func.func @transform_3(%arg0: i32) -> (i32, i32) {
    %c0_i32 = arith.constant 0 : i32
    %c0_i32_0 = arith.constant 0 : i32
    %c0_i32_1 = arith.constant 0 : i32
    return %c0_i32, %c0_i32_0 : i32, i32
  }
  func.func @transform_4(%arg0: i32) -> (i32, i32) {
    %c0_i32 = arith.constant 0 : i32
    %c0_i32_0 = arith.constant 0 : i32
    %c0_i32_1 = arith.constant 0 : i32
    return %c0_i32, %c0_i32_0 : i32, i32
  }
  func.func @transform_5(%arg0: i32) -> (i32, i32, i32) {
    %c0_i32 = arith.constant 0 : i32
    %c0_i32_0 = arith.constant 0 : i32
    %c0_i32_1 = arith.constant 0 : i32
    %c0_i32_2 = arith.constant 0 : i32
    return %c0_i32, %c0_i32_0, %c0_i32_1 : i32, i32, i32
  }
  func.func @transform_6(%arg0: i32) -> (i32, i32, i32) {
    %c0_i32 = arith.constant 0 : i32
    %c0_i32_0 = arith.constant 0 : i32
    %c0_i32_1 = arith.constant 0 : i32
    %c0_i32_2 = arith.constant 0 : i32
    return %c0_i32, %c0_i32_0, %c0_i32_1 : i32, i32, i32
  }
  func.func @transform_7(%arg0: i32) -> (i32, i32) {
    %c0_i32 = arith.constant 0 : i32
    %c0_i32_0 = arith.constant 0 : i32
    %c0_i32_1 = arith.constant 0 : i32
    return %c0_i32, %c0_i32_0 : i32, i32
  }
  func.func @transform_8(%arg0: i32) -> (i32, i32) {
    %c0_i32 = arith.constant 0 : i32
    %c0_i32_0 = arith.constant 0 : i32
    %c0_i32_1 = arith.constant 0 : i32
    return %c0_i32, %c0_i32_0 : i32, i32
  }
  func.func @transform_9(%arg0: i32) -> (i32, i32) {
    %c0_i32 = arith.constant 0 : i32
    %c0_i32_0 = arith.constant 0 : i32
    %c0_i32_1 = arith.constant 0 : i32
    return %c0_i32, %c0_i32_0 : i32, i32
  }
  func.func @transform_10(%arg0: i32) -> (i32, i32) {
    %c0_i32 = arith.constant 0 : i32
    %c0_i32_0 = arith.constant 0 : i32
    %c0_i32_1 = arith.constant 0 : i32
    return %c0_i32, %c0_i32_0 : i32, i32
  }
  func.func @transform_11(%arg0: i32) -> (i32, i32) {
    %c0_i32 = arith.constant 0 : i32
    %c0_i32_0 = arith.constant 0 : i32
    %c0_i32_1 = arith.constant 0 : i32
    return %c0_i32, %c0_i32_0 : i32, i32
  }
  func.func @transform_12(%arg0: i32) -> (i32, i32) {
    %c0_i32 = arith.constant 0 : i32
    %c0_i32_0 = arith.constant 0 : i32
    %c0_i32_1 = arith.constant 0 : i32
    return %c0_i32, %c0_i32_0 : i32, i32
  }
  func.func @transform_13(%arg0: i32) -> (i32, i32) {
    %c0_i32 = arith.constant 0 : i32
    %c0_i32_0 = arith.constant 0 : i32
    %c0_i32_1 = arith.constant 0 : i32
    return %c0_i32, %c0_i32_0 : i32, i32
  }
  func.func @transform_14(%arg0: i32) -> (i32, i32) {
    %c0_i32 = arith.constant 0 : i32
    %c0_i32_0 = arith.constant 0 : i32
    %c0_i32_1 = arith.constant 0 : i32
    return %c0_i32, %c0_i32_0 : i32, i32
  }
  func.func @transform_15(%arg0: i32) -> (i32, i32, i32) {
    %c0_i32 = arith.constant 0 : i32
    %c0_i32_0 = arith.constant 0 : i32
    %c0_i32_1 = arith.constant 0 : i32
    return %arg0, %c0_i32, %c0_i32_0 : i32, i32, i32
  }
}

</mosaic_0001>

<bundles_post_ra>
// kernel: tpu_custom_call.1
= control target key start
LH: loop header
LB: loop body
LE: loop exit
PB: predicated region body
PF: predicated region fallthrough
CT: control target
= control target key end

     0   :  { %s7696_s0 = inlined_call_operand.vmem [shape: bf16[2,256,4], index: 0, kind: input, shape index: {}]   ;;  %s7697_s1 = inlined_call_operand.vmem [shape: bf16[4,32], index: 1, kind: input, shape index: {}]   ;;  %s7698_s2 = inlined_call_operand.vmem [shape: f32[1,32], index: 2, kind: input, shape index: {}]   ;;  %s7699_s3 = inlined_call_operand.vmem [shape: f32[1,32], index: 3, kind: input, shape index: {}]   ;;  %s7700_s4 = inlined_call_operand.vmem [shape: f32[1,32], index: 4, kind: input, shape index: {}]   ;;  %s7701_s5 = inlined_call_operand.vmem [shape: bf16[4,32,32], index: 5, kind: input, shape index: {}]   ;;  %s7702_s6 = inlined_call_operand.vmem [shape: bf16[4,32,32], index: 6, kind: input, shape index: {}]   ;;  %s7703_s7 = inlined_call_operand.vmem [shape: f32[1,32], index: 7, kind: input, shape index: {}]   ;;  %s7704_s8 = inlined_call_operand.vmem [shape: f32[1,32], index: 8, kind: input, shape index: {}]   ;;  %s7705_s9 = inlined_call_operand.vmem [shape: bf16[32,128], index: 9, kind: input, shape index: {}]   ;;  %s7706_s10 = inlined_call_operand.vmem [shape: f32[1,128], index: 10, kind: input, shape index: {}]   ;;  %s7707_s11 = inlined_call_operand.vmem [shape: bf16[128,32], index: 11, kind: input, shape index: {}]   ;;  %s7708_s12 = inlined_call_operand.vmem [shape: f32[1,32], index: 12, kind: input, shape index: {}]   ;;  %s7709_s13 = inlined_call_operand.vmem [shape: bf16[32,128], index: 13, kind: input, shape index: {}]   ;;  %s7710_s14 = inlined_call_operand.vmem [shape: f32[1,128], index: 14, kind: input, shape index: {}]   ;;  %s7711_s15 = inlined_call_operand.hbm [shape: f32[2,1,128], index: 15, kind: output, shape index: {}]  }
   0x1   :  { %7785 = sst [smem:[#allocation64_spill]] %s7696_s0 }
   0x2   :  { %7786 = sst [smem:[#allocation65_spill]] %s7697_s1 }
   0x3   :  { %20 = vsyncpa [#allocation6], 0 }
   0x4   :  { %22 = vsyncpa [#allocation6 + $0x1], 0  ;;  %s5441_s18 = smov 0   ;;  %s5443_s19 = smov 0  }
   0x5   :  { %s5445_s20 = smov 0   ;;  %s5447_s21 = smov 0  }
   0x6 LB: > { %7787 = sst [smem:[#allocation8_spill]] %s5276_s20  ;;  %s5462_s22 = sadd.s32 4294967295, %s5280_s21   ;;  %s5280_s21 = sphi %s5447_s21, %s7979_s21   ;;  %s5276_s20 = sphi %s5445_s20, %s7976_s20   ;;  %s5272_s19 = sphi %s5443_s19, %s7978_s19   ;;  %s5268_s18 = sphi %s5441_s18, %s7977_s18  }
   0x7   : > { %s4101_s23 = sadd.s32 4294967294, %s5280_s21   ;;  %s5466_s24 = sadd.s32 1, %s5280_s21  }
   0x8   : > { %s355_s25 = sadd.s32 1, %s5276_s20  ;;  %s352_s26 = ssub.s32 %s5280_s21, %s5466_s24 }
   0x9   : > { %p365_p0 = scmp.ne.s32.totalorder %s5276_s20, %s5272_s19  ;;  %p353_p1 = scmp.eq.s32.totalorder %s352_s26, 0 }
   0xa   : > { %p366_p2 = scmp.eq.s32.totalorder %s5462_s22, 1  ;;  %p371_p3 = scmp.ne.s32.totalorder %s5272_s19, %s5268_s18 }
   0xb   : > { %p372_p4 = scmp.eq.s32.totalorder %s4101_s23, 1  ;;  %p4104_p7 = scmp.ge.s32.totalorder %s5280_s21, 1 }
   0xc   : > { %s5477_s27 = scalar_select %p353_p1, %s5276_s20, %s355_s25  }
   0xd   : > { %p5479_p5 = por %p366_p2, %p365_p0  ;;  %p5483_p6 = por %p372_p4, %p371_p3 }
   0xe   : > { %7788 = sst [smem:[#allocation9_spill]] %s5477_s27  ;;  %p440_p8 = scmp.lt.s32.totalorder %s5280_s21, 3 }
  0x10   : > { %p441_p9 = pnand %p4104_p7, %p440_p8 }
  0x12   : > { %444 = sbr.rel (%p441_p9) target bundleno = 3066 (0xbfa), region = 80 }
  0x19   : > { %s7732_s30 = sand.u32 1, %s5272_s19   ;;  %s7791_s1 = sld [smem:[#allocation65_spill]]  ;;  %vm662_vm0 = vcmask 1041408   ;;  %vm613_vm1 = vcmask 31744   ;;  %v5535_v18 = vld [vmem:[%s7698_s2] ss:$0 sm:$0xff] }
  0x1a   : > { %p487_p10 = scmp.lt.s32.totalorder %s5462_s22, 1  ;;  %s7792_s0 = sld [smem:[#allocation64_spill]]  ;;  %vm829_vm2 = vcmask 261120  }
  0x1b   : > { %s6045_s26 = scalar_lea.vmem [#allocation5], %s7732_s30  ;;  %s6047_s27 = smov 0  }
  0x1c   : > { %s488_s23 = scalar_select %p487_p10, %s5462_s22, 1 }
  0x1e   : > { %s4224_s25 = sshll.u32 %s488_s23, 7 }
  0x1f   : > { %v525_v0 = vld [vmem:[%s7791_s1] sm:$0x3] }
  0x20   : > { %4619 = vmatprep.subr.msk.bf16.mxu0 %vm662_vm0, %v525_v0  ;;  %4620 = vmatprep.subr.msk.bf16.mxu1 %vm662_vm0, %v525_v0  ;;  %v664_v1 = vsel %vm662_vm0, %v525_v0, 0  ;;  %s5498_s20 = scalar_lea.vmem %s7792_s0, %s4224_s25 }
  0x21   : > { %4416 = vmatpush3.bf16.msra.mxu0 %v664_v1  ;;  %4598 = vmatpush3.bf16.msra.mxu1 %v664_v1  ;;  %v4822_v2 = vld [vmem:[%s5498_s20] sm:$0xff]   ;;  %v4824_v4 = vld [vmem:[%s5498_s20 + $0x8] sm:$0xff]   ;;  %v4826_v6 = vld [vmem:[%s5498_s20 + $0x10] sm:$0xff]  }
  0x22   : > { %v4823_v3 = vld [vmem:[%s5498_s20 + $0x40] sm:$0xff]   ;;  %4417 = vmatprep.mubr.msk.bf16.mxu0 %vm613_vm1, %v4822_v2  ;;  %v4825_v5 = vld [vmem:[%s5498_s20 + $0x48] sm:$0xff]   ;;  %v4828_v7 = vld [vmem:[%s5498_s20 + $0x50] sm:$0xff]  }
  0x23   : > { %4433 = vmatprep.mubr.msk.bf16.mxu1 %vm613_vm1, %v4823_v3  ;;  %v4827_v8 = vld [vmem:[%s5498_s20 + $0x18] sm:$0xff]   ;;  %v4830_v10 = vld [vmem:[%s5498_s20 + $0x20] sm:$0xff]   ;;  %v4831_v12 = vld [vmem:[%s5498_s20 + $0x28] sm:$0xff]  }
  0x24   : > { %4418 = vmatmul.mubr.msk.bf16.vlgmr.msra.gmra.mrb[0].mxu0 %vm613_vm1, %v4824_v4  ;;  %4434 = vmatmul.mubr.msk.bf16.vlgmr.msra.gmra.mrb[0].mxu1 %vm613_vm1, %v4825_v5  ;;  %v4829_v9 = vld [vmem:[%s5498_s20 + $0x58] sm:$0xff]   ;;  %v4832_v11 = vld [vmem:[%s5498_s20 + $0x60] sm:$0xff]   ;;  %v4833_v13 = vld [vmem:[%s5498_s20 + $0x68] sm:$0xff]  }
  0x25   : > { %4421 = vmatprep.mubr.msk.bf16.mxu0 %vm613_vm1, %v4826_v6  ;;  %4437 = vmatprep.mubr.msk.bf16.mxu1 %vm613_vm1, %v4828_v7  ;;  %v4834_v14 = vld [vmem:[%s5498_s20 + $0x30] sm:$0xff]   ;;  %v4835_v16 = vld [vmem:[%s5498_s20 + $0x38] sm:$0xff]  }
  0x26   : > { %v4836_v15 = vld [vmem:[%s5498_s20 + $0x70] sm:$0xff]   ;;  %v4837_v17 = vld [vmem:[%s5498_s20 + $0x78] sm:$0xff]  }
  0x2c   : > { %4422 = vmatmul.mubr.msk.bf16.gmra.mrb[4].mxu0 %vm613_vm1, %v4827_v8  ;;  %4438 = vmatmul.mubr.msk.bf16.gmra.mrb[4].mxu1 %vm613_vm1, %v4829_v9 }
  0x2d   : > { %4425 = vmatprep.mubr.msk.bf16.mxu0 %vm613_vm1, %v4830_v10  ;;  %4441 = vmatprep.mubr.msk.bf16.mxu1 %vm613_vm1, %v4832_v11 }
  0x34   : > { %4426 = vmatmul.mubr.msk.bf16.gmra.mrb[8].mxu0 %vm613_vm1, %v4831_v12  ;;  %4442 = vmatmul.mubr.msk.bf16.gmra.mrb[8].mxu1 %vm613_vm1, %v4833_v13 }
  0x35   : > { %4429 = vmatprep.mubr.msk.bf16.mxu0 %vm613_vm1, %v4834_v14  ;;  %4445 = vmatprep.mubr.msk.bf16.mxu1 %vm613_vm1, %v4836_v15 }
  0x3c   : > { %4430 = vmatmul.mubr.msk.bf16.gmra.mrb[12].mxu0 %vm613_vm1, %v4835_v16  ;;  %4446 = vmatmul.mubr.msk.bf16.gmra.mrb[12].mxu1 %vm613_vm1, %v4837_v17 }
  0xf7   : > { %v4419_v19 = vpop.f32.mrb[0].mxu0  ;;  %v4435_v21 = vpop.f32.mrb[0].mxu1 }
  0xf8   : > { %v5538_v20 = vadd.f32 %v4419_v19, %v5535_v18  ;;  %v700_v22 = vpop.f32.mrb[1].mxu0  ;;  %v5541_v23 = vadd.f32 %v4435_v21, %v5535_v18  ;;  %v764_v24 = vpop.f32.mrb[1].mxu1 }
  0xf9   : > { %v4420_v25 = vpop.f32.mrb[2].mxu0  ;;  %v4436_v27 = vpop.f32.mrb[2].mxu1  ;;  %v5549_v30 = vadd.f32 %v5535_v18, %v700_v22  ;;  %v5559_v35 = vadd.f32 %v5535_v18, %v764_v24 }
  0xfa   : > { %7793 = vst [vmem:[#allocation10_spill] sm:$0xff] %v5541_v23  ;;  %v5544_v26 = vadd.f32 %v4420_v25, %v5535_v18  ;;  %v703_v28 = vpop.f32.mrb[3].mxu0  ;;  %v836_v29 = vsel %vm829_vm2, %v5538_v20, 0.0  ;;  %v767_v31 = vpop.f32.mrb[3].mxu1  ;;  %v884_v32 = vsel %vm829_vm2, %v5541_v23, 0.0  ;;  %v5554_v33 = vadd.f32 %v4436_v27, %v5535_v18 }
  0xfb   : > { %837 = vadd.xlane.f32.xlu1 %v836_v29  ;;  %885 = vadd.xlane.f32.xlu0 %v884_v32  ;;  %7796 = vst [vmem:[#allocation13_spill] sm:$0xff] %v5559_v35  ;;  %v830_v36 = vsel %vm829_vm2, %v5549_v30, 0.0  ;;  %v5564_v42 = vadd.f32 %v5535_v18, %v767_v31  ;;  %v5569_v46 = vadd.f32 %v5535_v18, %v703_v28  ;;  %v878_v47 = vsel %vm829_vm2, %v5559_v35, 0.0 }
  0xfc   : > { %7794 = vst [vmem:[#allocation11_spill] sm:$0xff] %v5544_v26  ;;  %7795 = vst [vmem:[#allocation12_spill] sm:$0xff] %v5554_v33  ;;  %v839_v34 = vsel %vm829_vm2, %v5544_v26, 0.0  ;;  %v887_v43 = vsel %vm829_vm2, %v5554_v33, 0.0 }
  0xfd   : > { %7797 = vst [vmem:[#allocation14_spill] sm:$0xff] %v5564_v42  ;;  %7798 = vst [vmem:[#allocation15_spill] sm:$0xff] %v5569_v46  ;;  %v881_v51 = vsel %vm829_vm2, %v5564_v42, 0.0  ;;  %v833_v52 = vsel %vm829_vm2, %v5569_v46, 0.0 }
  0xff   : > { %840 = vadd.xlane.f32.xlu1 %v839_v34  ;;  %v4423_v37 = vpop.f32.mrb[4].mxu0  ;;  %831 = vadd.xlane.f32.xlu0 %v830_v36  ;;  %v4439_v39 = vpop.f32.mrb[4].mxu1 }
 0x100   : > { %v716_v38 = vpop.f32.mrb[5].mxu0  ;;  %v780_v41 = vpop.f32.mrb[5].mxu1  ;;  %v5577_v50 = vadd.f32 %v4423_v37, %v5535_v18  ;;  %v5589_v58 = vadd.f32 %v4439_v39, %v5535_v18 }
 0x101   : > { %v4424_v40 = vpop.f32.mrb[6].mxu0  ;;  %v4440_v45 = vpop.f32.mrb[6].mxu1  ;;  %v5601_v4 = vadd.f32 %v5535_v18, %v716_v38  ;;  %v5609_v14 = vadd.f32 %v5535_v18, %v780_v41 }
 0x102   : > { %v719_v44 = vpop.f32.mrb[7].mxu0  ;;  %v783_v48 = vpop.f32.mrb[7].mxu1  ;;  %v5574_v49 = vadd.f32 %v4424_v40, %v5535_v18  ;;  %7800 = vst [vmem:[#allocation17_spill] sm:$0xff] %v5577_v50  ;;  %v5584_v54 = vadd.f32 %v4440_v45, %v5535_v18  ;;  %7802 = vst [vmem:[#allocation19_spill] sm:$0xff] %v5589_v58  ;;  %v848_v59 = vsel %vm829_vm2, %v5577_v50, 0.0  ;;  %v896_v2 = vsel %vm829_vm2, %v5589_v58, 0.0 }
 0x103   : > { %888 = vadd.xlane.f32.xlu1 %v887_v43  ;;  %879 = vadd.xlane.f32.xlu0 %v878_v47  ;;  %v5598_v3 = vadd.f32 %v5535_v18, %v719_v44  ;;  %7804 = vst [vmem:[#allocation21_spill] sm:$0xff] %v5601_v4  ;;  %v5604_v10 = vadd.f32 %v5535_v18, %v783_v48  ;;  %7806 = vst [vmem:[#allocation23_spill] sm:$0xff] %v5609_v14  ;;  %v842_v15 = vsel %vm829_vm2, %v5601_v4, 0.0 }
 0x104   : > { %7799 = vst [vmem:[#allocation16_spill] sm:$0xff] %v5574_v49  ;;  %7801 = vst [vmem:[#allocation18_spill] sm:$0xff] %v5584_v54  ;;  %v851_v55 = vsel %vm829_vm2, %v5574_v49, 0.0  ;;  %v899_v1 = vsel %vm829_vm2, %v5584_v54, 0.0  ;;  %v890_v22 = vsel %vm829_vm2, %v5609_v14, 0.0 }
 0x105   : > { %7803 = vst [vmem:[#allocation20_spill] sm:$0xff] %v5598_v3  ;;  %7805 = vst [vmem:[#allocation22_spill] sm:$0xff] %v5604_v10  ;;  %v845_v11 = vsel %vm829_vm2, %v5598_v3, 0.0  ;;  %v893_v21 = vsel %vm829_vm2, %v5604_v10, 0.0 }
 0x107   : > { %882 = vadd.xlane.f32.xlu1 %v881_v51  ;;  %v4427_v53 = vpop.f32.mrb[8].mxu0  ;;  %834 = vadd.xlane.f32.xlu0 %v833_v52  ;;  %v4443_v57 = vpop.f32.mrb[8].mxu1 }
 0x108   : > { %v732_v56 = vpop.f32.mrb[9].mxu0  ;;  %v796_v61 = vpop.f32.mrb[9].mxu1  ;;  %v5617_v19 = vadd.f32 %v4427_v53, %v5535_v18  ;;  %v5629_v27 = vadd.f32 %v4443_v57, %v5535_v18 }
 0x109   : > { %v4428_v60 = vpop.f32.mrb[10].mxu0  ;;  %v4444_v63 = vpop.f32.mrb[10].mxu1  ;;  %v5641_v34 = vadd.f32 %v5535_v18, %v732_v56  ;;  %v5649_v38 = vadd.f32 %v5535_v18, %v796_v61 }
 0x10a   : > { %v735_v62 = vpop.f32.mrb[11].mxu0  ;;  %v799_v0 = vpop.f32.mrb[11].mxu1  ;;  %v5614_v17 = vadd.f32 %v4428_v60, %v5535_v18  ;;  %7808 = vst [vmem:[#allocation25_spill] sm:$0xff] %v5617_v19  ;;  %v5624_v24 = vadd.f32 %v4444_v63, %v5535_v18  ;;  %7810 = vst [vmem:[#allocation27_spill] sm:$0xff] %v5629_v27  ;;  %v860_v28 = vsel %vm829_vm2, %v5617_v19, 0.0  ;;  %v908_v31 = vsel %vm829_vm2, %v5629_v27, 0.0 }
 0x10b   : > { %852 = vadd.xlane.f32.xlu1 %v851_v55  ;;  %849 = vadd.xlane.f32.xlu0 %v848_v59  ;;  %v5638_v32 = vadd.f32 %v5535_v18, %v735_v62  ;;  %7812 = vst [vmem:[#allocation29_spill] sm:$0xff] %v5641_v34  ;;  %v5644_v36 = vadd.f32 %v5535_v18, %v799_v0  ;;  %7814 = vst [vmem:[#allocation31_spill] sm:$0xff] %v5649_v38  ;;  %v854_v39 = vsel %vm829_vm2, %v5641_v34, 0.0 }
 0x10c   : > { %7807 = vst [vmem:[#allocation24_spill] sm:$0xff] %v5614_v17  ;;  %7809 = vst [vmem:[#allocation26_spill] sm:$0xff] %v5624_v24  ;;  %v863_v25 = vsel %vm829_vm2, %v5614_v17, 0.0  ;;  %v911_v29 = vsel %vm829_vm2, %v5624_v24, 0.0  ;;  %v902_v44 = vsel %vm829_vm2, %v5649_v38, 0.0 }
 0x10d   : > { %7811 = vst [vmem:[#allocation28_spill] sm:$0xff] %v5638_v32  ;;  %7813 = vst [vmem:[#allocation30_spill] sm:$0xff] %v5644_v36  ;;  %v857_v37 = vsel %vm829_vm2, %v5638_v32, 0.0  ;;  %v905_v43 = vsel %vm829_vm2, %v5644_v36, 0.0 }
 0x10f   : > { %900 = vadd.xlane.f32.xlu1 %v899_v1  ;;  %v4431_v5 = vpop.f32.mrb[12].mxu0  ;;  %897 = vadd.xlane.f32.xlu0 %v896_v2  ;;  %v4447_v7 = vpop.f32.mrb[12].mxu1 }
 0x110   : > { %v748_v6 = vpop.f32.mrb[13].mxu0  ;;  %v812_v9 = vpop.f32.mrb[13].mxu1  ;;  %v5657_v41 = vadd.f32 %v4431_v5, %v5535_v18  ;;  %v5691_v61 = vadd.f32 %v4447_v7, %v5535_v18 }
 0x111   : > { %v4432_v8 = vpop.f32.mrb[14].mxu0  ;;  %v4448_v13 = vpop.f32.mrb[14].mxu1  ;;  %v5671_v51 = vadd.f32 %v5535_v18, %v748_v6  ;;  %v5677_v53 = vadd.f32 %v5535_v18, %v812_v9 }
 0x112   : > { %v751_v12 = vpop.f32.mrb[15].mxu0  ;;  %v815_v16 = vpop.f32.mrb[15].mxu1  ;;  %v5654_v40 = vadd.f32 %v4432_v8, %v5535_v18  ;;  %7816 = vst [vmem:[#allocation33_spill] sm:$0xff] %v5657_v41  ;;  %v872_v47 = vsel %vm829_vm2, %v5657_v41, 0.0  ;;  %v5688_v60 = vadd.f32 %v4448_v13, %v5535_v18  ;;  %7822 = vst [vmem:[#allocation39_spill] sm:$0xff] %v5691_v61  ;;  %v920_v63 = vsel %vm829_vm2, %v5691_v61, 0.0 }
 0x113   : > { %846 = vadd.xlane.f32.xlu1 %v845_v11  ;;  %843 = vadd.xlane.f32.xlu0 %v842_v15  ;;  %v5668_v48 = vadd.f32 %v5535_v18, %v751_v12  ;;  %7818 = vst [vmem:[#allocation35_spill] sm:$0xff] %v5671_v51  ;;  %v5674_v52 = vadd.f32 %v5535_v18, %v815_v16  ;;  %7820 = vst [vmem:[#allocation37_spill] sm:$0xff] %v5677_v53  ;;  %v866_v56 = vsel %vm829_vm2, %v5671_v51, 0.0 }
 0x114   : > { %7815 = vst [vmem:[#allocation32_spill] sm:$0xff] %v5654_v40  ;;  %v875_v45 = vsel %vm829_vm2, %v5654_v40, 0.0  ;;  %v914_v59 = vsel %vm829_vm2, %v5677_v53, 0.0  ;;  %7821 = vst [vmem:[#allocation38_spill] sm:$0xff] %v5688_v60  ;;  %v923_v62 = vsel %vm829_vm2, %v5688_v60, 0.0 }
 0x115   : > { %7817 = vst [vmem:[#allocation34_spill] sm:$0xff] %v5668_v48  ;;  %7819 = vst [vmem:[#allocation36_spill] sm:$0xff] %v5674_v52  ;;  %v869_v55 = vsel %vm829_vm2, %v5668_v48, 0.0  ;;  %v917_v57 = vsel %vm829_vm2, %v5674_v52, 0.0 }
 0x117   : > { %894 = vadd.xlane.f32.xlu1 %v893_v21  ;;  %891 = vadd.xlane.f32.xlu0 %v890_v22 }
 0x11b   : > { %864 = vadd.xlane.f32.xlu1 %v863_v25  ;;  %861 = vadd.xlane.f32.xlu0 %v860_v28 }
 0x11f   : > { %912 = vadd.xlane.f32.xlu1 %v911_v29  ;;  %909 = vadd.xlane.f32.xlu0 %v908_v31 }
 0x123   : > { %858 = vadd.xlane.f32.xlu1 %v857_v37  ;;  %855 = vadd.xlane.f32.xlu0 %v854_v39 }
 0x127   : > { %906 = vadd.xlane.f32.xlu1 %v905_v43  ;;  %903 = vadd.xlane.f32.xlu0 %v902_v44 }
 0x12b   : > { %876 = vadd.xlane.f32.xlu1 %v875_v45  ;;  %873 = vadd.xlane.f32.xlu0 %v872_v47 }
 0x12f   : > { %870 = vadd.xlane.f32.xlu1 %v869_v55  ;;  %867 = vadd.xlane.f32.xlu0 %v866_v56 }
 0x133   : > { %918 = vadd.xlane.f32.xlu1 %v917_v57  ;;  %915 = vadd.xlane.f32.xlu0 %v914_v59 }
 0x137   : > { %924 = vadd.xlane.f32.xlu1 %v923_v62  ;;  %921 = vadd.xlane.f32.xlu0 %v920_v63 }
 0x188   : > { %v838_v0 = vpop.xlane.xlu1 %837  ;;  %v886_v1 = vpop.xlane.xlu0 %885 }
 0x189   : > { %v929_v2 = vmul.f32 0.03125, %v838_v0  ;;  %v945_v5 = vmul.f32 0.03125, %v886_v1 }
 0x18b   : > { %v5698_v6 = vsub.f32 %v5538_v20, %v929_v2  ;;  %v5701_v18 = vsub.f32 %v5541_v23, %v945_v5 }
 0x18c   : > { %v841_v7 = vpop.xlane.xlu1 %840  ;;  %v832_v9 = vpop.xlane.xlu0 %831 }
 0x18d   : > { %v930_v8 = vmul.f32 0.03125, %v841_v7  ;;  %v993_v11 = vmul.f32 %v5698_v6, %v5698_v6  ;;  %v927_v12 = vmul.f32 0.03125, %v832_v9  ;;  %v1009_v16 = vmul.f32 %v5701_v18, %v5701_v18 }
 0x18f   : > { %v5706_v13 = vsub.f32 %v5544_v26, %v930_v8  ;;  %v1029_v15 = vsel %vm829_vm2, %v993_v11, 0.0  ;;  %v5712_v21 = vsub.f32 %v5549_v30, %v927_v12  ;;  %v1077_v43 = vsel %vm829_vm2, %v1009_v16, 0.0 }
 0x190   : > { %v889_v22 = vpop.xlane.xlu1 %888  ;;  %1030 = vadd.xlane.f32.xlu0 %v1029_v15  ;;  %v880_v28 = vpop.xlane.xlu0 %879 }
 0x191   : > { %v946_v25 = vmul.f32 0.03125, %v889_v22  ;;  %v994_v29 = vmul.f32 %v5706_v13, %v5706_v13  ;;  %v943_v31 = vmul.f32 0.03125, %v880_v28  ;;  %v991_v44 = vmul.f32 %v5712_v21, %v5712_v21 }
 0x193   : > { %v5717_v37 = vsub.f32 %v5554_v33, %v946_v25  ;;  %v1032_v39 = vsel %vm829_vm2, %v994_v29, 0.0  ;;  %v5724_v45 = vsub.f32 %v5559_v35, %v943_v31  ;;  %v1023_v63 = vsel %vm829_vm2, %v991_v44, 0.0 }
 0x194   : > { %v883_v47 = vpop.xlane.xlu1 %882  ;;  %1033 = vadd.xlane.f32.xlu1 %v1032_v39  ;;  %1078 = vadd.xlane.f32.xlu0 %v1077_v43  ;;  %v835_v56 = vpop.xlane.xlu0 %834 }
 0x195   : > { %v944_v55 = vmul.f32 0.03125, %v883_v47  ;;  %v1010_v57 = vmul.f32 %v5717_v37, %v5717_v37  ;;  %v928_v59 = vmul.f32 0.03125, %v835_v56  ;;  %v1007_v0 = vmul.f32 %v5724_v45, %v5724_v45 }
 0x197   : > { %v1080_v62 = vsel %vm829_vm2, %v1010_v57, 0.0  ;;  %v5733_v1 = vsub.f32 %v5564_v42, %v944_v55  ;;  %v5736_v2 = vsub.f32 %v5569_v46, %v928_v59  ;;  %v1071_v15 = vsel %vm829_vm2, %v1007_v0, 0.0 }
 0x198   : > { %v853_v5 = vpop.xlane.xlu1 %852  ;;  %1081 = vadd.xlane.f32.xlu1 %v1080_v62  ;;  %1024 = vadd.xlane.f32.xlu0 %v1023_v63  ;;  %v850_v8 = vpop.xlane.xlu0 %849 }
 0x199   : > { %v934_v7 = vmul.f32 0.03125, %v853_v5  ;;  %v933_v9 = vmul.f32 0.03125, %v850_v8  ;;  %v992_v11 = vmul.f32 %v5736_v2, %v5736_v2  ;;  %v1008_v28 = vmul.f32 %v5733_v1, %v5733_v1 }
 0x19b   : > { %v5741_v12 = vsub.f32 %v5574_v49, %v934_v7  ;;  %v5745_v16 = vsub.f32 %v5577_v50, %v933_v9  ;;  %v1026_v25 = vsel %vm829_vm2, %v992_v11, 0.0  ;;  %v1074_v57 = vsel %vm829_vm2, %v1008_v28, 0.0 }
 0x19c   : > { %v901_v22 = vpop.xlane.xlu1 %900  ;;  %1072 = vadd.xlane.f32.xlu0 %v1071_v15  ;;  %1027 = vadd.xlane.f32.xlu1 %v1026_v25  ;;  %v898_v31 = vpop.xlane.xlu0 %897 }
 0x19d   : > { %v950_v29 = vmul.f32 0.03125, %v901_v22  ;;  %v949_v39 = vmul.f32 0.03125, %v898_v31  ;;  %v997_v43 = vmul.f32 %v5745_v16, %v5745_v16  ;;  %v998_v44 = vmul.f32 %v5741_v12, %v5741_v12 }
 0x19f   : > { %v5755_v47 = vsub.f32 %v5584_v54, %v950_v29  ;;  %v5758_v55 = vsub.f32 %v5589_v58, %v949_v39  ;;  %v1041_v59 = vsel %vm829_vm2, %v997_v43, 0.0  ;;  %v1044_v7 = vsel %vm829_vm2, %v998_v44, 0.0 }
 0x1a0   : > { %v847_v56 = vpop.xlane.xlu1 %846  ;;  %1075 = vadd.xlane.f32.xlu1 %v1074_v57  ;;  %1042 = vadd.xlane.f32.xlu0 %v1041_v59  ;;  %v844_v63 = vpop.xlane.xlu0 %843 }
 0x1a1   : > { %v932_v62 = vmul.f32 0.03125, %v847_v56  ;;  %v931_v0 = vmul.f32 0.03125, %v844_v63  ;;  %v1013_v5 = vmul.f32 %v5758_v55, %v5758_v55  ;;  %v1014_v22 = vmul.f32 %v5755_v47, %v5755_v47 }
 0x1a3   : > { %v5766_v8 = vsub.f32 %v5598_v3, %v932_v62  ;;  %v5769_v9 = vsub.f32 %v5601_v4, %v931_v0  ;;  %v1089_v15 = vsel %vm829_vm2, %v1013_v5, 0.0  ;;  %v1092_v56 = vsel %vm829_vm2, %v1014_v22, 0.0 }
 0x1a4   : > { %v895_v11 = vpop.xlane.xlu1 %894  ;;  %1045 = vadd.xlane.f32.xlu1 %v1044_v7  ;;  %1090 = vadd.xlane.f32.xlu0 %v1089_v15  ;;  %v892_v28 = vpop.xlane.xlu0 %891 }
 0x1a5   : > { %v948_v25 = vmul.f32 0.03125, %v895_v11  ;;  %v947_v29 = vmul.f32 0.03125, %v892_v28  ;;  %v995_v31 = vmul.f32 %v5769_v9, %v5769_v9  ;;  %v996_v59 = vmul.f32 %v5766_v8, %v5766_v8 }
 0x1a7   : > { %v5777_v39 = vsub.f32 %v5604_v10, %v948_v25  ;;  %v5780_v43 = vsub.f32 %v5609_v14, %v947_v29  ;;  %v1035_v57 = vsel %vm829_vm2, %v995_v31, 0.0  ;;  %v1038_v25 = vsel %vm829_vm2, %v996_v59, 0.0 }
 0x1a8   : > { %v865_v44 = vpop.xlane.xlu1 %864  ;;  %1093 = vadd.xlane.f32.xlu1 %v1092_v56  ;;  %1036 = vadd.xlane.f32.xlu0 %v1035_v57  ;;  %v862_v63 = vpop.xlane.xlu0 %861 }
 0x1a9   : > { %v938_v62 = vmul.f32 0.03125, %v865_v44  ;;  %v937_v0 = vmul.f32 0.03125, %v862_v63  ;;  %v1011_v5 = vmul.f32 %v5780_v43, %v5780_v43  ;;  %v1012_v7 = vmul.f32 %v5777_v39, %v5777_v39 }
 0x1ab   : > { %v5791_v11 = vsub.f32 %v5614_v17, %v938_v62  ;;  %v5794_v15 = vsub.f32 %v5617_v19, %v937_v0  ;;  %v1083_v28 = vsel %vm829_vm2, %v1011_v5, 0.0  ;;  %v1086_v57 = vsel %vm829_vm2, %v1012_v7, 0.0 }
 0x1ac   : > { %v913_v22 = vpop.xlane.xlu1 %912  ;;  %1039 = vadd.xlane.f32.xlu1 %v1038_v25  ;;  %1084 = vadd.xlane.f32.xlu0 %v1083_v28  ;;  %v910_v31 = vpop.xlane.xlu0 %909 }
 0x1ad   : > { %v954_v29 = vmul.f32 0.03125, %v913_v22  ;;  %v953_v44 = vmul.f32 0.03125, %v910_v31  ;;  %v1001_v56 = vmul.f32 %v5794_v15, %v5794_v15  ;;  %v1002_v5 = vmul.f32 %v5791_v11, %v5791_v11 }
 0x1af   : > { %v5802_v62 = vsub.f32 %v5624_v24, %v954_v29  ;;  %v5805_v63 = vsub.f32 %v5629_v27, %v953_v44  ;;  %v1053_v59 = vsel %vm829_vm2, %v1001_v56, 0.0  ;;  %v1056_v56 = vsel %vm829_vm2, %v1002_v5, 0.0 }
 0x1b0   : > { %v859_v0 = vpop.xlane.xlu1 %858  ;;  %1087 = vadd.xlane.f32.xlu1 %v1086_v57  ;;  %1054 = vadd.xlane.f32.xlu0 %v1053_v59  ;;  %v856_v25 = vpop.xlane.xlu0 %855 }
 0x1b1   : > { %v936_v22 = vmul.f32 0.03125, %v859_v0  ;;  %v935_v28 = vmul.f32 0.03125, %v856_v25  ;;  %v1017_v7 = vmul.f32 %v5805_v63, %v5805_v63  ;;  %v1018_v57 = vmul.f32 %v5802_v62, %v5802_v62 }
 0x1b3   : > { %v5813_v29 = vsub.f32 %v5638_v32, %v936_v22  ;;  %v5816_v31 = vsub.f32 %v5641_v34, %v935_v28  ;;  %v1101_v24 = vsel %vm829_vm2, %v1017_v7, 0.0  ;;  %v1104_v54 = vsel %vm829_vm2, %v1018_v57, 0.0 }
 0x1b4   : > { %v907_v44 = vpop.xlane.xlu1 %906  ;;  %1057 = vadd.xlane.f32.xlu1 %v1056_v56  ;;  %1102 = vadd.xlane.f32.xlu0 %v1101_v24  ;;  %v904_v59 = vpop.xlane.xlu0 %903 }
 0x1b5   : > { %v952_v0 = vmul.f32 0.03125, %v907_v44  ;;  %v951_v25 = vmul.f32 0.03125, %v904_v59  ;;  %v999_v22 = vmul.f32 %v5816_v31, %v5816_v31  ;;  %v1000_v28 = vmul.f32 %v5813_v29, %v5813_v29 }
 0x1b7   : > { %v5827_v27 = vsub.f32 %v5644_v36, %v952_v0  ;;  %v5830_v5 = vsub.f32 %v5649_v38, %v951_v25  ;;  %v1047_v44 = vsel %vm829_vm2, %v999_v22, 0.0  ;;  %v1050_v10 = vsel %vm829_vm2, %v1000_v28, 0.0 }
 0x1b8   : > { %v877_v7 = vpop.xlane.xlu1 %876  ;;  %1105 = vadd.xlane.f32.xlu1 %v1104_v54  ;;  %1048 = vadd.xlane.f32.xlu0 %v1047_v44  ;;  %v874_v56 = vpop.xlane.xlu0 %873 }
 0x1b9   : > { %v942_v24 = vmul.f32 0.03125, %v877_v7  ;;  %v941_v59 = vmul.f32 0.03125, %v874_v56  ;;  %v1015_v58 = vmul.f32 %v5830_v5, %v5830_v5  ;;  %v1016_v54 = vmul.f32 %v5827_v27, %v5827_v27 }
 0x1bb   : > { %v5838_v0 = vsub.f32 %v5654_v40, %v942_v24  ;;  %v5841_v25 = vsub.f32 %v5657_v41, %v941_v59  ;;  %v1095_v57 = vsel %vm829_vm2, %v1015_v58, 0.0  ;;  %v1098_v58 = vsel %vm829_vm2, %v1016_v54, 0.0 }
 0x1bc   : > { %v871_v36 = vpop.xlane.xlu1 %870  ;;  %1051 = vadd.xlane.f32.xlu1 %v1050_v10  ;;  %1096 = vadd.xlane.f32.xlu0 %v1095_v57  ;;  %v868_v7 = vpop.xlane.xlu0 %867 }
 0x1bd   : > { %v940_v22 = vmul.f32 0.03125, %v871_v36  ;;  %v939_v44 = vmul.f32 0.03125, %v868_v7  ;;  %v1005_v28 = vmul.f32 %v5841_v25, %v5841_v25  ;;  %v1006_v10 = vmul.f32 %v5838_v0, %v5838_v0 }
 0x1bf   : > { %v5849_v24 = vsub.f32 %v5668_v48, %v940_v22  ;;  %v5852_v56 = vsub.f32 %v5671_v51, %v939_v44  ;;  %v1065_v38 = vsel %vm829_vm2, %v1005_v28, 0.0  ;;  %v1068_v33 = vsel %vm829_vm2, %v1006_v10, 0.0 }
 0x1c0   : > { %v919_v59 = vpop.xlane.xlu1 %918  ;;  %1099 = vadd.xlane.f32.xlu1 %v1098_v58  ;;  %1066 = vadd.xlane.f32.xlu0 %v1065_v38  ;;  %v916_v57 = vpop.xlane.xlu0 %915 }
 0x1c1   : > { %v956_v36 = vmul.f32 0.03125, %v919_v59  ;;  %v955_v7 = vmul.f32 0.03125, %v916_v57  ;;  %v1003_v22 = vmul.f32 %v5852_v56, %v5852_v56  ;;  %v1004_v44 = vmul.f32 %v5849_v24, %v5849_v24 }
 0x1c3   : > { %v5863_v14 = vsub.f32 %v5674_v52, %v956_v36  ;;  %v5866_v54 = vsub.f32 %v5677_v53, %v955_v7  ;;  %v1059_v59 = vsel %vm829_vm2, %v1003_v22, 0.0  ;;  %v1062_v42 = vsel %vm829_vm2, %v1004_v44, 0.0 }
 0x1c4   : > { %v925_v28 = vpop.xlane.xlu1 %924  ;;  %1069 = vadd.xlane.f32.xlu1 %v1068_v33  ;;  %1060 = vadd.xlane.f32.xlu0 %v1059_v59  ;;  %v922_v58 = vpop.xlane.xlu0 %921 }
 0x1c5   : > { %v958_v38 = vmul.f32 0.03125, %v925_v28  ;;  %v957_v57 = vmul.f32 0.03125, %v922_v58  ;;  %v1019_v23 = vmul.f32 %v5866_v54, %v5866_v54  ;;  %v1020_v22 = vmul.f32 %v5863_v14, %v5863_v14 }
 0x1c7   : > { %v5874_v36 = vsub.f32 %v5688_v60, %v958_v38  ;;  %v5877_v7 = vsub.f32 %v5691_v61, %v957_v57  ;;  %v1107_v10 = vsel %vm829_vm2, %v1019_v23, 0.0  ;;  %v1110_v28 = vsel %vm829_vm2, %v1020_v22, 0.0 }
 0x1c8   : > { %1063 = vadd.xlane.f32.xlu1 %v1062_v42  ;;  %1108 = vadd.xlane.f32.xlu0 %v1107_v10 }
 0x1c9   : > { %v1021_v33 = vmul.f32 %v5877_v7, %v5877_v7  ;;  %v1022_v59 = vmul.f32 %v5874_v36, %v5874_v36 }
 0x1cb   : > { %v1113_v44 = vsel %vm829_vm2, %v1021_v33, 0.0  ;;  %v1116_v38 = vsel %vm829_vm2, %v1022_v59, 0.0 }
 0x1cc   : > { %1111 = vadd.xlane.f32.xlu1 %v1110_v28  ;;  %1114 = vadd.xlane.f32.xlu0 %v1113_v44 }
 0x1d0   : > { %1117 = vadd.xlane.f32.xlu1 %v1116_v38 }
 0x21d   : > { %v1031_v23 = vpop.xlane.xlu0 %1030 }
 0x21e   : > { %v1121_v58 = vmul.f32 0.03125, %v1031_v23 }
 0x220   : > { %v1153_v57 = vadd.f32 1e-05, %v1121_v58 }
 0x221   : > { %v1034_v42 = vpop.xlane.xlu1 %1033  ;;  %v1079_v10 = vpop.xlane.xlu0 %1078 }
 0x222   : > { %4838 = vrsqrt.f32 %v1153_v57  ;;  %v1122_v60 = vmul.f32 0.03125, %v1034_v42  ;;  %v1137_v61 = vmul.f32 0.03125, %v1079_v10 }
 0x224   : > { %v1154_v52 = vadd.f32 1e-05, %v1122_v60  ;;  %v1169_v22 = vadd.f32 1e-05, %v1137_v61  ;;  %v5892_v60 = vld [vmem:[%s7699_s3] ss:$0 sm:$0xff] }
 0x225   : > { %v1082_v53 = vpop.xlane.xlu1 %1081  ;;  %v1025_v33 = vpop.xlane.xlu0 %1024 }
 0x226   : > { %4840 = vrsqrt.f32 %v1154_v52  ;;  %v1138_v35 = vmul.f32 0.03125, %v1082_v53  ;;  %v1119_v40 = vmul.f32 0.03125, %v1025_v33 }
 0x227   : > { %4842 = vrsqrt.f32 %v1169_v22 }
 0x228   : > { %v1170_v28 = vadd.f32 1e-05, %v1138_v35  ;;  %v1151_v44 = vadd.f32 1e-05, %v1119_v40 }
 0x229   : > { %v1073_v59 = vpop.xlane.xlu0 %1072  ;;  %v1028_v38 = vpop.xlane.xlu1 %1027 }
 0x22a   : > { %4844 = vrsqrt.f32 %v1170_v28  ;;  %v1135_v23 = vmul.f32 0.03125, %v1073_v59  ;;  %v1120_v58 = vmul.f32 0.03125, %v1028_v38  ;;  %v5899_v28 = vld [vmem:[%s7700_s4] ss:$0 sm:$0xff] }
 0x22b   : > { %4846 = vrsqrt.f32 %v1151_v44 }
 0x22c   : > { %v4839_v41 = vpop.eup %4838  ;;  %v1167_v57 = vadd.f32 1e-05, %v1135_v23  ;;  %v1152_v53 = vadd.f32 1e-05, %v1120_v58 }
 0x22d   : > { %v1217_v52 = vmul.f32 %v4839_v41, %v5698_v6  ;;  %v1076_v61 = vpop.xlane.xlu1 %1075  ;;  %v1043_v35 = vpop.xlane.xlu0 %1042 }
 0x22e   : > { %4848 = vrsqrt.f32 %v1167_v57  ;;  %v1136_v40 = vmul.f32 0.03125, %v1076_v61  ;;  %v1125_v42 = vmul.f32 0.03125, %v1043_v35 }
 0x22f   : > { %4850 = vrsqrt.f32 %v1152_v53  ;;  %v1255_v22 = vmul.f32 %v5892_v60, %v1217_v52 }
 0x230   : > { %v4841_v10 = vpop.eup %4840  ;;  %v1168_v59 = vadd.f32 1e-05, %v1136_v40  ;;  %v1157_v41 = vadd.f32 1e-05, %v1125_v42 }
 0x231   : > { %v4843_v33 = vpop.eup %4842  ;;  %v1218_v44 = vmul.f32 %v4841_v10, %v5706_v13  ;;  %v1046_v38 = vpop.xlane.xlu1 %1045  ;;  %v1293_v61 = vadd.f32 %v5899_v28, %v1255_v22 }
 0x232   : > { %v1233_v6 = vmul.f32 %v4843_v33, %v5701_v18  ;;  %v1091_v23 = vpop.xlane.xlu0 %1090  ;;  %4852 = vrsqrt.f32 %v1168_v59  ;;  %v1126_v57 = vmul.f32 0.03125, %v1046_v38 }
 0x233   : > { %v1256_v58 = vmul.f32 %v5892_v60, %v1218_v44  ;;  %v1141_v53 = vmul.f32 0.03125, %v1091_v23  ;;  %4854 = vrsqrt.f32 %v1157_v41 }
 0x234   : > { %v4845_v52 = vpop.eup %4844  ;;  %v1271_v35 = vmul.f32 %v5892_v60, %v1233_v6  ;;  %v1158_v42 = vadd.f32 1e-05, %v1126_v57 }
 0x235   : > { %v4847_v48 = vpop.eup %4846  ;;  %v1294_v13 = vadd.f32 %v5899_v28, %v1256_v58  ;;  %v1234_v40 = vmul.f32 %v4845_v52, %v5717_v37  ;;  %v1173_v18 = vadd.f32 1e-05, %v1141_v53  ;;  %v1094_v33 = vpop.xlane.xlu1 %1093 }
 0x236   : > { %v1215_v10 = vmul.f32 %v4847_v48, %v5712_v21  ;;  %v1037_v44 = vpop.xlane.xlu0 %1036  ;;  %4856 = vrsqrt.f32 %v1158_v42  ;;  %v1142_v23 = vmul.f32 0.03125, %v1094_v33  ;;  %v1309_v58 = vadd.f32 %v5899_v28, %v1271_v35 }
 0x237   : > { %v1324_v59 = vpack.c.bf16 %v1294_v13, %v1293_v61  ;;  %v1272_v38 = vmul.f32 %v5892_v60, %v1234_v40  ;;  %4858 = vrsqrt.f32 %v1173_v18  ;;  %v1123_v6 = vmul.f32 0.03125, %v1037_v44 }
 0x238   : > { %v4849_v22 = vpop.eup %4848  ;;  %v1253_v57 = vmul.f32 %v5892_v60, %v1215_v10  ;;  %v1174_v48 = vadd.f32 1e-05, %v1142_v23 }
 0x239   : > { %v4851_v41 = vpop.eup %4850  ;;  %1340 = vst.msk [vmem:[#allocation2 + $0x8] sm:$0xff] %vm829_vm2, %v1324_v59  ;;  %v1310_v37 = vadd.f32 %v5899_v28, %v1272_v38  ;;  %v1231_v53 = vmul.f32 %v4849_v22, %v5724_v45  ;;  %v1155_v52 = vadd.f32 1e-05, %v1123_v6  ;;  %v1040_v61 = vpop.xlane.xlu1 %1039 }
 0x23a   : > { %v1216_v21 = vmul.f32 %v4851_v41, %v5736_v2  ;;  %v1085_v13 = vpop.xlane.xlu0 %1084  ;;  %4860 = vrsqrt.f32 %v1174_v48  ;;  %v1124_v42 = vmul.f32 0.03125, %v1040_v61  ;;  %v1291_v10 = vadd.f32 %v5899_v28, %v1253_v57 }
 0x23b   : > { %v1332_v40 = vpack.c.bf16 %v1310_v37, %v1309_v58  ;;  %4862 = vrsqrt.f32 %v1155_v52  ;;  %v1139_v33 = vmul.f32 0.03125, %v1085_v13  ;;  %v1269_v45 = vmul.f32 %v5892_v60, %v1231_v53 }
 0x23c   : > { %v1254_v18 = vmul.f32 %v5892_v60, %v1216_v21  ;;  %v4853_v35 = vpop.eup %4852  ;;  %v1156_v44 = vadd.f32 1e-05, %v1124_v42 }
 0x23d   : > { %1348 = vst.msk [vmem:[#allocation2 + $0x48] sm:$0xff] %vm829_vm2, %v1332_v40  ;;  %v4855_v59 = vpop.eup %4854  ;;  %v1232_v38 = vmul.f32 %v4853_v35, %v5733_v1  ;;  %v1171_v23 = vadd.f32 1e-05, %v1139_v33  ;;  %v1088_v22 = vpop.xlane.xlu1 %1087  ;;  %v1307_v40 = vadd.f32 %v5899_v28, %v1269_v45 }
 0x23e   : > { %v1292_v2 = vadd.f32 %v5899_v28, %v1254_v18  ;;  %v1055_v6 = vpop.xlane.xlu0 %1054  ;;  %v1221_v41 = vmul.f32 %v4855_v59, %v5745_v16  ;;  %4864 = vrsqrt.f32 %v1156_v44  ;;  %v1140_v58 = vmul.f32 0.03125, %v1088_v22 }
 0x23f   : > { %v1129_v37 = vmul.f32 0.03125, %v1055_v6  ;;  %v1270_v57 = vmul.f32 %v5892_v60, %v1232_v38  ;;  %4866 = vrsqrt.f32 %v1171_v23 }
 0x240   : > { %v5923_v48 = vld [vmem:[#allocation2 + $0x8] sm:$0xff]  ;;  %v1323_v21 = vpack.c.bf16 %v1292_v2, %v1291_v10  ;;  %v4857_v52 = vpop.eup %4856  ;;  %v1259_v61 = vmul.f32 %v5892_v60, %v1221_v41  ;;  %v1172_v53 = vadd.f32 1e-05, %v1140_v58 }
 0x241   : > { %7823 = vst [vmem:[#allocation40_spill] sm:$0xff] %v5923_v48  ;;  %v1161_v13 = vadd.f32 1e-05, %v1129_v37  ;;  %v4859_v1 = vpop.eup %4858  ;;  %v1308_v16 = vadd.f32 %v5899_v28, %v1270_v57  ;;  %v1222_v42 = vmul.f32 %v4857_v52, %v5741_v12  ;;  %v1058_v18 = vpop.xlane.xlu1 %1057 }
 0x242   : > { %1339 = vst.msk [vmem:[#allocation2] sm:$0xff] %vm829_vm2, %v1323_v21  ;;  %v1103_v33 = vpop.xlane.xlu0 %1102  ;;  %v1237_v35 = vmul.f32 %v4859_v1, %v5758_v55  ;;  %4868 = vrsqrt.f32 %v1172_v53  ;;  %v1130_v10 = vmul.f32 0.03125, %v1058_v18  ;;  %v1297_v45 = vadd.f32 %v5899_v28, %v1259_v61 }
 0x243   : > { %v1331_v59 = vpack.c.bf16 %v1308_v16, %v1307_v40  ;;  %v1260_v2 = vmul.f32 %v5892_v60, %v1222_v42  ;;  %4870 = vrsqrt.f32 %v1161_v13  ;;  %v1145_v38 = vmul.f32 0.03125, %v1103_v33 }
 0x244   : > { %v5932_v44 = vld [vmem:[#allocation2 + $0x48] sm:$0xff]  ;;  %v4861_v23 = vpop.eup %4860  ;;  %v1162_v22 = vadd.f32 1e-05, %v1130_v10  ;;  %v1275_v55 = vmul.f32 %v5892_v60, %v1237_v35 }
 0x245   : > { %7824 = vst [vmem:[#allocation41_spill] sm:$0xff] %v5932_v44  ;;  %v4863_v6 = vpop.eup %4862  ;;  %1347 = vst.msk [vmem:[#allocation2 + $0x40] sm:$0xff] %vm829_vm2, %v1331_v59  ;;  %v1298_v12 = vadd.f32 %v5899_v28, %v1260_v2  ;;  %v1238_v41 = vmul.f32 %v4861_v23, %v5755_v47  ;;  %v1177_v58 = vadd.f32 1e-05, %v1145_v38  ;;  %v1106_v37 = vpop.xlane.xlu1 %1105 }
 0x246   : > { %v1049_v21 = vpop.xlane.xlu0 %1048  ;;  %v1219_v57 = vmul.f32 %v4863_v6, %v5769_v9  ;;  %4872 = vrsqrt.f32 %v1162_v22  ;;  %v1146_v52 = vmul.f32 0.03125, %v1106_v37  ;;  %v1313_v47 = vadd.f32 %v5899_v28, %v1275_v55 }
 0x247   : > { %v1326_v53 = vpack.c.bf16 %v1298_v12, %v1297_v45  ;;  %v1276_v61 = vmul.f32 %v5892_v60, %v1238_v41  ;;  %4874 = vrsqrt.f32 %v1177_v58  ;;  %v1127_v13 = vmul.f32 0.03125, %v1049_v21 }
 0x248   : > { %v4865_v1 = vpop.eup %4864  ;;  %v1257_v16 = vmul.f32 %v5892_v60, %v1219_v57  ;;  %v1178_v42 = vadd.f32 1e-05, %v1146_v52 }
 0x249   : > { %v5942_v40 = vld [vmem:[#allocation2] sm:$0xff]  ;;  %v4867_v18 = vpop.eup %4866  ;;  %1342 = vst.msk [vmem:[#allocation2 + $0x18] sm:$0xff] %vm829_vm2, %v1326_v53  ;;  %v1314_v9 = vadd.f32 %v5899_v28, %v1276_v61  ;;  %v1220_v33 = vmul.f32 %v4865_v1, %v5766_v8  ;;  %v1159_v35 = vadd.f32 1e-05, %v1127_v13  ;;  %v1052_v10 = vpop.xlane.xlu1 %1051 }
 0x24a   : > { %7825 = vst [vmem:[#allocation42_spill] sm:$0xff] %v5942_v40  ;;  %v1097_v59 = vpop.xlane.xlu0 %1096  ;;  %v1235_v2 = vmul.f32 %v4867_v18, %v5780_v43  ;;  %4876 = vrsqrt.f32 %v1178_v42  ;;  %v1128_v38 = vmul.f32 0.03125, %v1052_v10  ;;  %v1295_v55 = vadd.f32 %v5899_v28, %v1257_v16 }
 0x24b   : > { %v1334_v23 = vpack.c.bf16 %v1314_v9, %v1313_v47  ;;  %v1258_v45 = vmul.f32 %v5892_v60, %v1220_v33  ;;  %4878 = vrsqrt.f32 %v1159_v35  ;;  %v1143_v22 = vmul.f32 0.03125, %v1097_v59 }
 0x24c   : > { %v4869_v6 = vpop.eup %4868  ;;  %v5951_v12 = vld [vmem:[#allocation2 + $0x40] sm:$0xff]  ;;  %v1160_v41 = vadd.f32 1e-05, %v1128_v38  ;;  %v1273_v43 = vmul.f32 %v5892_v60, %v1235_v2 }
 0x24d   : > { %7826 = vst [vmem:[#allocation43_spill] sm:$0xff] %v5951_v12  ;;  %v4871_v58 = vpop.eup %4870  ;;  %1350 = vst.msk [vmem:[#allocation2 + $0x58] sm:$0xff] %vm829_vm2, %v1334_v23  ;;  %v1296_v8 = vadd.f32 %v5899_v28, %v1258_v45  ;;  %v1236_v37 = vmul.f32 %v4869_v6, %v5777_v39  ;;  %v1175_v21 = vadd.f32 1e-05, %v1143_v22  ;;  %v1100_v57 = vpop.xlane.xlu1 %1099 }
 0x24e   : > { %v1067_v52 = vpop.xlane.xlu0 %1066  ;;  %v1225_v53 = vmul.f32 %v4871_v58, %v5794_v15  ;;  %4880 = vrsqrt.f32 %v1160_v41  ;;  %v1144_v61 = vmul.f32 0.03125, %v1100_v57  ;;  %v1311_v39 = vadd.f32 %v5899_v28, %v1273_v43 }
 0x24f   : > { %v1325_v13 = vpack.c.bf16 %v1296_v8, %v1295_v55  ;;  %v1274_v1 = vmul.f32 %v5892_v60, %v1236_v37  ;;  %4882 = vrsqrt.f32 %v1175_v21  ;;  %v1133_v16 = vmul.f32 0.03125, %v1067_v52 }
 0x250   : > { %v4873_v42 = vpop.eup %4872  ;;  %v5960_v18 = vld [vmem:[#allocation2 + $0x18] sm:$0xff]  ;;  %v1263_v47 = vmul.f32 %v5892_v60, %v1225_v53  ;;  %v1176_v9 = vadd.f32 1e-05, %v1144_v61 }
 0x251   : > { %7827 = vst [vmem:[#allocation44_spill] sm:$0xff] %v5960_v18  ;;  %v4875_v33 = vpop.eup %4874  ;;  %1341 = vst.msk [vmem:[#allocation2 + $0x10] sm:$0xff] %vm829_vm2, %v1325_v13  ;;  %v1312_v15 = vadd.f32 %v5899_v28, %v1274_v1  ;;  %v1226_v35 = vmul.f32 %v4873_v42, %v5791_v11  ;;  %v1165_v10 = vadd.f32 1e-05, %v1133_v16  ;;  %v1070_v59 = vpop.xlane.xlu1 %1069 }
 0x252   : > { %v1061_v2 = vpop.xlane.xlu0 %1060  ;;  %v1241_v38 = vmul.f32 %v4875_v33, %v5805_v63  ;;  %4884 = vrsqrt.f32 %v1176_v9  ;;  %v1134_v23 = vmul.f32 0.03125, %v1070_v59  ;;  %v1301_v58 = vadd.f32 %v5899_v28, %v1263_v47 }
 0x253   : > { %v1333_v45 = vpack.c.bf16 %v1312_v15, %v1311_v39  ;;  %v1264_v22 = vmul.f32 %v5892_v60, %v1226_v35  ;;  %4886 = vrsqrt.f32 %v1165_v10  ;;  %v1131_v6 = vmul.f32 0.03125, %v1061_v2 }
 0x254   : > { %v4877_v55 = vpop.eup %4876  ;;  %v5969_v41 = vld [vmem:[#allocation2 + $0x58] sm:$0xff]  ;;  %v1166_v8 = vadd.f32 1e-05, %v1134_v23  ;;  %v1279_v63 = vmul.f32 %v5892_v60, %v1241_v38 }
 0x255   : > { %7828 = vst [vmem:[#allocation45_spill] sm:$0xff] %v5969_v41  ;;  %v4879_v43 = vpop.eup %4878  ;;  %1349 = vst.msk [vmem:[#allocation2 + $0x50] sm:$0xff] %vm829_vm2, %v1333_v45  ;;  %v1302_v11 = vadd.f32 %v5899_v28, %v1264_v22  ;;  %v1242_v37 = vmul.f32 %v4877_v55, %v5802_v62  ;;  %v1163_v21 = vadd.f32 1e-05, %v1131_v6  ;;  %v1064_v57 = vpop.xlane.xlu1 %1063 }
 0x256   : > { %v1109_v52 = vpop.xlane.xlu0 %1108  ;;  %v1223_v53 = vmul.f32 %v4879_v43, %v5816_v31  ;;  %4888 = vrsqrt.f32 %v1166_v8  ;;  %v1132_v61 = vmul.f32 0.03125, %v1064_v57  ;;  %v1317_v62 = vadd.f32 %v5899_v28, %v1279_v63 }
 0x257   : > { %v1328_v13 = vpack.c.bf16 %v1302_v11, %v1301_v58  ;;  %v1280_v1 = vmul.f32 %v5892_v60, %v1242_v37  ;;  %4890 = vrsqrt.f32 %v1163_v21  ;;  %v1147_v16 = vmul.f32 0.03125, %v1109_v52 }
 0x258   : > { %v4881_v42 = vpop.eup %4880  ;;  %v5978_v47 = vld [vmem:[#allocation2 + $0x10] sm:$0xff]  ;;  %v1261_v9 = vmul.f32 %v5892_v60, %v1223_v53  ;;  %v1164_v33 = vadd.f32 1e-05, %v1132_v61 }
 0x259   : > { %7829 = vst [vmem:[#allocation46_spill] sm:$0xff] %v5978_v47  ;;  %v4883_v39 = vpop.eup %4882  ;;  %1344 = vst.msk [vmem:[#allocation2 + $0x28] sm:$0xff] %vm829_vm2, %v1328_v13  ;;  %v1318_v31 = vadd.f32 %v5899_v28, %v1280_v1  ;;  %v1224_v15 = vmul.f32 %v4881_v42, %v5813_v29  ;;  %v1179_v35 = vadd.f32 1e-05, %v1147_v16  ;;  %v1112_v10 = vpop.xlane.xlu1 %1111 }
 0x25a   : > { %v1115_v59 = vpop.xlane.xlu0 %1114  ;;  %v1239_v2 = vmul.f32 %v4883_v39, %v5830_v5  ;;  %4892 = vrsqrt.f32 %v1164_v33  ;;  %v1148_v38 = vmul.f32 0.03125, %v1112_v10  ;;  %v1299_v58 = vadd.f32 %v5899_v28, %v1261_v9 }
 0x25b   : > { %v1336_v23 = vpack.c.bf16 %v1318_v31, %v1317_v62  ;;  %v1262_v45 = vmul.f32 %v5892_v60, %v1224_v15  ;;  %4894 = vrsqrt.f32 %v1179_v35  ;;  %v1149_v22 = vmul.f32 0.03125, %v1115_v59 }
 0x25c   : > { %v4885_v6 = vpop.eup %4884  ;;  %v5987_v55 = vld [vmem:[#allocation2 + $0x50] sm:$0xff]  ;;  %v1180_v8 = vadd.f32 1e-05, %v1148_v38  ;;  %v1277_v5 = vmul.f32 %v5892_v60, %v1239_v2 }
 0x25d   : > { %7830 = vst [vmem:[#allocation47_spill] sm:$0xff] %v5987_v55  ;;  %v4887_v43 = vpop.eup %4886  ;;  %1352 = vst.msk [vmem:[#allocation2 + $0x68] sm:$0xff] %vm829_vm2, %v1336_v23  ;;  %v1300_v29 = vadd.f32 %v5899_v28, %v1262_v45  ;;  %v1240_v11 = vmul.f32 %v4885_v6, %v5827_v27  ;;  %v1181_v63 = vadd.f32 1e-05, %v1149_v22  ;;  %v1118_v37 = vpop.xlane.xlu1 %1117 }
 0x25e   : > { %v1229_v21 = vmul.f32 %v4887_v43, %v5841_v25  ;;  %4896 = vrsqrt.f32 %v1180_v8  ;;  %v1150_v57 = vmul.f32 0.03125, %v1118_v37  ;;  %v1315_v42 = vadd.f32 %v5899_v28, %v1277_v5 }
 0x25f   : > { %v1327_v52 = vpack.c.bf16 %v1300_v29, %v1299_v58  ;;  %v1278_v53 = vmul.f32 %v5892_v60, %v1240_v11  ;;  %4898 = vrsqrt.f32 %v1181_v63 }
 0x260   : > { %v4889_v61 = vpop.eup %4888  ;;  %v5996_v13 = vld [vmem:[#allocation2 + $0x28] sm:$0xff]  ;;  %v1182_v1 = vadd.f32 1e-05, %v1150_v57  ;;  %v1267_v9 = vmul.f32 %v5892_v60, %v1229_v21 }
 0x261   : > { %7831 = vst [vmem:[#allocation48_spill] sm:$0xff] %v5996_v13  ;;  %v4891_v16 = vpop.eup %4890  ;;  %1343 = vst.msk [vmem:[#allocation2 + $0x20] sm:$0xff] %vm829_vm2, %v1327_v52  ;;  %v1316_v27 = vadd.f32 %v5899_v28, %v1278_v53  ;;  %v1230_v25 = vmul.f32 %v4889_v61, %v5838_v0 }
 0x262   : > { %v1227_v33 = vmul.f32 %v4891_v16, %v5852_v56  ;;  %4900 = vrsqrt.f32 %v1182_v1  ;;  %v1305_v10 = vadd.f32 %v5899_v28, %v1267_v9 }
 0x263   : > { %v1335_v39 = vpack.c.bf16 %v1316_v27, %v1315_v42  ;;  %v1268_v62 = vmul.f32 %v5892_v60, %v1230_v25 }
 0x264   : > { %v4893_v31 = vpop.eup %4892  ;;  %v6005_v15 = vld [vmem:[#allocation2 + $0x68] sm:$0xff]  ;;  %v1265_v2 = vmul.f32 %v5892_v60, %v1227_v33 }
 0x265   : > { %7832 = vst [vmem:[#allocation49_spill] sm:$0xff] %v6005_v15  ;;  %v4895_v35 = vpop.eup %4894  ;;  %1351 = vst.msk [vmem:[#allocation2 + $0x60] sm:$0xff] %vm829_vm2, %v1335_v39  ;;  %v1306_v59 = vadd.f32 %v5899_v28, %v1268_v62  ;;  %v1228_v0 = vmul.f32 %v4893_v31, %v5849_v24 }
 0x266   : > { %v1243_v56 = vmul.f32 %v4895_v35, %v5866_v54  ;;  %v1303_v58 = vadd.f32 %v5899_v28, %v1265_v2 }
 0x267   : > { %v1330_v38 = vpack.c.bf16 %v1306_v59, %v1305_v10  ;;  %v1266_v23 = vmul.f32 %v5892_v60, %v1228_v0 }
 0x268   : > { %v4897_v45 = vpop.eup %4896  ;;  %v6014_v22 = vld [vmem:[#allocation2 + $0x20] sm:$0xff]  ;;  %v1281_v43 = vmul.f32 %v5892_v60, %v1243_v56 }
 0x269   : > { %7833 = vst [vmem:[#allocation50_spill] sm:$0xff] %v6014_v22  ;;  %v4899_v6 = vpop.eup %4898  ;;  %1346 = vst.msk [vmem:[#allocation2 + $0x38] sm:$0xff] %vm829_vm2, %v1330_v38  ;;  %v1304_v8 = vadd.f32 %v5899_v28, %v1266_v23  ;;  %v1244_v29 = vmul.f32 %v4897_v45, %v5863_v14 }
 0x26a   : > { %v1245_v24 = vmul.f32 %v4899_v6, %v5877_v7  ;;  %v1319_v37 = vadd.f32 %v5899_v28, %v1281_v43 }
 0x26b   : > { %v1329_v54 = vpack.c.bf16 %v1304_v8, %v1303_v58  ;;  %v1282_v5 = vmul.f32 %v5892_v60, %v1244_v29 }
 0x26c   : > { %v4901_v11 = vpop.eup %4900  ;;  %v6023_v63 = vld [vmem:[#allocation2 + $0x60] sm:$0xff]  ;;  %v1283_v57 = vmul.f32 %v5892_v60, %v1245_v24 }
 0x26d   : > { %7834 = vst [vmem:[#allocation51_spill] sm:$0xff] %v6023_v63  ;;  %1345 = vst.msk [vmem:[#allocation2 + $0x30] sm:$0xff] %vm829_vm2, %v1329_v54  ;;  %v1320_v21 = vadd.f32 %v5899_v28, %v1282_v5  ;;  %v1246_v52 = vmul.f32 %v4901_v11, %v5874_v36 }
 0x26e   : > { %v1321_v61 = vadd.f32 %v5899_v28, %v1283_v57 }
 0x26f   : > { %v1337_v14 = vpack.c.bf16 %v1320_v21, %v1319_v37  ;;  %v1284_v7 = vmul.f32 %v5892_v60, %v1246_v52 }
 0x270   : > { %v6031_v53 = vld [vmem:[#allocation2 + $0x38] sm:$0xff] }
 0x271   : > { %7835 = vst [vmem:[#allocation52_spill] sm:$0xff] %v6031_v53  ;;  %1353 = vst.msk [vmem:[#allocation2 + $0x70] sm:$0xff] %vm829_vm2, %v1337_v14  ;;  %v1322_v1 = vadd.f32 %v5899_v28, %v1284_v7 }
 0x273   : > { %v1338_v16 = vpack.c.bf16 %v1322_v1, %v1321_v61 }
 0x274   : > { %v6036_v42 = vld [vmem:[#allocation2 + $0x30] sm:$0xff] }
 0x275   : > { %7836 = vst [vmem:[#allocation53_spill] sm:$0xff] %v6036_v42  ;;  %1354 = vst.msk [vmem:[#allocation2 + $0x78] sm:$0xff] %vm829_vm2, %v1338_v16 }
 0x278   : > { %v6039_v27 = vld [vmem:[#allocation2 + $0x70] sm:$0xff] }
 0x279   : > { %7837 = vst [vmem:[#allocation54_spill] sm:$0xff] %v6039_v27 }
 0x27c   : > { %v6041_v9 = vld [vmem:[#allocation2 + $0x78] sm:$0xff] }
 0x27d   : > { %7838 = vst [vmem:[#allocation55_spill] sm:$0xff] %v6041_v9 }
 0x27e LB: >> { %4453 = vmatprep.mubr.msk.bf16.mxu0 %vm829_vm2, %v5942_v40  ;;  %4469 = vmatprep.mubr.msk.bf16.mxu1 %vm829_vm2, %v5951_v12  ;;  %s4225_s16 = sshll.u32 %s5284_s27, 4  ;;  %s4226_s25 = sshll.u32 %s5284_s27, 7  ;;  %s5284_s27 = sphi %s6047_s27, %s1376_s27  }
 0x27f   : >> { %s1379_s23 = scalar_lea.vmem %s7702_s6, %s4225_s16  ;;  %s6089_s16 = scalar_lea.vmem [#allocation3], %s4226_s25 }
 0x280   : >> { %v4902_v36 = vld [vmem:[%s1379_s23] sm:$0xff]   ;;  %v4903_v60 = vld [vmem:[%s1379_s23 + $0x8] sm:$0xff]   ;;  %s1376_s27 = sadd.s32 1, %s5284_s27  }
 0x281   : >> { %4449 = vmatprep.subr.bf16.mxu0 %v4902_v36  ;;  %4599 = vmatprep.subr.bf16.mxu1 %v4902_v36  ;;  %p1373_p11 = scmp.ge.s32.totalorder %s1376_s27, 4  }
 0x282   : >> { %4450 = vmatpush3.bf16.msra.mxu0 %v4902_v36  ;;  %4601 = vmatpush3.bf16.msra.mxu1 %v4902_v36  ;;  %s6126_s20 = smov (%p1373_p11), 0  }
 0x283   : >> { %4451 = vmatprep.subr.bf16.mxu0 %v4903_v60  ;;  %4600 = vmatprep.subr.bf16.mxu1 %v4903_v60 }
 0x286   : >> { %4452 = vmatpush3.bf16.msra.mxu0 %v4903_v60  ;;  %4602 = vmatpush3.bf16.msra.mxu1 %v4903_v60 }
 0x289   : >> { %4454 = vmatmul.mubr.msk.bf16.vlgmr.msra.gmra.mrb[0].mxu0 %vm829_vm2, %v5923_v48  ;;  %4470 = vmatmul.mubr.msk.bf16.vlgmr.msra.gmra.mrb[0].mxu1 %vm829_vm2, %v5932_v44 }
 0x28a   : >> { %4457 = vmatprep.mubr.msk.bf16.mxu0 %vm829_vm2, %v5978_v47  ;;  %4473 = vmatprep.mubr.msk.bf16.mxu1 %vm829_vm2, %v5987_v55 }
 0x291   : >> { %4458 = vmatmul.mubr.msk.bf16.gmra.mrb[4].mxu0 %vm829_vm2, %v5960_v18  ;;  %4474 = vmatmul.mubr.msk.bf16.gmra.mrb[4].mxu1 %vm829_vm2, %v5969_v41 }
 0x292   : >> { %4461 = vmatprep.mubr.msk.bf16.mxu0 %vm829_vm2, %v6014_v22  ;;  %4477 = vmatprep.mubr.msk.bf16.mxu1 %vm829_vm2, %v6023_v63 }
 0x299   : >> { %4462 = vmatmul.mubr.msk.bf16.gmra.mrb[8].mxu0 %vm829_vm2, %v5996_v13  ;;  %4478 = vmatmul.mubr.msk.bf16.gmra.mrb[8].mxu1 %vm829_vm2, %v6005_v15 }
 0x29a   : >> { %4465 = vmatprep.mubr.msk.bf16.mxu0 %vm829_vm2, %v6036_v42  ;;  %4481 = vmatprep.mubr.msk.bf16.mxu1 %vm829_vm2, %v6039_v27 }
 0x2a1   : >> { %4466 = vmatmul.mubr.msk.bf16.gmra.mrb[12].mxu0 %vm829_vm2, %v6031_v53  ;;  %4482 = vmatmul.mubr.msk.bf16.gmra.mrb[12].mxu1 %vm829_vm2, %v6041_v9 }
 0x35c   : >> { %v4455_v28 = vpop.f32.mrb[0].mxu0  ;;  %v4471_v25 = vpop.f32.mrb[0].mxu1 }
 0x35d   : >> { %v1478_v33 = vpop.f32.mrb[1].mxu0  ;;  %v1542_v39 = vpop.f32.mrb[1].mxu1 }
 0x35e   : >> { %v4456_v62 = vpop.f32.mrb[2].mxu0  ;;  %v4472_v31 = vpop.f32.mrb[2].mxu1 }
 0x35f   : >> { %v1606_v35 = vpack.c.bf16 %v4456_v62, %v4455_v28  ;;  %v1614_v10 = vpack.c.bf16 %v4472_v31, %v4471_v25  ;;  %v1481_v59 = vpop.f32.mrb[3].mxu0  ;;  %v1545_v2 = vpop.f32.mrb[3].mxu1 }
 0x360   : >> { %v1605_v0 = vpack.c.bf16 %v1481_v59, %v1478_v33  ;;  %v1613_v56 = vpack.c.bf16 %v1545_v2, %v1542_v39 }
 0x361   : >> { %1625 = vst.msk [vmem:[%s6089_s16 + $0x8] sm:$0xff] %vm829_vm2, %v1606_v35  ;;  %1633 = vst.msk [vmem:[%s6089_s16 + $0x48] sm:$0xff] %vm829_vm2, %v1614_v10 }
 0x362   : >> { %1624 = vst.msk [vmem:[%s6089_s16] sm:$0xff] %vm829_vm2, %v1605_v0  ;;  %1632 = vst.msk [vmem:[%s6089_s16 + $0x40] sm:$0xff] %vm829_vm2, %v1613_v56 }
 0x364   : >> { %v4459_v38 = vpop.f32.mrb[4].mxu0  ;;  %v4475_v23 = vpop.f32.mrb[4].mxu1 }
 0x365   : >> { %v1494_v45 = vpop.f32.mrb[5].mxu0  ;;  %v1558_v6 = vpop.f32.mrb[5].mxu1 }
 0x366   : >> { %v4460_v58 = vpop.f32.mrb[6].mxu0  ;;  %v4476_v8 = vpop.f32.mrb[6].mxu1 }
 0x367   : >> { %v1608_v43 = vpack.c.bf16 %v4460_v58, %v4459_v38  ;;  %v1616_v29 = vpack.c.bf16 %v4476_v8, %v4475_v23  ;;  %v1497_v24 = vpop.f32.mrb[7].mxu0  ;;  %v1561_v54 = vpop.f32.mrb[7].mxu1 }
 0x368   : >> { %v1607_v5 = vpack.c.bf16 %v1497_v24, %v1494_v45  ;;  %v1615_v11 = vpack.c.bf16 %v1561_v54, %v1558_v6 }
 0x369   : >> { %1627 = vst.msk [vmem:[%s6089_s16 + $0x18] sm:$0xff] %vm829_vm2, %v1608_v43  ;;  %1635 = vst.msk [vmem:[%s6089_s16 + $0x58] sm:$0xff] %vm829_vm2, %v1616_v29 }
 0x36a   : >> { %1626 = vst.msk [vmem:[%s6089_s16 + $0x10] sm:$0xff] %vm829_vm2, %v1607_v5  ;;  %1634 = vst.msk [vmem:[%s6089_s16 + $0x50] sm:$0xff] %vm829_vm2, %v1615_v11 }
 0x36c   : >> { %v4463_v37 = vpop.f32.mrb[8].mxu0  ;;  %v4479_v21 = vpop.f32.mrb[8].mxu1 }
 0x36d   : >> { %v1510_v57 = vpop.f32.mrb[9].mxu0  ;;  %v1574_v52 = vpop.f32.mrb[9].mxu1 }
 0x36e   : >> { %v4464_v14 = vpop.f32.mrb[10].mxu0  ;;  %v4480_v7 = vpop.f32.mrb[10].mxu1 }
 0x36f   : >> { %v1610_v61 = vpack.c.bf16 %v4464_v14, %v4463_v37  ;;  %v1618_v1 = vpack.c.bf16 %v4480_v7, %v4479_v21  ;;  %v1513_v16 = vpop.f32.mrb[11].mxu0  ;;  %v1577_v36 = vpop.f32.mrb[11].mxu1 }
 0x370   : >> { %v1609_v60 = vpack.c.bf16 %v1513_v16, %v1510_v57  ;;  %v1617_v28 = vpack.c.bf16 %v1577_v36, %v1574_v52 }
 0x371   : >> { %1629 = vst.msk [vmem:[%s6089_s16 + $0x28] sm:$0xff] %vm829_vm2, %v1610_v61  ;;  %1637 = vst.msk [vmem:[%s6089_s16 + $0x68] sm:$0xff] %vm829_vm2, %v1618_v1 }
 0x372   : >> { %1628 = vst.msk [vmem:[%s6089_s16 + $0x20] sm:$0xff] %vm829_vm2, %v1609_v60  ;;  %1636 = vst.msk [vmem:[%s6089_s16 + $0x60] sm:$0xff] %vm829_vm2, %v1617_v28 }
 0x374   : >> { %v4467_v25 = vpop.f32.mrb[12].mxu0  ;;  %v4483_v33 = vpop.f32.mrb[12].mxu1  ;;  %1375 = sbr.rel (!%p1373_p11) target bundleno = 638 (0x27e), region = 142 }
 0x375   : >> { %v1526_v39 = vpop.f32.mrb[13].mxu0  ;;  %v1590_v62 = vpop.f32.mrb[13].mxu1 }
 0x376   : >> { %v4468_v31 = vpop.f32.mrb[14].mxu0  ;;  %v4484_v35 = vpop.f32.mrb[14].mxu1 }
 0x377   : >> { %v1612_v10 = vpack.c.bf16 %v4468_v31, %v4467_v25  ;;  %v1620_v59 = vpack.c.bf16 %v4484_v35, %v4483_v33  ;;  %v1529_v2 = vpop.f32.mrb[15].mxu0  ;;  %v1593_v0 = vpop.f32.mrb[15].mxu1 }
 0x378   : >> { %v1611_v56 = vpack.c.bf16 %v1529_v2, %v1526_v39  ;;  %v1619_v38 = vpack.c.bf16 %v1593_v0, %v1590_v62 }
 0x379   : >> { %1631 = vst.msk [vmem:[%s6089_s16 + $0x38] sm:$0xff] %vm829_vm2, %v1612_v10  ;;  %1639 = vst.msk [vmem:[%s6089_s16 + $0x78] sm:$0xff] %vm829_vm2, %v1620_v59 }
 0x37a   : >> { %1630 = vst.msk [vmem:[%s6089_s16 + $0x30] sm:$0xff] %vm829_vm2, %v1611_v56  ;;  %1638 = vst.msk [vmem:[%s6089_s16 + $0x70] sm:$0xff] %vm829_vm2, %v1619_v38 }
 0x37b LB: >> { %s4164_s17 = sshll.u32 %s5288_s20, 7  ;;  %v6150_v54 = vmov 0.0   ;;  %v6152_v5 = vmov 0.0   ;;  %v6154_v11 = vmov 0.0   ;;  %v6156_v37 = vmov 0.0   ;;  %s6182_s27 = smov 0   ;;  %s5288_s20 = sphi %s6126_s20, %s1645_s20  }
 0x37c   : >> { %s1647_s23 = sshra.s32 %s4164_s17, 4  ;;  %v6158_v21 = vmov 0.0   ;;  %v6160_v57 = vmov 0.0   ;;  %v6162_v52 = vmov 0.0   ;;  %v6164_v14 = vmov 0.0  }
 0x37d   : >> { %s4165_s25 = sshll.u32 %s1647_s23, 3  ;;  %v6166_v7 = vmov 0.0   ;;  %v6168_v61 = vmov 0.0   ;;  %v6170_v1 = vmov 0.0   ;;  %v6172_v16 = vmov 0.0  }
 0x37e   : >> { %s1650_s16 = scalar_lea.vmem [#allocation2], %s4165_s25  ;;  %v6174_v36 = vmov 0.0   ;;  %v6176_v60 = vmov 0.0   ;;  %v6178_v28 = vmov 0.0   ;;  %v6180_v25 = vmov 0.0  }
 0x37f   : >> { %v6134_v23 = vld [vmem:[%s1650_s16] sm:$0xff]  ;;  %v6136_v45 = vld [vmem:[%s1650_s16 + $0x8] sm:$0xff]  ;;  %v6138_v6 = vld [vmem:[%s1650_s16 + $0x10] sm:$0xff] }
 0x380   : >> { %7839 = vst [vmem:[#allocation56_spill] sm:$0xff] %v6134_v23  ;;  %7840 = vst [vmem:[#allocation57_spill] sm:$0xff] %v6136_v45  ;;  %v6140_v58 = vld [vmem:[%s1650_s16 + $0x18] sm:$0xff]  ;;  %v6142_v8 = vld [vmem:[%s1650_s16 + $0x20] sm:$0xff] }
 0x381   : >> { %7841 = vst [vmem:[#allocation58_spill] sm:$0xff] %v6138_v6  ;;  %7842 = vst [vmem:[#allocation59_spill] sm:$0xff] %v6140_v58  ;;  %v6144_v43 = vld [vmem:[%s1650_s16 + $0x28] sm:$0xff]  ;;  %v6146_v29 = vld [vmem:[%s1650_s16 + $0x30] sm:$0xff] }
 0x382   : >> { %7843 = vst [vmem:[#allocation60_spill] sm:$0xff] %v6142_v8  ;;  %7844 = vst [vmem:[#allocation61_spill] sm:$0xff] %v6144_v43  ;;  %v6148_v24 = vld [vmem:[%s1650_s16 + $0x38] sm:$0xff] }
 0x383   : >> { %7845 = vst [vmem:[#allocation62_spill] sm:$0xff] %v6146_v29  ;;  %7846 = vst [vmem:[#allocation63_spill] sm:$0xff] %v6148_v24 }
 0x384 LB: >>> { %v7848_v12 = vld [vmem:[#allocation43_spill] sm:$0xff]  ;;  %v7849_v40 = vld [vmem:[#allocation42_spill] sm:$0xff]  ;;  %s4227_s23 = sshll.u32 %s5356_s27, 4  ;;  %v7850_v44 = vld [vmem:[#allocation41_spill] sm:$0xff]  ;;  %s5356_s27 = sphi %s6182_s27, %s1664_s27   ;;  %v5352_v25 = vphi %v6180_v25, %v7893_v25   ;;  %v5348_v28 = vphi %v6178_v28, %v7892_v28   ;;  %v5344_v60 = vphi %v6176_v60, %v7891_v60   ;;  %v5340_v36 = vphi %v6174_v36, %v7890_v36   ;;  %v5336_v16 = vphi %v6172_v16, %v7889_v16   ;;  %v5332_v1 = vphi %v6170_v1, %v7888_v1   ;;  %v5328_v61 = vphi %v6168_v61, %v7887_v61   ;;  %v5324_v7 = vphi %v6166_v7, %v7886_v7   ;;  %v5320_v14 = vphi %v6164_v14, %v7885_v14   ;;  %v5316_v52 = vphi %v6162_v52, %v7884_v52   ;;  %v5312_v57 = vphi %v6160_v57, %v7883_v57   ;;  %v5308_v21 = vphi %v6158_v21, %v7882_v21   ;;  %v5304_v37 = vphi %v6156_v37, %v7881_v37   ;;  %v5300_v11 = vphi %v6154_v11, %v7880_v11   ;;  %v5296_v5 = vphi %v6152_v5, %v7879_v5   ;;  %v5292_v54 = vphi %v6150_v54, %v7878_v54  }
 0x385   : >>> { %4621 = vmatprep.subr.msk.bf16.mxu1 %vm829_vm2, %v7848_v12  ;;  %v1854_v33 = vsel %vm829_vm2, %v7849_v40, 0  ;;  %s1683_s30 = scalar_lea.vmem %s7701_s5, %s4227_s23  ;;  %v7851_v48 = vld [vmem:[#allocation40_spill] sm:$0xff]  ;;  %v7852_v55 = vld [vmem:[#allocation47_spill] sm:$0xff]  ;;  %v7854_v47 = vld [vmem:[#allocation46_spill] sm:$0xff] }
 0x386   : >>> { %4275 = vmatpush3.bf16.xpose.msra.mxu1 %v1854_v33  ;;  %v4904_v39 = vld [vmem:[%s1683_s30] sm:$0xff]   ;;  %v4905_v62 = vld [vmem:[%s1683_s30 + $0x8] sm:$0xff]   ;;  %v1857_v31 = vsel %vm829_vm2, %v7851_v48, 0  ;;  %v1860_v35 = vsel %vm829_vm2, %v7854_v47, 0  ;;  %v7858_v18 = vld [vmem:[#allocation44_spill] sm:$0xff]  ;;  %s4228_s30 = sshll.u32 %s5356_s27, 7 }
 0x387   : >>> { %v7847_v23 = vld [vmem:[#allocation56_spill] sm:$0xff]  ;;  %4622 = vmatprep.subr.msk.bf16.mxu1 %vm829_vm2, %v7850_v44  ;;  %4485 = vmatprep.subr.bf16.mxu0 %v4904_v39  ;;  %v7853_v45 = vld [vmem:[#allocation57_spill] sm:$0xff]  ;;  %v1863_v10 = vsel %vm829_vm2, %v7858_v18, 0  ;;  %v7860_v63 = vld [vmem:[#allocation51_spill] sm:$0xff]  ;;  %s6400_s23 = scalar_lea.vmem [#allocation3], %s4228_s30  ;;  %s1664_s27 = sadd.s32 1, %s5356_s27  }
 0x388   : >>> { %4489 = vmatprep.mubr.msk.bf16.mxu0 %vm829_vm2, %v7847_v23  ;;  %4486 = vmatpush3.bf16.msra.mxu0 %v4904_v39  ;;  %v7855_v6 = vld [vmem:[#allocation58_spill] sm:$0xff]  ;;  %v7856_v41 = vld [vmem:[#allocation45_spill] sm:$0xff]  ;;  %v7857_v58 = vld [vmem:[#allocation59_spill] sm:$0xff]  ;;  %p6607_p12 = scmp.ge.s32.totalorder %s1664_s27, 4  }
 0x389   : >>> { %4487 = vmatprep.subr.bf16.mxu0 %v4905_v62  ;;  %v7859_v8 = vld [vmem:[#allocation60_spill] sm:$0xff]  ;;  %v7861_v43 = vld [vmem:[#allocation61_spill] sm:$0xff]  ;;  %v7862_v22 = vld [vmem:[#allocation50_spill] sm:$0xff]  ;;  %s2402_s16 = scalar_lea.vmem (%p6607_p12), [#allocation4], %s4164_s17  ;;  %s1645_s20 = sadd.s32 (%p6607_p12), 1, %s5288_s20  }
 0x38a   : >>> { %v1866_v59 = vsel %vm829_vm2, %v7862_v22, 0  ;;  %v7863_v29 = vld [vmem:[#allocation62_spill] sm:$0xff]  ;;  %v7864_v15 = vld [vmem:[#allocation49_spill] sm:$0xff]  ;;  %v7865_v24 = vld [vmem:[#allocation63_spill] sm:$0xff]  ;;  %p1642_p13 = scmp.ge.s32.totalorder (%p6607_p12), %s1645_s20, 2  }
 0x38b   : >>> { %v7866_v13 = vld [vmem:[#allocation48_spill] sm:$0xff]  ;;  %v7867_v27 = vld [vmem:[#allocation54_spill] sm:$0xff]  ;;  %v7868_v42 = vld [vmem:[#allocation53_spill] sm:$0xff] }
 0x38c   : >>> { %4488 = vmatpush3.bf16.msra.mxu0 %v4905_v62  ;;  %v1869_v2 = vsel %vm829_vm2, %v7866_v13, 0  ;;  %v1872_v0 = vsel %vm829_vm2, %v7868_v42, 0  ;;  %v7869_v9 = vld [vmem:[#allocation55_spill] sm:$0xff]  ;;  %v7870_v53 = vld [vmem:[#allocation52_spill] sm:$0xff] }
 0x38d   : >>> { %v1875_v56 = vsel %vm829_vm2, %v7870_v53, 0  ;;  %v2282_v17 = vld [vmem:[%s6400_s23 + $0x48] sm:$0xff]  ;;  %v2283_v32 = vld [vmem:[%s6400_s23 + $0x50] sm:$0xff] }
 0x38e   : >>> { %4277 = vmatpush3.bf16.xpose.msra.mxu1 %v1857_v31  ;;  %v2274_v19 = vld [vmem:[%s6400_s23 + $0x8] sm:$0xff] }
 0x38f   : >>> { %4623 = vmatprep.subr.msk.bf16.mxu1 %vm829_vm2, %v7852_v55  ;;  %4490 = vmatmul.mubr.msk.bf16.vlgmr.msra.gmra.mrb[0].mxu0 %vm829_vm2, %v7853_v45 }
 0x390   : >>> { %4493 = vmatprep.mubr.msk.bf16.mxu0 %vm829_vm2, %v7855_v6 }
 0x396   : >>> { %4279 = vmatpush3.bf16.xpose.msra.mxu1 %v1860_v35 }
 0x397   : >>> { %4624 = vmatprep.subr.msk.bf16.mxu1 %vm829_vm2, %v7856_v41  ;;  %4494 = vmatmul.mubr.msk.bf16.gmra.mrb[4].mxu0 %vm829_vm2, %v7857_v58 }
 0x398   : >>> { %4497 = vmatprep.mubr.msk.bf16.mxu0 %vm829_vm2, %v7859_v8 }
 0x39e   : >>> { %4281 = vmatpush3.bf16.xpose.msra.mxu1 %v1863_v10 }
 0x39f   : >>> { %4625 = vmatprep.subr.msk.bf16.mxu1 %vm829_vm2, %v7860_v63  ;;  %4498 = vmatmul.mubr.msk.bf16.gmra.mrb[8].mxu0 %vm829_vm2, %v7861_v43 }
 0x3a0   : >>> { %4501 = vmatprep.mubr.msk.bf16.mxu0 %vm829_vm2, %v7863_v29 }
 0x3a6   : >>> { %4283 = vmatpush3.bf16.xpose.msra.mxu1 %v1866_v59 }
 0x3a7   : >>> { %4626 = vmatprep.subr.msk.bf16.mxu1 %vm829_vm2, %v7864_v15  ;;  %4502 = vmatmul.mubr.msk.bf16.gmra.mrb[12].mxu0 %vm829_vm2, %v7865_v24 }
 0x3ae   : >>> { %4285 = vmatpush3.bf16.xpose.msra.mxu1 %v1869_v2 }
 0x3af   : >>> { %4627 = vmatprep.subr.msk.bf16.mxu1 %vm829_vm2, %v7867_v27 }
 0x3b6   : >>> { %4287 = vmatpush3.bf16.xpose.msra.mxu1 %v1872_v0 }
 0x3b7   : >>> { %4628 = vmatprep.subr.msk.bf16.mxu1 %vm829_vm2, %v7869_v9 }
 0x3be   : >>> { %4289 = vmatpush3.bf16.xpose.msra.mxu1 %v1875_v56 }
 0x462   : >>> { %v4491_v38 = vpop.f32.mrb[0].mxu0 }
 0x463   : >>> { %v1758_v33 = vpop.f32.mrb[1].mxu0 }
 0x464   : >>> { %v4492_v39 = vpop.f32.mrb[2].mxu0 }
 0x465   : >>> { %v1822_v62 = vpack.c.bf16 %v4492_v39, %v4491_v38  ;;  %v1761_v31 = vpop.f32.mrb[3].mxu0 }
 0x466   : >>> { %v1821_v35 = vpack.c.bf16 %v1761_v31, %v1758_v33 }
 0x468   : >>> { %4290 = vmatprep.mubr.msk.bf16.mxu1 %vm829_vm2, %v1821_v35 }
 0x469   : >>> { %4291 = vmatmul.mubr.msk.bf16.vlgmr.msra.gmra.mrb[0].mxu1 %vm829_vm2, %v1821_v35 }
 0x46a   : >>> { %4292 = vmatprep.mubr.msk.bf16.mxu1 %vm829_vm2, %v1822_v62  ;;  %v4495_v10 = vpop.f32.mrb[4].mxu0 }
 0x46b   : >>> { %v1774_v59 = vpop.f32.mrb[5].mxu0 }
 0x46c   : >>> { %v4496_v2 = vpop.f32.mrb[6].mxu0 }
 0x46d   : >>> { %v1824_v0 = vpack.c.bf16 %v4496_v2, %v4495_v10  ;;  %v1777_v6 = vpop.f32.mrb[7].mxu0 }
 0x46e   : >>> { %v1823_v8 = vpack.c.bf16 %v1777_v6, %v1774_v59 }
 0x471   : >>> { %4293 = vmatmul.mubr.msk.bf16.gmra.mrb[4].mxu1 %vm829_vm2, %v1822_v62 }
 0x472   : >>> { %4294 = vmatprep.mubr.msk.bf16.mxu1 %vm829_vm2, %v1823_v8  ;;  %v4499_v56 = vpop.f32.mrb[8].mxu0 }
 0x473   : >>> { %v1790_v38 = vpop.f32.mrb[9].mxu0 }
 0x474   : >>> { %v4500_v39 = vpop.f32.mrb[10].mxu0 }
 0x475   : >>> { %v1826_v33 = vpack.c.bf16 %v4500_v39, %v4499_v56  ;;  %v1793_v31 = vpop.f32.mrb[11].mxu0 }
 0x476   : >>> { %v1825_v9 = vpack.c.bf16 %v1793_v31, %v1790_v38 }
 0x479   : >>> { %4295 = vmatmul.mubr.msk.bf16.gmra.mrb[8].mxu1 %vm829_vm2, %v1823_v8 }
 0x47a   : >>> { %4296 = vmatprep.mubr.msk.bf16.mxu1 %vm829_vm2, %v1824_v0  ;;  %v4503_v35 = vpop.f32.mrb[12].mxu0 }
 0x47b   : >>> { %v1806_v12 = vpop.f32.mrb[13].mxu0 }
 0x47c   : >>> { %v4504_v13 = vpop.f32.mrb[14].mxu0 }
 0x47d   : >>> { %v1828_v10 = vpack.c.bf16 %v4504_v13, %v4503_v35  ;;  %v1809_v2 = vpop.f32.mrb[15].mxu0 }
 0x47e   : >>> { %v1827_v6 = vpack.c.bf16 %v1809_v2, %v1806_v12 }
 0x481   : >>> { %4297 = vmatmul.mubr.msk.bf16.gmra.mrb[12].mxu1 %vm829_vm2, %v1824_v0 }
 0x482   : >>> { %4298 = vmatprep.mubr.msk.bf16.mxu1 %vm829_vm2, %v1825_v9 }
 0x489   : >>> { %4299 = vmatmul.mubr.msk.bf16.gmra.mrb[16].mxu1 %vm829_vm2, %v1825_v9 }
 0x48a   : >>> { %4300 = vmatprep.mubr.msk.bf16.mxu1 %vm829_vm2, %v1826_v33 }
 0x491   : >>> { %4301 = vmatmul.mubr.msk.bf16.gmra.mrb[20].mxu1 %vm829_vm2, %v1826_v33 }
 0x492   : >>> { %4302 = vmatprep.mubr.msk.bf16.mxu1 %vm829_vm2, %v1827_v6 }
 0x499   : >>> { %4303 = vmatmul.mubr.msk.bf16.gmra.mrb[24].mxu1 %vm829_vm2, %v1827_v6 }
 0x49a   : >>> { %4304 = vmatprep.mubr.msk.bf16.mxu1 %vm829_vm2, %v1828_v10 }
 0x4a1   : >>> { %4305 = vmatmul.mubr.msk.bf16.gmra.mrb[28].mxu1 %vm829_vm2, %v1828_v10 }
 0x53c   : >>> { %v6303_v13 = vpop.f32.mrb[0].mxu1 }
 0x53d   : >>> { %v6305_v12 = vpop.f32.mrb[1].mxu1 }
 0x53e   : >>> { %v6307_v8 = vpop.f32.mrb[2].mxu1  ;;  %v2014_v9 = vmax.f32 %v6303_v13, %v6305_v12 }
 0x53f   : >>> { %v6311_v62 = vpop.f32.mrb[3].mxu1 }
 0x540   : >>> { %2015 = vmax.xlane.f32.xlu0 %v2014_v9  ;;  %v2017_v59 = vmax.f32 %v6307_v8, %v6311_v62 }
 0x544   : >>> { %2018 = vmax.xlane.f32.xlu0 %v2017_v59  ;;  %v6315_v0 = vpop.f32.mrb[4].mxu1 }
 0x545   : >>> { %v6317_v56 = vpop.f32.mrb[5].mxu1 }
 0x546   : >>> { %v6319_v38 = vpop.f32.mrb[6].mxu1  ;;  %v2020_v39 = vmax.f32 %v6315_v0, %v6317_v56 }
 0x547   : >>> { %v6323_v33 = vpop.f32.mrb[7].mxu1 }
 0x548   : >>> { %2021 = vmax.xlane.f32.xlu1 %v2020_v39  ;;  %v2023_v31 = vmax.f32 %v6319_v38, %v6323_v33 }
 0x54c   : >>> { %2024 = vmax.xlane.f32.xlu1 %v2023_v31  ;;  %v6327_v35 = vpop.f32.mrb[8].mxu1 }
 0x54d   : >>> { %v6329_v10 = vpop.f32.mrb[9].mxu1 }
 0x54e   : >>> { %v6331_v2 = vpop.f32.mrb[10].mxu1  ;;  %v2026_v6 = vmax.f32 %v6327_v35, %v6329_v10 }
 0x54f   : >>> { %v6335_v9 = vpop.f32.mrb[11].mxu1 }
 0x550   : >>> { %2027 = vmax.xlane.f32.xlu0 %v2026_v6  ;;  %v2029_v59 = vmax.f32 %v6331_v2, %v6335_v9 }
 0x552   : >>> { %2030 = vmax.xlane.f32.xlu1 %v2029_v59 }
 0x554   : >>> { %v6339_v39 = vpop.f32.mrb[12].mxu1 }
 0x555   : >>> { %v6341_v15 = vpop.f32.mrb[13].mxu1 }
 0x556   : >>> { %v6343_v31 = vpop.f32.mrb[14].mxu1  ;;  %v2032_v18 = vmax.f32 %v6339_v39, %v6341_v15 }
 0x557   : >>> { %v6347_v22 = vpop.f32.mrb[15].mxu1 }
 0x558   : >>> { %2033 = vmax.xlane.f32.xlu0 %v2032_v18  ;;  %v2035_v23 = vmax.f32 %v6343_v31, %v6347_v22 }
 0x55a   : >>> { %2036 = vmax.xlane.f32.xlu1 %v2035_v23 }
 0x55c   : >>> { %v6351_v6 = vpop.f32.mrb[16].mxu1 }
 0x55d   : >>> { %v6353_v24 = vpop.f32.mrb[17].mxu1 }
 0x55e   : >>> { %v6355_v59 = vpop.f32.mrb[18].mxu1  ;;  %v2038_v27 = vmax.f32 %v6351_v6, %v6353_v24 }
 0x55f   : >>> { %v6359_v29 = vpop.f32.mrb[19].mxu1 }
 0x560   : >>> { %2039 = vmax.xlane.f32.xlu0 %v2038_v27  ;;  %v2041_v40 = vmax.f32 %v6355_v59, %v6359_v29 }
 0x562   : >>> { %2042 = vmax.xlane.f32.xlu1 %v2041_v40 }
 0x564   : >>> { %v6363_v18 = vpop.f32.mrb[20].mxu1 }
 0x565   : >>> { %v6365_v41 = vpop.f32.mrb[21].mxu1 }
 0x566   : >>> { %v6367_v23 = vpop.f32.mrb[22].mxu1  ;;  %v2044_v42 = vmax.f32 %v6363_v18, %v6365_v41 }
 0x567   : >>> { %v6371_v43 = vpop.f32.mrb[23].mxu1 }
 0x568   : >>> { %2045 = vmax.xlane.f32.xlu0 %v2044_v42  ;;  %v2047_v44 = vmax.f32 %v6367_v23, %v6371_v43 }
 0x56a   : >>> { %2048 = vmax.xlane.f32.xlu1 %v2047_v44 }
 0x56c   : >>> { %v6375_v27 = vpop.f32.mrb[24].mxu1 }
 0x56d   : >>> { %v6377_v40 = vpop.f32.mrb[25].mxu1 }
 0x56e   : >>> { %v6379_v45 = vpop.f32.mrb[26].mxu1  ;;  %v2050_v47 = vmax.f32 %v6375_v27, %v6377_v40 }
 0x56f   : >>> { %v6383_v48 = vpop.f32.mrb[27].mxu1 }
 0x570   : >>> { %2051 = vmax.xlane.f32.xlu0 %v2050_v47  ;;  %v2053_v42 = vmax.f32 %v6379_v45, %v6383_v48  ;;  %v2281_v47 = vld [vmem:[%s6400_s23 + $0x40] sm:$0xff] }
 0x571   : >>> { %4306 = vmatprep.subr.bf16.mxu0 %v2281_v47 }
 0x572   : >>> { %2054 = vmax.xlane.f32.xlu1 %v2053_v42  ;;  %v2273_v42 = vld [vmem:[%s6400_s23] sm:$0xff] }
 0x573   : >>> { %4307 = vmatpush3.bf16.msra.mxu0 %v2273_v42 }
 0x574   : >>> { %v6387_v53 = vpop.f32.mrb[28].mxu1  ;;  %4308 = vmatprep.subr.bf16.mxu0 %v2282_v17 }
 0x575   : >>> { %v6389_v44 = vpop.f32.mrb[29].mxu1 }
 0x576   : >>> { %v6391_v55 = vpop.f32.mrb[30].mxu1  ;;  %v2056_v58 = vmax.f32 %v6387_v53, %v6389_v44 }
 0x577   : >>> { %v6395_v63 = vpop.f32.mrb[31].mxu1  ;;  %4309 = vmatpush3.bf16.msra.mxu0 %v2274_v19 }
 0x578   : >>> { %v2059_v51 = vmax.f32 %v6391_v55, %v6395_v63  ;;  %2057 = vmax.xlane.f32.xlu0 %v2056_v58  ;;  %4310 = vmatprep.subr.bf16.mxu0 %v2283_v32  ;;  %v2284_v58 = vld [vmem:[%s6400_s23 + $0x58] sm:$0xff] }
 0x57a   : >>> { %2060 = vmax.xlane.f32.xlu1 %v2059_v51  ;;  %v2275_v51 = vld [vmem:[%s6400_s23 + $0x10] sm:$0xff] }
 0x57b   : >>> { %4311 = vmatpush3.bf16.msra.mxu0 %v2275_v51 }
 0x57c   : >>> { %4312 = vmatprep.subr.bf16.mxu0 %v2284_v58 }
 0x5cd   : >>> { %v2016_v34 = vpop.xlane.xlu0 %2015 }
 0x5ce   : >>> { %v2062_v49 = vsub.f32 %v6303_v13, %v2016_v34  ;;  %v2063_v50 = vsub.f32 %v6305_v12, %v2016_v34 }
 0x5d0   : >>> { %v2094_v3 = vmul.f32 1.442695, %v2062_v49  ;;  %v2096_v4 = vmul.f32 1.442695, %v2063_v50 }
 0x5d1   : >>> { %v2019_v26 = vpop.xlane.xlu0 %2018 }
 0x5d2   : >>> { %4906 = vpow2.f32 %v2094_v3  ;;  %v2064_v47 = vsub.f32 %v6307_v8, %v2019_v26  ;;  %v2065_v17 = vsub.f32 %v6311_v62, %v2019_v26 }
 0x5d3   : >>> { %4908 = vpow2.f32 %v2096_v4 }
 0x5d4   : >>> { %v2098_v19 = vmul.f32 1.442695, %v2064_v47  ;;  %v2100_v32 = vmul.f32 1.442695, %v2065_v17 }
 0x5d5   : >>> { %v2022_v42 = vpop.xlane.xlu1 %2021 }
 0x5d6   : >>> { %4910 = vpow2.f32 %v2098_v19  ;;  %v2066_v51 = vsub.f32 %v6315_v0, %v2022_v42  ;;  %v2067_v58 = vsub.f32 %v6317_v56, %v2022_v42 }
 0x5d7   : >>> { %4912 = vpow2.f32 %v2100_v32 }
 0x5d8   : >>> { %v2102_v13 = vmul.f32 1.442695, %v2066_v51  ;;  %v2104_v34 = vmul.f32 1.442695, %v2067_v58 }
 0x5d9   : >>> { %v2025_v49 = vpop.xlane.xlu1 %2024 }
 0x5da   : >>> { %4914 = vpow2.f32 %v2102_v13  ;;  %v2068_v50 = vsub.f32 %v6319_v38, %v2025_v49  ;;  %v2069_v3 = vsub.f32 %v6323_v33, %v2025_v49 }
 0x5db   : >>> { %4916 = vpow2.f32 %v2104_v34 }
 0x5dc   : >>> { %v6417_v26 = vpop.eup %4906  ;;  %v2106_v4 = vmul.f32 1.442695, %v2068_v50  ;;  %v2108_v12 = vmul.f32 1.442695, %v2069_v3 }
 0x5dd   : >>> { %v6419_v8 = vpop.eup %4908  ;;  %v2028_v62 = vpop.xlane.xlu0 %2027 }
 0x5de   : >>> { %4918 = vpow2.f32 %v2106_v4  ;;  %v2070_v0 = vsub.f32 %v6327_v35, %v2028_v62  ;;  %v2071_v56 = vsub.f32 %v6329_v10, %v2028_v62  ;;  %v2158_v47 = vadd.f32 %v6419_v8, %v6417_v26 }
 0x5df   : >>> { %4920 = vpow2.f32 %v2108_v12  ;;  %v2031_v38 = vpop.xlane.xlu1 %2030 }
 0x5e0   : >>> { %v6425_v17 = vpop.eup %4910  ;;  %v2110_v33 = vmul.f32 1.442695, %v2070_v0  ;;  %v2112_v19 = vmul.f32 1.442695, %v2071_v56  ;;  %v2072_v32 = vsub.f32 %v6331_v2, %v2031_v38  ;;  %v2073_v42 = vsub.f32 %v6335_v9, %v2031_v38  ;;  %2159 = vadd.xlane.f32.xlu0 %v2158_v47 }
 0x5e1   : >>> { %v6429_v51 = vpop.eup %4912 }
 0x5e2   : >>> { %4922 = vpow2.f32 %v2110_v33  ;;  %v2114_v35 = vmul.f32 1.442695, %v2072_v32  ;;  %v2116_v58 = vmul.f32 1.442695, %v2073_v42  ;;  %v2161_v10 = vadd.f32 %v6429_v51, %v6425_v17 }
 0x5e3   : >>> { %4924 = vpow2.f32 %v2112_v19 }
 0x5e4   : >>> { %v6433_v13 = vpop.eup %4914  ;;  %4926 = vpow2.f32 %v2114_v35  ;;  %2162 = vadd.xlane.f32.xlu1 %v2161_v10 }
 0x5e5   : >>> { %v6435_v34 = vpop.eup %4916  ;;  %4928 = vpow2.f32 %v2116_v58  ;;  %v2034_v2 = vpop.xlane.xlu0 %2033 }
 0x5e6   : >>> { %v2074_v9 = vsub.f32 %v6339_v39, %v2034_v2  ;;  %v2075_v49 = vsub.f32 %v6341_v15, %v2034_v2  ;;  %v2164_v50 = vadd.f32 %v6435_v34, %v6433_v13  ;;  %v2276_v2 = vld [vmem:[%s6400_s23 + $0x18] sm:$0xff] }
 0x5e7   : >>> { %v2037_v3 = vpop.xlane.xlu1 %2036  ;;  %4313 = vmatpush3.bf16.msra.mxu0 %v2276_v2 }
 0x5e8   : >>> { %v6441_v4 = vpop.eup %4918  ;;  %v2118_v12 = vmul.f32 1.442695, %v2074_v9  ;;  %v2120_v62 = vmul.f32 1.442695, %v2075_v49  ;;  %v2076_v0 = vsub.f32 %v6343_v31, %v2037_v3  ;;  %v2077_v56 = vsub.f32 %v6347_v22, %v2037_v3  ;;  %2165 = vadd.xlane.f32.xlu0 %v2164_v50 }
 0x5e9   : >>> { %v6445_v47 = vpop.eup %4920 }
 0x5ea   : >>> { %4930 = vpow2.f32 %v2118_v12  ;;  %v2122_v38 = vmul.f32 1.442695, %v2076_v0  ;;  %v2124_v39 = vmul.f32 1.442695, %v2077_v56  ;;  %v2167_v15 = vadd.f32 %v6445_v47, %v6441_v4  ;;  %v2277_v0 = vld [vmem:[%s6400_s23 + $0x20] sm:$0xff] }
 0x5eb   : >>> { %4932 = vpow2.f32 %v2120_v62  ;;  %v2285_v62 = vld [vmem:[%s6400_s23 + $0x60] sm:$0xff] }
 0x5ec   : >>> { %v6449_v33 = vpop.eup %4922  ;;  %4934 = vpow2.f32 %v2122_v38  ;;  %2168 = vadd.xlane.f32.xlu1 %v2167_v15  ;;  %4314 = vmatprep.subr.bf16.mxu0 %v2285_v62  ;;  %v2288_v62 = vld [vmem:[%s6400_s23 + $0x78] sm:$0xff] }
 0x5ed   : >>> { %v6451_v19 = vpop.eup %4924  ;;  %4936 = vpow2.f32 %v2124_v39  ;;  %v2040_v31 = vpop.xlane.xlu0 %2039  ;;  %4315 = vmatpush3.bf16.msra.mxu0 %v2277_v0 }
 0x5ee   : >>> { %v6453_v22 = vpop.eup %4926  ;;  %v2078_v32 = vsub.f32 %v6351_v6, %v2040_v31  ;;  %v2079_v42 = vsub.f32 %v6353_v24, %v2040_v31  ;;  %v2170_v35 = vadd.f32 %v6451_v19, %v6449_v33 }
 0x5ef   : >>> { %v6459_v58 = vpop.eup %4928  ;;  %v2043_v10 = vpop.xlane.xlu1 %2042 }
 0x5f0   : >>> { %v2126_v9 = vmul.f32 1.442695, %v2078_v32  ;;  %v2128_v49 = vmul.f32 1.442695, %v2079_v42  ;;  %v2080_v50 = vsub.f32 %v6355_v59, %v2043_v10  ;;  %v2081_v3 = vsub.f32 %v6359_v29, %v2043_v10  ;;  %2171 = vadd.xlane.f32.xlu0 %v2170_v35  ;;  %v2286_v32 = vld [vmem:[%s6400_s23 + $0x68] sm:$0xff] }
 0x5f1   : >>> { %v2173_v6 = vadd.f32 %v6459_v58, %v6453_v22  ;;  %4316 = vmatprep.subr.bf16.mxu0 %v2286_v32  ;;  %v2278_v10 = vld [vmem:[%s6400_s23 + $0x28] sm:$0xff] }
 0x5f2   : >>> { %4938 = vpow2.f32 %v2126_v9  ;;  %v2130_v24 = vmul.f32 1.442695, %v2080_v50  ;;  %v2132_v12 = vmul.f32 1.442695, %v2081_v3  ;;  %4317 = vmatpush3.bf16.msra.mxu0 %v2278_v10 }
 0x5f3   : >>> { %4940 = vpow2.f32 %v2128_v49  ;;  %2174 = vadd.xlane.f32.xlu1 %v2173_v6  ;;  %v2287_v6 = vld [vmem:[%s6400_s23 + $0x70] sm:$0xff] }
 0x5f4   : >>> { %v6468_v56 = vpop.eup %4930  ;;  %4942 = vpow2.f32 %v2130_v24  ;;  %4318 = vmatprep.subr.bf16.mxu0 %v2287_v6  ;;  %v2279_v24 = vld [vmem:[%s6400_s23 + $0x30] sm:$0xff] }
 0x5f5   : >>> { %v6470_v29 = vpop.eup %4932  ;;  %4944 = vpow2.f32 %v2132_v12  ;;  %v2046_v59 = vpop.xlane.xlu0 %2045 }
 0x5f6   : >>> { %v6472_v38 = vpop.eup %4934  ;;  %v2082_v39 = vsub.f32 %v6363_v18, %v2046_v59  ;;  %v2083_v15 = vsub.f32 %v6365_v41, %v2046_v59  ;;  %v2176_v31 = vadd.f32 %v6470_v29, %v6468_v56  ;;  %4319 = vmatpush3.bf16.msra.mxu0 %v2279_v24 }
 0x5f7   : >>> { %v6479_v42 = vpop.eup %4936  ;;  %v2049_v35 = vpop.xlane.xlu1 %2048  ;;  %4320 = vmatprep.subr.bf16.mxu0 %v2288_v62 }
 0x5f8   : >>> { %v2134_v2 = vmul.f32 1.442695, %v2082_v39  ;;  %v2136_v9 = vmul.f32 1.442695, %v2083_v15  ;;  %v2084_v49 = vsub.f32 %v6367_v23, %v2049_v35  ;;  %v2085_v50 = vsub.f32 %v6371_v43, %v2049_v35  ;;  %2177 = vadd.xlane.f32.xlu0 %v2176_v31  ;;  %v2280_v31 = vld [vmem:[%s6400_s23 + $0x38] sm:$0xff] }
 0x5f9   : >>> { %v2179_v41 = vadd.f32 %v6479_v42, %v6472_v38 }
 0x5fa   : >>> { %4946 = vpow2.f32 %v2134_v2  ;;  %v2138_v18 = vmul.f32 1.442695, %v2084_v49  ;;  %v2140_v3 = vmul.f32 1.442695, %v2085_v50  ;;  %4321 = vmatpush3.bf16.msra.mxu0 %v2280_v31 }
 0x5fb   : >>> { %4948 = vpow2.f32 %v2136_v9  ;;  %2180 = vadd.xlane.f32.xlu1 %v2179_v41 }
 0x5fc   : >>> { %v6488_v12 = vpop.eup %4938  ;;  %4950 = vpow2.f32 %v2138_v18 }
 0x5fd   : >>> { %v6490_v43 = vpop.eup %4940  ;;  %4952 = vpow2.f32 %v2140_v3  ;;  %v2052_v23 = vpop.xlane.xlu0 %2051 }
 0x5fe   : >>> { %v6493_v0 = vpop.eup %4942  ;;  %v2086_v59 = vsub.f32 %v6375_v27, %v2052_v23  ;;  %v2087_v39 = vsub.f32 %v6377_v40, %v2052_v23  ;;  %v2182_v15 = vadd.f32 %v6490_v43, %v6488_v12 }
 0x5ff   : >>> { %v6500_v32 = vpop.eup %4944  ;;  %v2055_v35 = vpop.xlane.xlu1 %2054 }
 0x600   : >>> { %v2142_v10 = vmul.f32 1.442695, %v2086_v59  ;;  %v2144_v2 = vmul.f32 1.442695, %v2087_v39  ;;  %v2088_v9 = vsub.f32 %v6379_v45, %v2055_v35  ;;  %v2089_v49 = vsub.f32 %v6383_v48, %v2055_v35  ;;  %2183 = vadd.xlane.f32.xlu0 %v2182_v15 }
 0x601   : >>> { %v2185_v27 = vadd.f32 %v6500_v32, %v6493_v0 }
 0x602   : >>> { %4954 = vpow2.f32 %v2142_v10  ;;  %v2146_v40 = vmul.f32 1.442695, %v2088_v9  ;;  %v2148_v50 = vmul.f32 1.442695, %v2089_v49 }
 0x603   : >>> { %4956 = vpow2.f32 %v2144_v2  ;;  %2186 = vadd.xlane.f32.xlu1 %v2185_v27 }
 0x604   : >>> { %v6506_v41 = vpop.eup %4946  ;;  %4958 = vpow2.f32 %v2146_v40 }
 0x605   : >>> { %v6508_v18 = vpop.eup %4948  ;;  %4960 = vpow2.f32 %v2148_v50  ;;  %v2058_v3 = vpop.xlane.xlu0 %2057 }
 0x606   : >>> { %v6510_v45 = vpop.eup %4950  ;;  %v2090_v48 = vsub.f32 %v6387_v53, %v2058_v3  ;;  %v2091_v6 = vsub.f32 %v6389_v44, %v2058_v3  ;;  %v2188_v24 = vadd.f32 %v6508_v18, %v6506_v41 }
 0x607   : >>> { %v6516_v23 = vpop.eup %4952  ;;  %v2061_v62 = vpop.xlane.xlu1 %2060 }
 0x608   : >>> { %v2150_v59 = vmul.f32 1.442695, %v2090_v48  ;;  %v2152_v39 = vmul.f32 1.442695, %v2091_v6  ;;  %2189 = vadd.xlane.f32.xlu0 %v2188_v24  ;;  %v2092_v15 = vsub.f32 %v6391_v55, %v2061_v62  ;;  %v2093_v31 = vsub.f32 %v6395_v63, %v2061_v62 }
 0x609   : >>> { %v2191_v35 = vadd.f32 %v6516_v23, %v6510_v45 }
 0x60a   : >>> { %4962 = vpow2.f32 %v2150_v59  ;;  %v2154_v53 = vmul.f32 1.442695, %v2092_v15  ;;  %v2156_v10 = vmul.f32 1.442695, %v2093_v31 }
 0x60b   : >>> { %4964 = vpow2.f32 %v2152_v39  ;;  %2192 = vadd.xlane.f32.xlu1 %v2191_v35 }
 0x60c   : >>> { %v6522_v44 = vpop.eup %4954  ;;  %4966 = vpow2.f32 %v2154_v53 }
 0x60d   : >>> { %v6524_v2 = vpop.eup %4956  ;;  %4968 = vpow2.f32 %v2156_v10 }
 0x60e   : >>> { %v6526_v9 = vpop.eup %4958  ;;  %v2194_v55 = vadd.f32 %v6524_v2, %v6522_v44 }
 0x60f   : >>> { %v6530_v63 = vpop.eup %4960 }
 0x610   : >>> { %2195 = vadd.xlane.f32.xlu0 %v2194_v55  ;;  %v2197_v49 = vadd.f32 %v6530_v63, %v6526_v9 }
 0x612   : >>> { %2198 = vadd.xlane.f32.xlu1 %v2197_v49 }
 0x614   : >>> { %v6534_v27 = vpop.eup %4962 }
 0x615   : >>> { %v6536_v40 = vpop.eup %4964 }
 0x616   : >>> { %v6538_v50 = vpop.eup %4966  ;;  %v2200_v3 = vadd.f32 %v6536_v40, %v6534_v27 }
 0x617   : >>> { %v6542_v48 = vpop.eup %4968 }
 0x618   : >>> { %2201 = vadd.xlane.f32.xlu0 %v2200_v3  ;;  %v2203_v6 = vadd.f32 %v6542_v48, %v6538_v50 }
 0x61a   : >>> { %2204 = vadd.xlane.f32.xlu1 %v2203_v6 }
 0x66d   : >>> { %v2160_v24 = vpop.xlane.xlu0 %2159 }
 0x66e   : >>> { %4970 = vrcp.f32 %v2160_v24 }
 0x671   : >>> { %v2163_v62 = vpop.xlane.xlu1 %2162 }
 0x672   : >>> { %4972 = vrcp.f32 %v2163_v62 }
 0x675   : >>> { %v2166_v59 = vpop.xlane.xlu0 %2165 }
 0x676   : >>> { %4974 = vrcp.f32 %v2166_v59 }
 0x678   : >>> { %v4971_v15 = vpop.eup %4970 }
 0x679   : >>> { %v2169_v39 = vpop.xlane.xlu1 %2168  ;;  %v2222_v35 = vmul.f32 %v4971_v15, %v6417_v26  ;;  %v2223_v55 = vmul.f32 %v4971_v15, %v6419_v8 }
 0x67a   : >>> { %4976 = vrcp.f32 %v2169_v39 }
 0x67c   : >>> { %v4973_v31 = vpop.eup %4972 }
 0x67d   : >>> { %v2224_v53 = vmul.f32 %v4973_v31, %v6425_v17  ;;  %v2172_v10 = vpop.xlane.xlu0 %2171  ;;  %v2225_v49 = vmul.f32 %v4973_v31, %v6429_v51 }
 0x67e   : >>> { %4978 = vrcp.f32 %v2172_v10 }
 0x67f   : >>> { %v2255_v3 = vpack.c.bf16 %v2225_v49, %v2223_v55  ;;  %v2254_v6 = vpack.c.bf16 %v2224_v53, %v2222_v35 }
 0x680   : >>> { %v2175_v24 = vpop.xlane.xlu1 %2174  ;;  %v4975_v62 = vpop.eup %4974 }
 0x681   : >>> { %4980 = vrcp.f32 %v2175_v24  ;;  %2321 = vmatprep.mubr.bf16.mxu0 %v2255_v3  ;;  %v2227_v46 = vmul.f32 %v4975_v62, %v6435_v34  ;;  %v2226_v17 = vmul.f32 %v4975_v62, %v6433_v13 }
 0x682   : >>> { %2322 = vmatmul.mubr.bf16.vlgmr.msra.gmra.mrb[16].mxu0 %v2254_v6 }
 0x684   : >>> { %v4977_v59 = vpop.eup %4976 }
 0x685   : >>> { %v2178_v39 = vpop.xlane.xlu0 %2177  ;;  %v2229_v26 = vmul.f32 %v4977_v59, %v6445_v47  ;;  %v2228_v8 = vmul.f32 %v4977_v59, %v6441_v4 }
 0x686   : >>> { %4982 = vrcp.f32 %v2178_v39 }
 0x687   : >>> { %v2257_v51 = vpack.c.bf16 %v2229_v26, %v2227_v46  ;;  %v2256_v15 = vpack.c.bf16 %v2228_v8, %v2226_v17 }
 0x688   : >>> { %v2181_v31 = vpop.xlane.xlu1 %2180  ;;  %v4979_v35 = vpop.eup %4978 }
 0x689   : >>> { %4984 = vrcp.f32 %v2181_v31  ;;  %2329 = vmatprep.mubr.bf16.mxu0 %v2257_v51  ;;  %v2231_v10 = vmul.f32 %v4979_v35, %v6451_v19  ;;  %v2230_v13 = vmul.f32 %v4979_v35, %v6449_v33 }
 0x68a   : >>> { %2330 = vmatmul.mubr.bf16.gmra.mrb[20].mxu0 %v2256_v15 }
 0x68b   : >>> { %v4981_v53 = vpop.eup %4980 }
 0x68c   : >>> { %v2233_v55 = vmul.f32 %v4981_v53, %v6459_v58  ;;  %v2232_v34 = vmul.f32 %v4981_v53, %v6453_v22 }
 0x68d   : >>> { %v2184_v47 = vpop.xlane.xlu0 %2183 }
 0x68e   : >>> { %v2259_v49 = vpack.c.bf16 %v2233_v55, %v2231_v10  ;;  %4986 = vrcp.f32 %v2184_v47  ;;  %v2258_v4 = vpack.c.bf16 %v2232_v34, %v2230_v13 }
 0x690   : >>> { %2337 = vmatprep.mubr.bf16.mxu0 %v2259_v49  ;;  %v2187_v46 = vpop.xlane.xlu1 %2186  ;;  %v4983_v3 = vpop.eup %4982 }
 0x691   : >>> { %4988 = vrcp.f32 %v2187_v46  ;;  %v2235_v24 = vmul.f32 %v4983_v3, %v6470_v29  ;;  %v2234_v59 = vmul.f32 %v4983_v3, %v6468_v56 }
 0x692   : >>> { %2338 = vmatmul.mubr.bf16.gmra.mrb[24].mxu0 %v2258_v4 }
 0x693   : >>> { %v4985_v6 = vpop.eup %4984 }
 0x694   : >>> { %v2237_v19 = vmul.f32 %v4985_v6, %v6479_v42  ;;  %v2236_v58 = vmul.f32 %v4985_v6, %v6472_v38 }
 0x695   : >>> { %v2190_v62 = vpop.xlane.xlu0 %2189 }
 0x696   : >>> { %v2261_v22 = vpack.c.bf16 %v2237_v19, %v2235_v24  ;;  %4990 = vrcp.f32 %v2190_v62  ;;  %v2260_v39 = vpack.c.bf16 %v2236_v58, %v2234_v59 }
 0x698   : >>> { %2345 = vmatprep.mubr.bf16.mxu0 %v2261_v22  ;;  %v2193_v33 = vpop.xlane.xlu1 %2192  ;;  %v4987_v26 = vpop.eup %4986 }
 0x699   : >>> { %4992 = vrcp.f32 %v2193_v33  ;;  %v2239_v8 = vmul.f32 %v4987_v26, %v6490_v43  ;;  %v2238_v15 = vmul.f32 %v4987_v26, %v6488_v12 }
 0x69a   : >>> { %2346 = vmatmul.mubr.bf16.gmra.mrb[28].mxu0 %v2260_v39 }
 0x69b   : >>> { %v4989_v17 = vpop.eup %4988 }
 0x69c   : >>> { %v2241_v29 = vmul.f32 %v4989_v17, %v6500_v32  ;;  %v2240_v42 = vmul.f32 %v4989_v17, %v6493_v0 }
 0x69d   : >>> { %v2196_v51 = vpop.xlane.xlu0 %2195 }
 0x69e   : >>> { %4994 = vrcp.f32 %v2196_v51  ;;  %v2263_v38 = vpack.c.bf16 %v2241_v29, %v2239_v8  ;;  %v2262_v31 = vpack.c.bf16 %v2240_v42, %v2238_v15 }
 0x69f   : >>> { %v2199_v56 = vpop.xlane.xlu1 %2198 }
 0x6a0   : >>> { %2353 = vmatprep.mubr.bf16.mxu0 %v2263_v38  ;;  %4996 = vrcp.f32 %v2199_v56  ;;  %v4991_v35 = vpop.eup %4990 }
 0x6a1   : >>> { %v2243_v10 = vmul.f32 %v4991_v35, %v6508_v18  ;;  %v2242_v34 = vmul.f32 %v4991_v35, %v6506_v41 }
 0x6a2   : >>> { %2354 = vmatmul.mubr.bf16.gmra.mrb[32].mxu0 %v2262_v31 }
 0x6a3   : >>> { %v4993_v53 = vpop.eup %4992 }
 0x6a4   : >>> { %v2245_v43 = vmul.f32 %v4993_v53, %v6516_v23  ;;  %v2244_v32 = vmul.f32 %v4993_v53, %v6510_v45 }
 0x6a5   : >>> { %v2202_v55 = vpop.xlane.xlu0 %2201 }
 0x6a6   : >>> { %4998 = vrcp.f32 %v2202_v55  ;;  %v2265_v0 = vpack.c.bf16 %v2245_v43, %v2243_v10  ;;  %v2264_v49 = vpack.c.bf16 %v2244_v32, %v2242_v34 }
 0x6a7   : >>> { %v2205_v47 = vpop.xlane.xlu1 %2204 }
 0x6a8   : >>> { %v4995_v12 = vpop.eup %4994  ;;  %2361 = vmatprep.mubr.bf16.mxu0 %v2265_v0  ;;  %5000 = vrcp.f32 %v2205_v47 }
 0x6a9   : >>> { %v2247_v46 = vmul.f32 %v4995_v12, %v6524_v2  ;;  %v2246_v45 = vmul.f32 %v4995_v12, %v6522_v44 }
 0x6aa   : >>> { %v4997_v13 = vpop.eup %4996  ;;  %2362 = vmatmul.mubr.bf16.gmra.mrb[36].mxu0 %v2264_v49 }
 0x6ab   : >>> { %v2249_v18 = vmul.f32 %v4997_v13, %v6530_v63  ;;  %v2248_v23 = vmul.f32 %v4997_v13, %v6526_v9 }
 0x6ad   : >>> { %v2267_v4 = vpack.c.bf16 %v2249_v18, %v2247_v46  ;;  %v2266_v6 = vpack.c.bf16 %v2248_v23, %v2246_v45 }
 0x6af   : >>> { %2369 = vmatprep.mubr.bf16.mxu0 %v2267_v4 }
 0x6b0   : >>> { %v4999_v3 = vpop.eup %4998 }
 0x6b1   : >>> { %v2251_v24 = vmul.f32 %v4999_v3, %v6536_v40  ;;  %v2250_v2 = vmul.f32 %v4999_v3, %v6534_v27 }
 0x6b2   : >>> { %v5001_v41 = vpop.eup %5000  ;;  %2370 = vmatmul.mubr.bf16.gmra.mrb[40].mxu0 %v2266_v6 }
 0x6b3   : >>> { %v2253_v19 = vmul.f32 %v5001_v41, %v6542_v48  ;;  %v2252_v58 = vmul.f32 %v5001_v41, %v6538_v50 }
 0x6b5   : >>> { %v2269_v62 = vpack.c.bf16 %v2253_v19, %v2251_v24  ;;  %v2268_v63 = vpack.c.bf16 %v2252_v58, %v2250_v2 }
 0x6b7   : >>> { %2377 = vmatprep.mubr.bf16.mxu0 %v2269_v62 }
 0x6ba   : >>> { %2378 = vmatmul.mubr.bf16.gmra.mrb[44].mxu0 %v2268_v63 }
 0x755   : >>> { %v4322_v9 = vpop.f32.mrb[16].mxu0 }
 0x756   : >>> { %v4323_v22 = vpop.f32.mrb[17].mxu0 }
 0x757   : >>> { %v4324_v44 = vadd.f32 %v4323_v22, %v4322_v9  ;;  %v4325_v59 = vpop.f32.mrb[18].mxu0 }
 0x758   : >>> { %v4326_v33 = vpop.f32.mrb[19].mxu0 }
 0x759   : >>> { %v6579_v25 = vadd.f32 %v5352_v25, %v4324_v44   ;;  %v4327_v26 = vadd.f32 %v4326_v33, %v4325_v59 }
 0x75b   : >>> { %v7871_v39 = vmov %v6579_v25  ;;  %v6582_v28 = vadd.f32 %v5348_v28, %v4327_v26  }
 0x75c   : >> { %2403 = vst.msk [vmem:[%s2402_s16] sm:$0xff] (%p6607_p12), %vm829_vm2, %v7871_v39 }
 0x75d   : >>> { %v7872_v40 = vmov %v6582_v28  ;;  %v4328_v48 = vpop.f32.mrb[20].mxu0 }
 0x75e   : >>> { %v4329_v50 = vpop.f32.mrb[21].mxu0  ;;  %2404 = vst.msk [vmem:[%s2402_s16 + $0x8] sm:$0xff] (%p6607_p12), %vm829_vm2, %v7872_v40 }
 0x75f   : >>> { %v4330_v17 = vadd.f32 %v4329_v50, %v4328_v48  ;;  %v4331_v8 = vpop.f32.mrb[22].mxu0 }
 0x760   : >>> { %v4332_v27 = vpop.f32.mrb[23].mxu0 }
 0x761   : >>> { %v6585_v60 = vadd.f32 %v5344_v60, %v4330_v17   ;;  %v4333_v42 = vadd.f32 %v4332_v27, %v4331_v8 }
 0x763   : >>> { %v7873_v29 = vmov %v6585_v60  ;;  %v6588_v36 = vadd.f32 %v5340_v36, %v4333_v42  }
 0x764   : >> { %2405 = vst.msk [vmem:[%s2402_s16 + $0x10] sm:$0xff] (%p6607_p12), %vm829_vm2, %v7873_v29 }
 0x765   : >>> { %v7874_v51 = vmov %v6588_v36  ;;  %v4334_v38 = vpop.f32.mrb[24].mxu0 }
 0x766   : >>> { %v4335_v15 = vpop.f32.mrb[25].mxu0  ;;  %2406 = vst.msk [vmem:[%s2402_s16 + $0x18] sm:$0xff] (%p6607_p12), %vm829_vm2, %v7874_v51 }
 0x767   : >>> { %v4336_v56 = vadd.f32 %v4335_v15, %v4334_v38  ;;  %v4337_v25 = vpop.f32.mrb[26].mxu0 }
 0x768   : >>> { %v4338_v31 = vpop.f32.mrb[27].mxu0 }
 0x769   : >>> { %v6591_v16 = vadd.f32 %v5336_v16, %v4336_v56   ;;  %v4339_v28 = vadd.f32 %v4338_v31, %v4337_v25  ;;  %v7893_v25 = vmov %v7871_v39 }
 0x76b   : >>> { %v7875_v35 = vmov %v6591_v16  ;;  %v6594_v1 = vadd.f32 %v5332_v1, %v4339_v28   ;;  %v7892_v28 = vmov %v7872_v40 }
 0x76c   : >> { %2407 = vst.msk [vmem:[%s2402_s16 + $0x20] sm:$0xff] (%p6607_p12), %vm829_vm2, %v7875_v35 }
 0x76d   : >>> { %v7876_v53 = vmov %v6594_v1  ;;  %v4340_v10 = vpop.f32.mrb[28].mxu0 }
 0x76e   : >>> { %v4341_v43 = vpop.f32.mrb[29].mxu0  ;;  %2408 = vst.msk [vmem:[%s2402_s16 + $0x28] sm:$0xff] (%p6607_p12), %vm829_vm2, %v7876_v53 }
 0x76f   : >>> { %v4342_v32 = vadd.f32 %v4341_v43, %v4340_v10  ;;  %v4343_v60 = vpop.f32.mrb[30].mxu0 }
 0x770   : >>> { %v4344_v55 = vpop.f32.mrb[31].mxu0 }
 0x771   : >>> { %v2392_v0 = vadd.f32 %v5328_v61, %v4342_v32   ;;  %v4345_v36 = vadd.f32 %v4344_v55, %v4343_v60  ;;  %v7891_v60 = vmov %v7873_v29 }
 0x773   : >>> { %v2393_v34 = vadd.f32 %v5324_v7, %v4345_v36   ;;  %v7890_v36 = vmov %v7874_v51  ;;  %2409 = vst.msk [vmem:[%s2402_s16 + $0x30] sm:$0xff] (%p6607_p12), %vm829_vm2, %v2392_v0 }
 0x775   : >>> { %v4346_v47 = vpop.f32.mrb[32].mxu0  ;;  %2410 = vst.msk [vmem:[%s2402_s16 + $0x38] sm:$0xff] (%p6607_p12), %vm829_vm2, %v2393_v34 }
 0x776   : >>> { %v4347_v12 = vpop.f32.mrb[33].mxu0 }
 0x777   : >>> { %v4348_v49 = vadd.f32 %v4347_v12, %v4346_v47  ;;  %v4349_v13 = vpop.f32.mrb[34].mxu0 }
 0x778   : >>> { %v4350_v46 = vpop.f32.mrb[35].mxu0 }
 0x779   : >>> { %v2394_v18 = vadd.f32 %v5320_v14, %v4348_v49   ;;  %v4351_v16 = vadd.f32 %v4350_v46, %v4349_v13 }
 0x77b   : >>> { %v2395_v23 = vadd.f32 %v5316_v52, %v4351_v16   ;;  %v7889_v16 = vmov %v7875_v35  ;;  %2411 = vst.msk [vmem:[%s2402_s16 + $0x40] sm:$0xff] (%p6607_p12), %vm829_vm2, %v2394_v18 }
 0x77d   : >>> { %v4352_v1 = vpop.f32.mrb[36].mxu0  ;;  %2412 = vst.msk [vmem:[%s2402_s16 + $0x48] sm:$0xff] (%p6607_p12), %vm829_vm2, %v2395_v23 }
 0x77e   : >>> { %v4353_v4 = vpop.f32.mrb[37].mxu0 }
 0x77f   : >>> { %v4354_v45 = vadd.f32 %v4353_v4, %v4352_v1  ;;  %v4355_v3 = vpop.f32.mrb[38].mxu0  ;;  %v7888_v1 = vmov %v7876_v53 }
 0x780   : >>> { %v4356_v6 = vpop.f32.mrb[39].mxu0 }
 0x781   : >>> { %v2396_v41 = vadd.f32 %v5312_v57, %v4354_v45   ;;  %v4357_v61 = vadd.f32 %v4356_v6, %v4355_v3 }
 0x783   : >>> { %v2397_v24 = vadd.f32 %v5308_v21, %v4357_v61   ;;  %v7887_v61 = vmov %v2392_v0  ;;  %2413 = vst.msk [vmem:[%s2402_s16 + $0x50] sm:$0xff] (%p6607_p12), %vm829_vm2, %v2396_v41 }
 0x785   : >>> { %v4358_v7 = vpop.f32.mrb[40].mxu0  ;;  %v7882_v21 = vmov %v2397_v24  ;;  %2414 = vst.msk [vmem:[%s2402_s16 + $0x58] sm:$0xff] (%p6607_p12), %vm829_vm2, %v2397_v24 }
 0x786   : >>> { %v4359_v19 = vpop.f32.mrb[41].mxu0 }
 0x787   : >>> { %v4360_v58 = vadd.f32 %v4359_v19, %v4358_v7  ;;  %v4361_v62 = vpop.f32.mrb[42].mxu0  ;;  %v7886_v7 = vmov %v2393_v34 }
 0x788   : >>> { %v4362_v2 = vpop.f32.mrb[43].mxu0 }
 0x789   : >>> { %v2398_v63 = vadd.f32 %v5304_v37, %v4360_v58   ;;  %v4363_v14 = vadd.f32 %v4362_v2, %v4361_v62 }
 0x78b   : >>> { %v2399_v9 = vadd.f32 %v5300_v11, %v4363_v14   ;;  %v7881_v37 = vmov %v2398_v63  ;;  %v7885_v14 = vmov %v2394_v18  ;;  %2415 = vst.msk [vmem:[%s2402_s16 + $0x60] sm:$0xff] (%p6607_p12), %vm829_vm2, %v2398_v63 }
 0x78d   : >>> { %v4364_v52 = vpop.f32.mrb[44].mxu0  ;;  %v7880_v11 = vmov %v2399_v9  ;;  %2416 = vst.msk [vmem:[%s2402_s16 + $0x68] sm:$0xff] (%p6607_p12), %vm829_vm2, %v2399_v9 }
 0x78e   : >>> { %v4365_v22 = vpop.f32.mrb[45].mxu0 }
 0x78f   : >>> { %v4366_v44 = vadd.f32 %v4365_v22, %v4364_v52  ;;  %v4367_v59 = vpop.f32.mrb[46].mxu0  ;;  %v7884_v52 = vmov %v2395_v23  ;;  %1663 = sbr.rel (!%p6607_p12) target bundleno = 900 (0x384), region = 153 }
 0x790   : >>> { %v4368_v33 = vpop.f32.mrb[47].mxu0 }
 0x791   : >>> { %v2400_v26 = vadd.f32 %v5296_v5, %v4366_v44   ;;  %v4369_v57 = vadd.f32 %v4368_v33, %v4367_v59 }
 0x793   : >>> { %v2401_v48 = vadd.f32 %v5292_v54, %v4369_v57   ;;  %v7879_v5 = vmov %v2400_v26  ;;  %v7883_v57 = vmov %v2396_v41  ;;  %2417 = vst.msk [vmem:[%s2402_s16 + $0x70] sm:$0xff] (%p6607_p12), %vm829_vm2, %v2400_v26 }
 0x795   : >>> { %v7878_v54 = vmov %v2401_v48  ;;  %2418 = vst.msk [vmem:[%s2402_s16 + $0x78] sm:$0xff] (%p6607_p12), %vm829_vm2, %v2401_v48 }
 0x796   : > { %1644 = sbr.rel (!%p1642_p13) target bundleno = 891 (0x37b), region = 164  ;;  %v7894_v39 = vld [vmem:[#allocation15_spill] sm:$0xff] (%p1642_p13)  ;;  %v7896_v38 = vld [vmem:[#allocation21_spill] sm:$0xff] (%p1642_p13)  ;;  %v7897_v56 = vld [vmem:[#allocation20_spill] sm:$0xff] (%p1642_p13)  ;;  %vm5359_vm3 = vmmov (%p1642_p13), 0   ;;  %s4221_s16 = sshll.u32 (%p1642_p13), %s5462_s22, 4 }
 0x797   : > { %v7895_v17 = vld [vmem:[#allocation11_spill] sm:$0xff] (%p1642_p13)  ;;  %v7899_v10 = vld [vmem:[#allocation17_spill] sm:$0xff] (%p1642_p13)  ;;  %v7900_v32 = vld [vmem:[#allocation16_spill] sm:$0xff] (%p1642_p13)  ;;  %s3971_s20 = sshll.u32 (%p1642_p13), %s6045_s26, 4  ;;  %s7651_s30 = scalar_lea.hbm (%p1642_p13), %s7711_s15, %s4221_s16  ;;  %s7653_s20 = int_to_ptr.vmem [resolvable:$true] %s3971_s20 }
 0x798   : > { %v7901_v49 = vld [vmem:[#allocation29_spill] sm:$0xff] (%p1642_p13)  ;;  %v7903_v46 = vld [vmem:[#allocation28_spill] sm:$0xff] (%p1642_p13)  ;;  %v7909_v19 = vld [vmem:[#allocation35_spill] sm:$0xff] (%p1642_p13)  ;;  %s7974_s23 = sand.u32 (%p1642_p13), 1, %s5272_s19   ;;  %s5142_s22 = scalar_lea.vmem (%p1642_p13), %s7653_s20, 16 }
 0x799   : > { %v7905_v16 = vld [vmem:[#allocation25_spill] sm:$0xff] (%p1642_p13)  ;;  %v7907_v1 = vld [vmem:[#allocation24_spill] sm:$0xff] (%p1642_p13)  ;;  %v7911_v62 = vld [vmem:[#allocation34_spill] sm:$0xff] (%p1642_p13)  ;;  %s3959_s25 = scalar_lea.sflag (%p1642_p13), [#allocation6], %s7974_s23  ;;  %p5143_p0 = scmp.ne.s32.totalorder (%p1642_p13), %s7653_s20, %s5142_s22 }
 0x79a   : > { %v7913_v52 = vld [vmem:[#allocation33_spill] sm:$0xff] (%p1642_p13)  ;;  %v7915_v44 = vld [vmem:[#allocation32_spill] sm:$0xff] (%p1642_p13)  ;;  %s5360_s0 = smov (%p1642_p13), [#allocation5]  }
 0x79b   : > { %p5144_p1 = pnand (%p1642_p13), %p5143_p0, %p5479_p5  ;;  %s5146_s1 = sshll.u32 (%p1642_p13), %s5360_s0, 4  ;;  %s5147_s1 = int_to_ptr.vmem [resolvable:$false] %s5146_s1 }
 0x79c   : > { %v2419_v54 = vld [vmem:[#allocation4] sm:$0xff] (%p1642_p13)  ;;  %v2421_v5 = vld [vmem:[#allocation4 + $0x10] sm:$0xff] (%p1642_p13)  ;;  %v2420_v11 = vld [vmem:[#allocation4 + $0x8] sm:$0xff] (%p1642_p13)  ;;  %s5148_s16 = scalar_lea.vmem (%p1642_p13), %s5147_s1, 32  ;;  %p5149_p3 = scmp.lt.s32.totalorder (%p1642_p13), %s7653_s20, %s5147_s1 }
 0x79d   : > { %v6681_v37 = vadd.f32 %v2419_v54, %v5549_v30  ;;  %v6684_v21 = vadd.f32 %v2421_v5, %v5538_v20  ;;  %v6687_v40 = vadd.f32 %v2420_v11, %v7894_v39  ;;  %v2422_v50 = vld [vmem:[#allocation4 + $0x18] sm:$0xff]  ;;  %v2423_v27 = vld [vmem:[#allocation4 + $0x20] sm:$0xff]  ;;  %v2424_v29 = vld [vmem:[#allocation4 + $0x28] sm:$0xff]  ;;  %p5145_p2 = pneg %p5144_p1  ;;  %p5150_p4 = scmp.lt.s32.totalorder %s5148_s16, %s5142_s22 }
 0x79e   : > { %v6690_v8 = vadd.f32 %v2422_v50, %v7895_v17  ;;  %v6701_v15 = vadd.f32 %v2423_v27, %v7896_v38  ;;  %v6704_v25 = vadd.f32 %v2424_v29, %v7897_v56  ;;  %v2425_v31 = vld [vmem:[#allocation4 + $0x30] sm:$0xff]  ;;  %v2426_v35 = vld [vmem:[#allocation4 + $0x38] sm:$0xff]  ;;  %v2427_v55 = vld [vmem:[#allocation4 + $0x40] sm:$0xff] }
 0x79f   : > { %v2485_v42 = vsel %vm829_vm2, %v6681_v37, 0.0  ;;  %v2491_v51 = vsel %vm829_vm2, %v6684_v21, 0.0  ;;  %v2488_v20 = vsel %vm829_vm2, %v6687_v40, 0.0  ;;  %v6711_v43 = vadd.f32 %v2425_v31, %v7899_v10  ;;  %v2428_v0 = vld [vmem:[#allocation4 + $0x48] sm:$0xff]  ;;  %v2429_v36 = vld [vmem:[#allocation4 + $0x50] sm:$0xff]  ;;  %v2430_v34 = vld [vmem:[#allocation4 + $0x58] sm:$0xff]  ;;  %p5151_p7 = por %p5150_p4, %p5149_p3 }
 0x7a0   : > { %2486 = vadd.xlane.f32.xlu0 %v2485_v42  ;;  %2492 = vadd.xlane.f32.xlu1 %v2491_v51  ;;  %v2494_v30 = vsel %vm829_vm2, %v6690_v8, 0.0  ;;  %7898 = vst [vmem:[#allocation40_spill] sm:$0xff] %v6704_v25  ;;  %v2497_v28 = vsel %vm829_vm2, %v6701_v15, 0.0  ;;  %v2500_v53 = vsel %vm829_vm2, %v6704_v25, 0.0  ;;  %v6714_v60 = vadd.f32 %v2426_v35, %v7900_v32  ;;  %v2431_v45 = vld [vmem:[#allocation4 + $0x60] sm:$0xff]  ;;  %v2432_v3 = vld [vmem:[#allocation4 + $0x68] sm:$0xff] }
 0x7a1   : > { %v2503_v47 = vsel %vm829_vm2, %v6711_v43, 0.0  ;;  %v6721_v13 = vadd.f32 %v2427_v55, %v7901_v49  ;;  %v6724_v18 = vadd.f32 %v2428_v0, %v7903_v46  ;;  %v6727_v23 = vadd.f32 %v2429_v36, %v7905_v16  ;;  %v2433_v7 = vld [vmem:[#allocation4 + $0x70] sm:$0xff]  ;;  %v2434_v63 = vld [vmem:[#allocation4 + $0x78] sm:$0xff]  ;;  %v2435_v33 = vld [vmem:[#allocation4 + $0x80] sm:$0xff]  ;;  %p5152_p8 = pnand %p5151_p7, %p5145_p2 }
 0x7a2   : > { %v2506_v12 = vsel %vm829_vm2, %v6714_v60, 0.0  ;;  %v6730_v4 = vadd.f32 %v2430_v34, %v7907_v1  ;;  %v6741_v58 = vadd.f32 %v2431_v45, %v7909_v19  ;;  %v6744_v2 = vadd.f32 %v2432_v3, %v7911_v62  ;;  %v2436_v26 = vld [vmem:[#allocation4 + $0x88] sm:$0xff]  ;;  %v7917_v54 = vld [vmem:[#allocation13_spill] sm:$0xff]  ;;  %v2437_v50 = vld [vmem:[#allocation4 + $0x90] sm:$0xff] }
 0x7a3   : > { %7902 = vst [vmem:[#allocation41_spill] sm:$0xff] %v6721_v13  ;;  %7904 = vst [vmem:[#allocation42_spill] sm:$0xff] %v6724_v18  ;;  %v2509_v6 = vsel %vm829_vm2, %v6721_v13, 0.0  ;;  %v2512_v41 = vsel %vm829_vm2, %v6724_v18, 0.0  ;;  %v2515_v61 = vsel %vm829_vm2, %v6727_v23, 0.0  ;;  %v6751_v22 = vadd.f32 %v2433_v7, %v7913_v52  ;;  %v7919_v11 = vld [vmem:[#allocation14_spill] sm:$0xff] }
 0x7a4   : > { %2489 = vadd.xlane.f32.xlu0 %v2488_v20  ;;  %2495 = vadd.xlane.f32.xlu1 %v2494_v30  ;;  %7906 = vst [vmem:[#allocation43_spill] sm:$0xff] %v6727_v23  ;;  %7908 = vst [vmem:[#allocation44_spill] sm:$0xff] %v6730_v4  ;;  %v2518_v24 = vsel %vm829_vm2, %v6730_v4, 0.0  ;;  %v2521_v14 = vsel %vm829_vm2, %v6741_v58, 0.0  ;;  %v2524_v9 = vsel %vm829_vm2, %v6744_v2, 0.0  ;;  %v6754_v59 = vadd.f32 %v2434_v63, %v7915_v44  ;;  %v2438_v17 = vld [vmem:[#allocation4 + $0x98] sm:$0xff] }
 0x7a5   : > { %7910 = vst [vmem:[#allocation45_spill] sm:$0xff] %v6741_v58  ;;  %7912 = vst [vmem:[#allocation46_spill] sm:$0xff] %v6744_v2  ;;  %v2527_v57 = vsel %vm829_vm2, %v6751_v22, 0.0  ;;  %v6761_v5 = vadd.f32 %v2435_v33, %v7917_v54  ;;  %v6764_v39 = vadd.f32 %v2436_v26, %v7919_v11  ;;  %v7921_v42 = vld [vmem:[#allocation10_spill] sm:$0xff]  ;;  %v7923_v20 = vld [vmem:[#allocation12_spill] sm:$0xff] }
 0x7a6   : > { %7914 = vst [vmem:[#allocation47_spill] sm:$0xff] %v6751_v22  ;;  %7916 = vst [vmem:[#allocation48_spill] sm:$0xff] %v6754_v59  ;;  %v2530_v48 = vsel %vm829_vm2, %v6754_v59, 0.0  ;;  %v6771_v51 = vadd.f32 %v2437_v50, %v7921_v42  ;;  %v6774_v30 = vadd.f32 %v2438_v17, %v7923_v20  ;;  %v2439_v38 = vld [vmem:[#allocation4 + $0xa0] sm:$0xff]  ;;  %v2440_v56 = vld [vmem:[#allocation4 + $0xa8] sm:$0xff] }
 0x7a7   : > { %7918 = vst [vmem:[#allocation49_spill] sm:$0xff] %v6761_v5  ;;  %7920 = vst [vmem:[#allocation50_spill] sm:$0xff] %v6764_v39  ;;  %v2533_v27 = vsel %vm829_vm2, %v6761_v5, 0.0  ;;  %v2536_v29 = vsel %vm829_vm2, %v6764_v39, 0.0  ;;  %v7927_v10 = vld [vmem:[#allocation22_spill] sm:$0xff]  ;;  %v2441_v55 = vld [vmem:[#allocation4 + $0xb0] sm:$0xff] }
 0x7a8   : > { %2498 = vadd.xlane.f32.xlu0 %v2497_v28  ;;  %2501 = vadd.xlane.f32.xlu1 %v2500_v53  ;;  %7922 = vst [vmem:[#allocation51_spill] sm:$0xff] %v6771_v51  ;;  %7924 = vst [vmem:[#allocation52_spill] sm:$0xff] %v6774_v30  ;;  %v2539_v31 = vsel %vm829_vm2, %v6771_v51, 0.0  ;;  %v2542_v35 = vsel %vm829_vm2, %v6774_v30, 0.0  ;;  %v7925_v28 = vld [vmem:[#allocation23_spill] sm:$0xff]  ;;  %v6784_v32 = vadd.f32 %v2440_v56, %v7927_v10  ;;  %v2442_v0 = vld [vmem:[#allocation4 + $0xb8] sm:$0xff] }
 0x7a9   : > { %v6781_v53 = vadd.f32 %v2439_v38, %v7925_v28  ;;  %v7931_v49 = vld [vmem:[#allocation18_spill] sm:$0xff]  ;;  %v2445_v7 = vld [vmem:[#allocation4 + $0xd0] sm:$0xff]  ;;  %v2446_v19 = vld [vmem:[#allocation4 + $0xd8] sm:$0xff] }
 0x7aa   : > { %7928 = vst [vmem:[#allocation54_spill] sm:$0xff] %v6784_v32  ;;  %v2548_v34 = vsel %vm829_vm2, %v6784_v32, 0.0  ;;  %v6794_v46 = vadd.f32 %v2442_v0, %v7931_v49  ;;  %v2443_v16 = vld [vmem:[#allocation4 + $0xc0] sm:$0xff]  ;;  %v2444_v1 = vld [vmem:[#allocation4 + $0xc8] sm:$0xff]  ;;  %v7943_v50 = vld [vmem:[#allocation36_spill] sm:$0xff] }
 0x7ab   : > { %7926 = vst [vmem:[#allocation53_spill] sm:$0xff] %v6781_v53  ;;  %v2545_v36 = vsel %vm829_vm2, %v6781_v53, 0.0  ;;  %v7939_v52 = vld [vmem:[#allocation26_spill] sm:$0xff]  ;;  %v7941_v54 = vld [vmem:[#allocation37_spill] sm:$0xff]  ;;  %v7945_v38 = vld [vmem:[#allocation39_spill] sm:$0xff] }
 0x7ac   : > { %2504 = vadd.xlane.f32.xlu0 %v2503_v47  ;;  %2507 = vadd.xlane.f32.xlu1 %v2506_v12  ;;  %v7929_v47 = vld [vmem:[#allocation19_spill] sm:$0xff]  ;;  %7932 = vst [vmem:[#allocation15_spill] sm:$0xff] %v6794_v46  ;;  %v2554_v3 = vsel %vm829_vm2, %v6794_v46, 0.0  ;;  %v6814_v44 = vadd.f32 %v2446_v19, %v7939_v52  ;;  %v2447_v33 = vld [vmem:[#allocation4 + $0xe0] sm:$0xff] }
 0x7ad   : > { %v6791_v12 = vadd.f32 %v2441_v55, %v7929_v47  ;;  %v2448_v26 = vld [vmem:[#allocation4 + $0xe8] sm:$0xff]  ;;  %v6821_v11 = vadd.f32 %v2447_v33, %v7941_v54 }
 0x7ae   : > { %7940 = vst [vmem:[#allocation17_spill] sm:$0xff] %v6814_v44  ;;  %v6824_v17 = vadd.f32 %v2448_v26, %v7943_v50 }
 0x7af   : > { %7930 = vst [vmem:[#allocation55_spill] sm:$0xff] %v6791_v12  ;;  %v2551_v45 = vsel %vm829_vm2, %v6791_v12, 0.0  ;;  %7942 = vst [vmem:[#allocation16_spill] sm:$0xff] %v6821_v11  ;;  %v2569_v42 = vsel %vm829_vm2, %v6821_v11, 0.0 }
 0x7b0   : > { %2510 = vadd.xlane.f32.xlu0 %v2509_v6  ;;  %2513 = vadd.xlane.f32.xlu1 %v2512_v41  ;;  %v7933_v6 = vld [vmem:[#allocation31_spill] sm:$0xff]  ;;  %7944 = vst [vmem:[#allocation29_spill] sm:$0xff] %v6824_v17  ;;  %v2572_v20 = vsel %vm829_vm2, %v6824_v17, 0.0 }
 0x7b1   : > { %v6801_v41 = vadd.f32 %v2443_v16, %v7933_v6 }
 0x7b3   : > { %7934 = vst [vmem:[#allocation11_spill] sm:$0xff] %v6801_v41  ;;  %v2557_v62 = vsel %vm829_vm2, %v6801_v41, 0.0 }
 0x7b4   : > { %2516 = vadd.xlane.f32.xlu0 %v2515_v61  ;;  %2519 = vadd.xlane.f32.xlu1 %v2518_v24  ;;  %v7935_v61 = vld [vmem:[#allocation30_spill] sm:$0xff] }
 0x7b5   : > { %v6804_v24 = vadd.f32 %v2444_v1, %v7935_v61 }
 0x7b7   : > { %7936 = vst [vmem:[#allocation21_spill] sm:$0xff] %v6804_v24  ;;  %v2560_v63 = vsel %vm829_vm2, %v6804_v24, 0.0 }
 0x7b8   : > { %2522 = vadd.xlane.f32.xlu0 %v2521_v14  ;;  %2525 = vadd.xlane.f32.xlu1 %v2524_v9  ;;  %v7937_v14 = vld [vmem:[#allocation27_spill] sm:$0xff] }
 0x7b9   : > { %v6811_v9 = vadd.f32 %v2445_v7, %v7937_v14 }
 0x7bb   : > { %7938 = vst [vmem:[#allocation20_spill] sm:$0xff] %v6811_v9 }
 0x7bc   : > { %2528 = vadd.xlane.f32.xlu0 %v2527_v57  ;;  %2531 = vadd.xlane.f32.xlu1 %v2530_v48  ;;  %v2563_v57 = vsel %vm829_vm2, %v6811_v9, 0.0  ;;  %v2566_v48 = vsel %vm829_vm2, %v6814_v44, 0.0 }
 0x7c0   : > { %2534 = vadd.xlane.f32.xlu0 %v2533_v27  ;;  %2537 = vadd.xlane.f32.xlu1 %v2536_v29  ;;  %v2449_v27 = vld [vmem:[#allocation4 + $0xf0] sm:$0xff]  ;;  %v2450_v29 = vld [vmem:[#allocation4 + $0xf8] sm:$0xff] }
 0x7c1   : > { %v6831_v56 = vadd.f32 %v2449_v27, %v7945_v38 }
 0x7c3   : > { %7946 = vst [vmem:[#allocation28_spill] sm:$0xff] %v6831_v56  ;;  %v2575_v28 = vsel %vm829_vm2, %v6831_v56, 0.0 }
 0x7c4   : > { %2540 = vadd.xlane.f32.xlu0 %v2539_v31  ;;  %2543 = vadd.xlane.f32.xlu1 %v2542_v35  ;;  %v7947_v31 = vld [vmem:[#allocation38_spill] sm:$0xff] }
 0x7c5   : > { %v6834_v35 = vadd.f32 %v2450_v29, %v7947_v31 }
 0x7c7   : > { %7948 = vst [vmem:[#allocation25_spill] sm:$0xff] %v6834_v35  ;;  %v2578_v10 = vsel %vm829_vm2, %v6834_v35, 0.0 }
 0x7c8   : > { %2546 = vadd.xlane.f32.xlu0 %v2545_v36  ;;  %2549 = vadd.xlane.f32.xlu1 %v2548_v34 }
 0x7cc   : > { %2552 = vadd.xlane.f32.xlu0 %v2551_v45  ;;  %2555 = vadd.xlane.f32.xlu1 %v2554_v3 }
 0x7d0   : > { %2558 = vadd.xlane.f32.xlu0 %v2557_v62  ;;  %2561 = vadd.xlane.f32.xlu1 %v2560_v63 }
 0x7d4   : > { %2564 = vadd.xlane.f32.xlu0 %v2563_v57  ;;  %2567 = vadd.xlane.f32.xlu1 %v2566_v48 }
 0x7d8   : > { %2570 = vadd.xlane.f32.xlu0 %v2569_v42  ;;  %2573 = vadd.xlane.f32.xlu1 %v2572_v20 }
 0x7dc   : > { %2576 = vadd.xlane.f32.xlu0 %v2575_v28  ;;  %2579 = vadd.xlane.f32.xlu1 %v2578_v10 }
 0x82d   : > { %v2487_v55 = vpop.xlane.xlu0 %2486  ;;  %v2493_v0 = vpop.xlane.xlu1 %2492 }
 0x82e   : > { %v2581_v36 = vmul.f32 0.03125, %v2487_v55  ;;  %v2583_v34 = vmul.f32 0.03125, %v2493_v0 }
 0x830   : > { %v6841_v47 = vsub.f32 %v6681_v37, %v2581_v36  ;;  %v6844_v49 = vsub.f32 %v6684_v21, %v2583_v34 }
 0x831   : > { %v2490_v16 = vpop.xlane.xlu0 %2489  ;;  %v2496_v1 = vpop.xlane.xlu1 %2495 }
 0x832   : > { %v2582_v45 = vmul.f32 0.03125, %v2490_v16  ;;  %v2584_v3 = vmul.f32 0.03125, %v2496_v1  ;;  %v2645_v6 = vmul.f32 %v6841_v47, %v6841_v47  ;;  %v2647_v61 = vmul.f32 %v6844_v49, %v6844_v49 }
 0x834   : > { %v6851_v7 = vsub.f32 %v6687_v40, %v2582_v45  ;;  %v6854_v19 = vsub.f32 %v6690_v8, %v2584_v3  ;;  %v2677_v62 = vsel %vm829_vm2, %v2645_v6, 0.0  ;;  %v2683_v52 = vsel %vm829_vm2, %v2647_v61, 0.0 }
 0x835   : > { %2678 = vadd.xlane.f32.xlu0 %v2677_v62  ;;  %v2499_v63 = vpop.xlane.xlu0 %2498  ;;  %v2502_v14 = vpop.xlane.xlu1 %2501 }
 0x836   : > { %v2585_v33 = vmul.f32 0.03125, %v2499_v63  ;;  %v2586_v26 = vmul.f32 0.03125, %v2502_v14  ;;  %v2646_v57 = vmul.f32 %v6851_v7, %v6851_v7  ;;  %v2648_v48 = vmul.f32 %v6854_v19, %v6854_v19 }
 0x838   : > { %v6863_v54 = vsub.f32 %v6701_v15, %v2585_v33  ;;  %v6866_v50 = vsub.f32 %v6704_v25, %v2586_v26  ;;  %v2680_v27 = vsel %vm829_vm2, %v2646_v57, 0.0  ;;  %v2686_v20 = vsel %vm829_vm2, %v2648_v48, 0.0 }
 0x839   : > { %2684 = vadd.xlane.f32.xlu0 %v2683_v52  ;;  %2681 = vadd.xlane.f32.xlu1 %v2680_v27  ;;  %v2505_v29 = vpop.xlane.xlu0 %2504  ;;  %v2508_v42 = vpop.xlane.xlu1 %2507 }
 0x83a   : > { %v2587_v38 = vmul.f32 0.03125, %v2505_v29  ;;  %v2588_v31 = vmul.f32 0.03125, %v2508_v42  ;;  %v2649_v28 = vmul.f32 %v6863_v54, %v6863_v54  ;;  %v2650_v10 = vmul.f32 %v6866_v50, %v6866_v50 }
 0x83c   : > { %v6875_v55 = vsub.f32 %v6711_v43, %v2587_v38  ;;  %v6878_v0 = vsub.f32 %v6714_v60, %v2588_v31  ;;  %v2689_v36 = vsel %vm829_vm2, %v2649_v28, 0.0  ;;  %v2692_v1 = vsel %vm829_vm2, %v2650_v10, 0.0 }
 0x83d   : > { %2687 = vadd.xlane.f32.xlu1 %v2686_v20  ;;  %2690 = vadd.xlane.f32.xlu0 %v2689_v36  ;;  %v2511_v34 = vpop.xlane.xlu0 %2510  ;;  %v2514_v16 = vpop.xlane.xlu1 %2513 }
 0x83e   : > { %v2589_v45 = vmul.f32 0.03125, %v2511_v34  ;;  %v2590_v3 = vmul.f32 0.03125, %v2514_v16  ;;  %v2651_v6 = vmul.f32 %v6875_v55, %v6875_v55  ;;  %v2652_v61 = vmul.f32 %v6878_v0, %v6878_v0 }
 0x840   : > { %v6887_v62 = vsub.f32 %v6721_v13, %v2589_v45  ;;  %v6890_v63 = vsub.f32 %v6724_v18, %v2590_v3  ;;  %v2695_v14 = vsel %vm829_vm2, %v2651_v6, 0.0  ;;  %v2698_v26 = vsel %vm829_vm2, %v2652_v61, 0.0 }
 0x841   : > { %2693 = vadd.xlane.f32.xlu1 %v2692_v1  ;;  %2696 = vadd.xlane.f32.xlu0 %v2695_v14  ;;  %v2517_v52 = vpop.xlane.xlu0 %2516  ;;  %v2520_v33 = vpop.xlane.xlu1 %2519 }
 0x842   : > { %v2591_v57 = vmul.f32 0.03125, %v2517_v52  ;;  %v2592_v48 = vmul.f32 0.03125, %v2520_v33  ;;  %v2653_v27 = vmul.f32 %v6887_v62, %v6887_v62  ;;  %v2654_v29 = vmul.f32 %v6890_v63, %v6890_v63 }
 0x844   : > { %v6899_v42 = vsub.f32 %v6727_v23, %v2591_v57  ;;  %v6902_v20 = vsub.f32 %v6730_v4, %v2592_v48  ;;  %v2701_v38 = vsel %vm829_vm2, %v2653_v27, 0.0  ;;  %v2704_v10 = vsel %vm829_vm2, %v2654_v29, 0.0 }
 0x845   : > { %2699 = vadd.xlane.f32.xlu1 %v2698_v26  ;;  %2702 = vadd.xlane.f32.xlu0 %v2701_v38  ;;  %v2523_v31 = vpop.xlane.xlu0 %2522  ;;  %v2526_v28 = vpop.xlane.xlu1 %2525 }
 0x846   : > { %v2593_v36 = vmul.f32 0.03125, %v2523_v31  ;;  %v2594_v34 = vmul.f32 0.03125, %v2526_v28  ;;  %v2655_v16 = vmul.f32 %v6899_v42, %v6899_v42  ;;  %v2656_v1 = vmul.f32 %v6902_v20, %v6902_v20 }
 0x848   : > { %v6911_v45 = vsub.f32 %v6741_v58, %v2593_v36  ;;  %v6914_v3 = vsub.f32 %v6744_v2, %v2594_v34  ;;  %v2707_v6 = vsel %vm829_vm2, %v2655_v16, 0.0  ;;  %v2710_v52 = vsel %vm829_vm2, %v2656_v1, 0.0 }
 0x849   : > { %2705 = vadd.xlane.f32.xlu1 %v2704_v10  ;;  %2708 = vadd.xlane.f32.xlu0 %v2707_v6  ;;  %v2529_v61 = vpop.xlane.xlu0 %2528  ;;  %v2532_v14 = vpop.xlane.xlu1 %2531 }
 0x84a   : > { %v2595_v33 = vmul.f32 0.03125, %v2529_v61  ;;  %v2596_v26 = vmul.f32 0.03125, %v2532_v14  ;;  %v2657_v57 = vmul.f32 %v6911_v45, %v6911_v45  ;;  %v2658_v48 = vmul.f32 %v6914_v3, %v6914_v3 }
 0x84c   : > { %v6923_v27 = vsub.f32 %v6751_v22, %v2595_v33  ;;  %v6926_v29 = vsub.f32 %v6754_v59, %v2596_v26  ;;  %v2713_v38 = vsel %vm829_vm2, %v2657_v57, 0.0  ;;  %v2716_v10 = vsel %vm829_vm2, %v2658_v48, 0.0 }
 0x84d   : > { %2711 = vadd.xlane.f32.xlu1 %v2710_v52  ;;  %2714 = vadd.xlane.f32.xlu0 %v2713_v38  ;;  %v2535_v31 = vpop.xlane.xlu0 %2534  ;;  %v2538_v28 = vpop.xlane.xlu1 %2537 }
 0x84e   : > { %v2597_v36 = vmul.f32 0.03125, %v2535_v31  ;;  %v2598_v34 = vmul.f32 0.03125, %v2538_v28  ;;  %v2659_v16 = vmul.f32 %v6923_v27, %v6923_v27  ;;  %v2660_v1 = vmul.f32 %v6926_v29, %v6926_v29 }
 0x850   : > { %v6935_v6 = vsub.f32 %v6761_v5, %v2597_v36  ;;  %v6938_v61 = vsub.f32 %v6764_v39, %v2598_v34  ;;  %v2719_v14 = vsel %vm829_vm2, %v2659_v16, 0.0  ;;  %v2722_v26 = vsel %vm829_vm2, %v2660_v1, 0.0 }
 0x851   : > { %2717 = vadd.xlane.f32.xlu1 %v2716_v10  ;;  %2720 = vadd.xlane.f32.xlu0 %v2719_v14  ;;  %v2541_v52 = vpop.xlane.xlu0 %2540  ;;  %v2544_v33 = vpop.xlane.xlu1 %2543 }
 0x852   : > { %v2599_v57 = vmul.f32 0.03125, %v2541_v52  ;;  %v2600_v48 = vmul.f32 0.03125, %v2544_v33  ;;  %v2661_v38 = vmul.f32 %v6935_v6, %v6935_v6  ;;  %v2662_v31 = vmul.f32 %v6938_v61, %v6938_v61 }
 0x854   : > { %v6947_v28 = vsub.f32 %v6771_v51, %v2599_v57  ;;  %v6950_v36 = vsub.f32 %v6774_v30, %v2600_v48  ;;  %v2725_v10 = vsel %vm829_vm2, %v2661_v38, 0.0  ;;  %v2728_v1 = vsel %vm829_vm2, %v2662_v31, 0.0 }
 0x855   : > { %2723 = vadd.xlane.f32.xlu1 %v2722_v26  ;;  %2726 = vadd.xlane.f32.xlu0 %v2725_v10  ;;  %v2547_v34 = vpop.xlane.xlu0 %2546  ;;  %v2550_v16 = vpop.xlane.xlu1 %2549 }
 0x856   : > { %v2601_v14 = vmul.f32 0.03125, %v2547_v34  ;;  %v2602_v52 = vmul.f32 0.03125, %v2550_v16  ;;  %v2663_v33 = vmul.f32 %v6947_v28, %v6947_v28  ;;  %v2664_v57 = vmul.f32 %v6950_v36, %v6950_v36  ;;  %v5002_v34 = vld [vmem:[%s7705_s9] sm:$0xff]  }
 0x857   : > { %4505 = vmatprep.subr.bf16.mxu0 %v5002_v34 }
 0x858   : > { %v6959_v39 = vsub.f32 %v6781_v53, %v2601_v14  ;;  %v6962_v48 = vsub.f32 %v6784_v32, %v2602_v52  ;;  %v2731_v26 = vsel %vm829_vm2, %v2663_v33, 0.0  ;;  %v2734_v10 = vsel %vm829_vm2, %v2664_v57, 0.0  ;;  %4506 = vmatpush3.bf16.msra.mxu0 %v5002_v34  ;;  %v5003_v32 = vld [vmem:[%s7705_s9 + $0x8] sm:$0xff]  }
 0x859   : > { %2729 = vadd.xlane.f32.xlu1 %v2728_v1  ;;  %2732 = vadd.xlane.f32.xlu0 %v2731_v26  ;;  %v2553_v38 = vpop.xlane.xlu0 %2552  ;;  %v2556_v31 = vpop.xlane.xlu1 %2555 }
 0x85a   : > { %v2603_v16 = vmul.f32 0.03125, %v2553_v38  ;;  %v2604_v30 = vmul.f32 0.03125, %v2556_v31  ;;  %v2665_v14 = vmul.f32 %v6959_v39, %v6959_v39  ;;  %v2666_v52 = vmul.f32 %v6962_v48, %v6962_v48  ;;  %4507 = vmatprep.subr.bf16.mxu0 %v5003_v32 }
 0x85c   : > { %v6974_v1 = vsub.f32 %v6791_v12, %v2603_v16  ;;  %v6977_v33 = vsub.f32 %v6794_v46, %v2604_v30  ;;  %v2737_v57 = vsel %vm829_vm2, %v2665_v14, 0.0  ;;  %v2740_v31 = vsel %vm829_vm2, %v2666_v52, 0.0  ;;  %4508 = vmatpush3.bf16.msra.mxu0 %v5003_v32 }
 0x85d   : > { %2735 = vadd.xlane.f32.xlu1 %v2734_v10  ;;  %2738 = vadd.xlane.f32.xlu0 %v2737_v57  ;;  %v2559_v26 = vpop.xlane.xlu0 %2558  ;;  %v2562_v38 = vpop.xlane.xlu1 %2561 }
 0x85e   : > { %v2605_v53 = vmul.f32 0.03125, %v2559_v26  ;;  %v2606_v5 = vmul.f32 0.03125, %v2562_v38  ;;  %v2667_v16 = vmul.f32 %v6974_v1, %v6974_v1  ;;  %v2668_v30 = vmul.f32 %v6977_v33, %v6977_v33 }
 0x860   : > { %v6989_v10 = vsub.f32 %v6801_v41, %v2605_v53  ;;  %v6992_v34 = vsub.f32 %v6804_v24, %v2606_v5  ;;  %v2743_v14 = vsel %vm829_vm2, %v2667_v16, 0.0  ;;  %v2746_v26 = vsel %vm829_vm2, %v2668_v30, 0.0 }
 0x861   : > { %2741 = vadd.xlane.f32.xlu1 %v2740_v31  ;;  %2744 = vadd.xlane.f32.xlu0 %v2743_v14  ;;  %v2565_v52 = vpop.xlane.xlu0 %2564  ;;  %v2568_v57 = vpop.xlane.xlu1 %2567 }
 0x862   : > { %v2607_v38 = vmul.f32 0.03125, %v2565_v52  ;;  %v2608_v46 = vmul.f32 0.03125, %v2568_v57  ;;  %v2669_v12 = vmul.f32 %v6989_v10, %v6989_v10  ;;  %v2670_v53 = vmul.f32 %v6992_v34, %v6992_v34 }
 0x864   : > { %v7001_v5 = vsub.f32 %v6811_v9, %v2607_v38  ;;  %v7004_v16 = vsub.f32 %v6814_v44, %v2608_v46  ;;  %v2749_v32 = vsel %vm829_vm2, %v2669_v12, 0.0  ;;  %v2752_v14 = vsel %vm829_vm2, %v2670_v53, 0.0 }
 0x865   : > { %2747 = vadd.xlane.f32.xlu1 %v2746_v26  ;;  %2750 = vadd.xlane.f32.xlu0 %v2749_v32  ;;  %v2571_v31 = vpop.xlane.xlu0 %2570  ;;  %v2574_v30 = vpop.xlane.xlu1 %2573 }
 0x866   : > { %v2609_v52 = vmul.f32 0.03125, %v2571_v31  ;;  %v2610_v57 = vmul.f32 0.03125, %v2574_v30  ;;  %v2671_v24 = vmul.f32 %v7001_v5, %v7001_v5  ;;  %v2672_v38 = vmul.f32 %v7004_v16, %v7004_v16 }
 0x868   : > { %v7013_v41 = vsub.f32 %v6821_v11, %v2609_v52  ;;  %v7016_v46 = vsub.f32 %v6824_v17, %v2610_v57  ;;  %v2755_v12 = vsel %vm829_vm2, %v2671_v24, 0.0  ;;  %v2758_v32 = vsel %vm829_vm2, %v2672_v38, 0.0 }
 0x869   : > { %2753 = vadd.xlane.f32.xlu1 %v2752_v14  ;;  %2756 = vadd.xlane.f32.xlu0 %v2755_v12  ;;  %v2577_v26 = vpop.xlane.xlu0 %2576  ;;  %v2580_v53 = vpop.xlane.xlu1 %2579 }
 0x86a   : > { %v2611_v31 = vmul.f32 0.03125, %v2577_v26  ;;  %v2612_v30 = vmul.f32 0.03125, %v2580_v53  ;;  %v2673_v44 = vmul.f32 %v7013_v41, %v7013_v41  ;;  %v2674_v52 = vmul.f32 %v7016_v46, %v7016_v46 }
 0x86c   : > { %v7025_v11 = vsub.f32 %v6831_v56, %v2611_v31  ;;  %v7028_v57 = vsub.f32 %v6834_v35, %v2612_v30  ;;  %v2761_v24 = vsel %vm829_vm2, %v2673_v44, 0.0  ;;  %v2764_v14 = vsel %vm829_vm2, %v2674_v52, 0.0  ;;  %v7041_v44 = vld [vmem:[%s7707_s11] sm:$0xff]   ;;  %v7055_v31 = vld [vmem:[%s7707_s11 + $0x10] sm:$0xff]   ;;  %v7062_v30 = vld [vmem:[%s7707_s11 + $0x18] sm:$0xff]  }
 0x86d   : > { %2759 = vadd.xlane.f32.xlu1 %v2758_v32  ;;  %2762 = vadd.xlane.f32.xlu0 %v2761_v24  ;;  %v7047_v32 = vld [vmem:[%s7707_s11 + $0x8] sm:$0xff]  }
 0x86e   : > { %v2675_v38 = vmul.f32 %v7025_v11, %v7025_v11  ;;  %v2676_v12 = vmul.f32 %v7028_v57, %v7028_v57  ;;  %4541 = vmatprep.subr.bf16.mxu0 %v7041_v44  ;;  %4603 = vmatprep.subr.bf16.mxu1 %v7041_v44 }
 0x86f   : > { %4611 = vmatpush3.bf16.msra.mxu1 %v7041_v44 }
 0x870   : > { %v2767_v26 = vsel %vm829_vm2, %v2675_v38, 0.0  ;;  %v2770_v53 = vsel %vm829_vm2, %v2676_v12, 0.0  ;;  %4604 = vmatprep.subr.bf16.mxu1 %v7047_v32 }
 0x871   : > { %2765 = vadd.xlane.f32.xlu1 %v2764_v14  ;;  %2768 = vadd.xlane.f32.xlu0 %v2767_v26 }
 0x873   : > { %4612 = vmatpush3.bf16.msra.mxu1 %v7047_v32 }
 0x874   : > { %4605 = vmatprep.subr.bf16.mxu1 %v7055_v31 }
 0x875   : > { %2771 = vadd.xlane.f32.xlu1 %v2770_v53 }
 0x877   : > { %4613 = vmatpush3.bf16.msra.mxu1 %v7055_v31 }
 0x878   : > { %4606 = vmatprep.subr.bf16.mxu1 %v7062_v30 }
 0x87b   : > { %4614 = vmatpush3.bf16.msra.mxu1 %v7062_v30 }
 0x8c2   : > { %v2679_v52 = vpop.xlane.xlu0 %2678 }
 0x8c3   : > { %v2773_v24 = vmul.f32 0.03125, %v2679_v52 }
 0x8c5   : > { %v2805_v14 = vadd.f32 1e-05, %v2773_v24 }
 0x8c6   : > { %v2682_v38 = vpop.xlane.xlu1 %2681  ;;  %v2685_v12 = vpop.xlane.xlu0 %2684 }
 0x8c7   : > { %5014 = vrsqrt.f32 %v2805_v14  ;;  %v2774_v26 = vmul.f32 0.03125, %v2682_v38  ;;  %v2775_v53 = vmul.f32 0.03125, %v2685_v12 }
 0x8c9   : > { %v2806_v17 = vadd.f32 1e-05, %v2774_v26  ;;  %v2807_v35 = vadd.f32 1e-05, %v2775_v53 }
 0x8ca   : > { %v2688_v56 = vpop.xlane.xlu1 %2687  ;;  %v2691_v9 = vpop.xlane.xlu0 %2690 }
 0x8cb   : > { %5016 = vrsqrt.f32 %v2806_v17  ;;  %v2776_v51 = vmul.f32 0.03125, %v2688_v56  ;;  %v2777_v2 = vmul.f32 0.03125, %v2691_v9 }
 0x8cc   : > { %5018 = vrsqrt.f32 %v2807_v35 }
 0x8cd   : > { %v2808_v59 = vadd.f32 1e-05, %v2776_v51  ;;  %v2809_v58 = vadd.f32 1e-05, %v2777_v2  ;;  %v7071_v2 = vld [vmem:[%s7703_s7] ss:$0 sm:$0xff] }
 0x8ce   : > { %v2694_v22 = vpop.xlane.xlu1 %2693  ;;  %v2697_v18 = vpop.xlane.xlu0 %2696 }
 0x8cf   : > { %5020 = vrsqrt.f32 %v2808_v59  ;;  %v2778_v52 = vmul.f32 0.03125, %v2694_v22  ;;  %v2779_v24 = vmul.f32 0.03125, %v2697_v18 }
 0x8d0   : > { %5022 = vrsqrt.f32 %v2809_v58 }
 0x8d1   : > { %v5015_v4 = vpop.eup %5014  ;;  %v2810_v14 = vadd.f32 1e-05, %v2778_v52  ;;  %v2811_v38 = vadd.f32 1e-05, %v2779_v24  ;;  %v7078_v24 = vld [vmem:[%s7704_s8] ss:$0 sm:$0xff] }
 0x8d2   : > { %v2700_v12 = vpop.xlane.xlu1 %2699  ;;  %v2703_v26 = vpop.xlane.xlu0 %2702  ;;  %v2869_v53 = vmul.f32 %v5015_v4, %v6841_v47 }
 0x8d3   : > { %5024 = vrsqrt.f32 %v2810_v14  ;;  %v2780_v17 = vmul.f32 0.03125, %v2700_v12  ;;  %v2781_v56 = vmul.f32 0.03125, %v2703_v26 }
 0x8d4   : > { %5026 = vrsqrt.f32 %v2811_v38  ;;  %v2907_v52 = vmul.f32 %v7071_v2, %v2869_v53 }
 0x8d5   : > { %v5017_v59 = vpop.eup %5016  ;;  %v2812_v22 = vadd.f32 1e-05, %v2780_v17  ;;  %v2813_v18 = vadd.f32 1e-05, %v2781_v56 }
 0x8d6   : > { %v5019_v58 = vpop.eup %5018  ;;  %v2706_v51 = vpop.xlane.xlu1 %2705  ;;  %v2870_v35 = vmul.f32 %v5017_v59, %v6851_v7  ;;  %v2945_v53 = vadd.f32 %v7078_v24, %v2907_v52 }
 0x8d7   : > { %v2709_v9 = vpop.xlane.xlu0 %2708  ;;  %5028 = vrsqrt.f32 %v2812_v22  ;;  %v2782_v4 = vmul.f32 0.03125, %v2706_v51  ;;  %v2871_v14 = vmul.f32 %v5019_v58, %v6844_v49 }
 0x8d8   : > { %v2783_v47 = vmul.f32 0.03125, %v2709_v9  ;;  %5030 = vrsqrt.f32 %v2813_v18  ;;  %v2908_v38 = vmul.f32 %v7071_v2, %v2870_v35 }
 0x8d9   : > { %v5021_v12 = vpop.eup %5020  ;;  %v2814_v26 = vadd.f32 1e-05, %v2782_v4  ;;  %v2909_v9 = vmul.f32 %v7071_v2, %v2871_v14 }
 0x8da   : > { %v2815_v17 = vadd.f32 1e-05, %v2783_v47  ;;  %v5023_v56 = vpop.eup %5022  ;;  %v2712_v7 = vpop.xlane.xlu1 %2711  ;;  %v2946_v22 = vadd.f32 %v7078_v24, %v2908_v38  ;;  %v2872_v51 = vmul.f32 %v5021_v12, %v6854_v19 }
 0x8db   : > { %v2715_v59 = vpop.xlane.xlu0 %2714  ;;  %5032 = vrsqrt.f32 %v2814_v26  ;;  %v2784_v13 = vmul.f32 0.03125, %v2712_v7  ;;  %v2873_v35 = vmul.f32 %v5023_v56, %v6863_v54  ;;  %v2947_v19 = vadd.f32 %v7078_v24, %v2909_v9 }
 0x8dc   : > { %v2785_v49 = vmul.f32 0.03125, %v2715_v59  ;;  %5034 = vrsqrt.f32 %v2815_v17  ;;  %v2977_v18 = vpack.c.bf16 %v2946_v22, %v2945_v53  ;;  %v2910_v58 = vmul.f32 %v7071_v2, %v2872_v51 }
 0x8dd   : > { %v5025_v4 = vpop.eup %5024  ;;  %v2816_v47 = vadd.f32 1e-05, %v2784_v13  ;;  %v2911_v26 = vmul.f32 %v7071_v2, %v2873_v35 }
 0x8de   : > { %v2817_v23 = vadd.f32 1e-05, %v2785_v49  ;;  %v5027_v25 = vpop.eup %5026  ;;  %v2718_v52 = vpop.xlane.xlu1 %2717  ;;  %4509 = vmatprep.mubr.msk.bf16.mxu0 %vm829_vm2, %v2977_v18  ;;  %v2948_v14 = vadd.f32 %v7078_v24, %v2910_v58  ;;  %v2874_v12 = vmul.f32 %v5025_v4, %v6866_v50 }
 0x8df   : > { %v2721_v38 = vpop.xlane.xlu0 %2720  ;;  %5036 = vrsqrt.f32 %v2816_v47  ;;  %v2786_v17 = vmul.f32 0.03125, %v2718_v52  ;;  %v2875_v54 = vmul.f32 %v5027_v25, %v6875_v55  ;;  %v2949_v50 = vadd.f32 %v7078_v24, %v2911_v26 }
 0x8e0   : > { %v2787_v7 = vmul.f32 0.03125, %v2721_v38  ;;  %5038 = vrsqrt.f32 %v2817_v23  ;;  %v2978_v13 = vpack.c.bf16 %v2948_v14, %v2947_v19  ;;  %v2912_v56 = vmul.f32 %v7071_v2, %v2874_v12 }
 0x8e1   : > { %v5029_v59 = vpop.eup %5028  ;;  %v2818_v53 = vadd.f32 1e-05, %v2786_v17  ;;  %v2913_v25 = vmul.f32 %v7071_v2, %v2875_v54 }
 0x8e2   : > { %v2819_v22 = vadd.f32 1e-05, %v2787_v7  ;;  %v5031_v51 = vpop.eup %5030  ;;  %v2724_v9 = vpop.xlane.xlu1 %2723  ;;  %4510 = vmatmul.mubr.msk.bf16.vlgmr.msra.gmra.mrb[0].mxu0 %vm829_vm2, %v2978_v13  ;;  %v2950_v18 = vadd.f32 %v7078_v24, %v2912_v56  ;;  %v2876_v58 = vmul.f32 %v5029_v59, %v6878_v0 }
 0x8e3   : > { %v2727_v49 = vpop.xlane.xlu0 %2726  ;;  %5040 = vrsqrt.f32 %v2818_v53  ;;  %v2788_v23 = vmul.f32 0.03125, %v2724_v9  ;;  %4542 = vmatpush3.bf16.msra.mxu0 %v7041_v44  ;;  %v2877_v47 = vmul.f32 %v5031_v51, %v6887_v62  ;;  %v2951_v26 = vadd.f32 %v7078_v24, %v2913_v25 }
 0x8e4   : > { %v2789_v55 = vmul.f32 0.03125, %v2727_v49  ;;  %5042 = vrsqrt.f32 %v2819_v22  ;;  %v2979_v35 = vpack.c.bf16 %v2950_v18, %v2949_v50  ;;  %v2914_v4 = vmul.f32 %v7071_v2, %v2876_v58  ;;  %4543 = vmatprep.subr.bf16.mxu0 %v7047_v32 }
 0x8e5   : > { %v5033_v52 = vpop.eup %5032  ;;  %v2820_v38 = vadd.f32 1e-05, %v2788_v23  ;;  %v2915_v7 = vmul.f32 %v7071_v2, %v2877_v47 }
 0x8e6   : > { %v2821_v19 = vadd.f32 1e-05, %v2789_v55  ;;  %v5035_v14 = vpop.eup %5034  ;;  %v2730_v0 = vpop.xlane.xlu1 %2729  ;;  %4513 = vmatprep.mubr.msk.bf16.mxu0 %vm829_vm2, %v2979_v35  ;;  %v2952_v44 = vadd.f32 %v7078_v24, %v2914_v4  ;;  %v2878_v17 = vmul.f32 %v5033_v52, %v6890_v63 }
 0x8e7   : > { %v2733_v12 = vpop.xlane.xlu0 %2732  ;;  %5044 = vrsqrt.f32 %v2820_v38  ;;  %v2790_v62 = vmul.f32 0.03125, %v2730_v0  ;;  %v2879_v13 = vmul.f32 %v5035_v14, %v6899_v42  ;;  %4544 = vmatpush3.bf16.msra.mxu0 %v7047_v32  ;;  %v2953_v50 = vadd.f32 %v7078_v24, %v2915_v7 }
 0x8e8   : > { %v2791_v54 = vmul.f32 0.03125, %v2733_v12  ;;  %5046 = vrsqrt.f32 %v2821_v19  ;;  %v2980_v56 = vpack.c.bf16 %v2952_v44, %v2951_v26  ;;  %v2916_v59 = vmul.f32 %v7071_v2, %v2878_v17  ;;  %4545 = vmatprep.subr.bf16.mxu0 %v7055_v31 }
 0x8e9   : > { %v5037_v53 = vpop.eup %5036  ;;  %v2822_v22 = vadd.f32 1e-05, %v2790_v62  ;;  %v2917_v18 = vmul.f32 %v7071_v2, %v2879_v13 }
 0x8ea   : > { %v2823_v51 = vadd.f32 1e-05, %v2791_v54  ;;  %v5039_v9 = vpop.eup %5038  ;;  %v2736_v63 = vpop.xlane.xlu1 %2735  ;;  %4514 = vmatmul.mubr.msk.bf16.gmra.mrb[4].mxu0 %vm829_vm2, %v2980_v56  ;;  %v2954_v42 = vadd.f32 %v7078_v24, %v2916_v59  ;;  %v2880_v32 = vmul.f32 %v5037_v53, %v6902_v20 }
 0x8eb   : > { %v2739_v49 = vpop.xlane.xlu0 %2738  ;;  %5048 = vrsqrt.f32 %v2822_v22  ;;  %v2792_v58 = vmul.f32 0.03125, %v2736_v63  ;;  %4546 = vmatpush3.bf16.msra.mxu0 %v7055_v31  ;;  %v2881_v35 = vmul.f32 %v5039_v9, %v6911_v45  ;;  %v2955_v14 = vadd.f32 %v7078_v24, %v2917_v18 }
 0x8ec   : > { %v2793_v25 = vmul.f32 0.03125, %v2739_v49  ;;  %5050 = vrsqrt.f32 %v2823_v51  ;;  %v2981_v23 = vpack.c.bf16 %v2954_v42, %v2953_v50  ;;  %v2918_v55 = vmul.f32 %v7071_v2, %v2880_v32  ;;  %4547 = vmatprep.subr.bf16.mxu0 %v7062_v30 }
 0x8ed   : > { %v5041_v4 = vpop.eup %5040  ;;  %v2824_v47 = vadd.f32 1e-05, %v2792_v58  ;;  %v2919_v12 = vmul.f32 %v7071_v2, %v2881_v35 }
 0x8ee   : > { %v2825_v52 = vadd.f32 1e-05, %v2793_v25  ;;  %v5043_v38 = vpop.eup %5042  ;;  %v2742_v20 = vpop.xlane.xlu1 %2741  ;;  %4517 = vmatprep.mubr.msk.bf16.mxu0 %vm829_vm2, %v2981_v23  ;;  %v2956_v31 = vadd.f32 %v7078_v24, %v2918_v55  ;;  %v2882_v0 = vmul.f32 %v5041_v4, %v6914_v3 }
 0x8ef   : > { %v2745_v19 = vpop.xlane.xlu0 %2744  ;;  %5052 = vrsqrt.f32 %v2824_v47  ;;  %v2794_v45 = vmul.f32 0.03125, %v2742_v20  ;;  %v2883_v44 = vmul.f32 %v5043_v38, %v6923_v27  ;;  %4548 = vmatpush3.bf16.msra.mxu0 %v7062_v30  ;;  %v2957_v53 = vadd.f32 %v7078_v24, %v2919_v12 }
 0x8f0   : > { %v2795_v26 = vmul.f32 0.03125, %v2745_v19  ;;  %5054 = vrsqrt.f32 %v2825_v52  ;;  %v2982_v17 = vpack.c.bf16 %v2956_v31, %v2955_v14  ;;  %v2920_v7 = vmul.f32 %v7071_v2, %v2882_v0 }
 0x8f1   : > { %v5045_v62 = vpop.eup %5044  ;;  %v2826_v54 = vadd.f32 1e-05, %v2794_v45  ;;  %v2921_v30 = vmul.f32 %v7071_v2, %v2883_v44 }
 0x8f2   : > { %v2827_v13 = vadd.f32 1e-05, %v2795_v26  ;;  %v5047_v56 = vpop.eup %5046  ;;  %v2748_v59 = vpop.xlane.xlu1 %2747  ;;  %4518 = vmatmul.mubr.msk.bf16.gmra.mrb[8].mxu0 %vm829_vm2, %v2982_v17  ;;  %v2958_v22 = vadd.f32 %v7078_v24, %v2920_v7  ;;  %v2884_v27 = vmul.f32 %v5045_v62, %v6926_v29 }
 0x8f3   : > { %v2751_v3 = vpop.xlane.xlu0 %2750  ;;  %5056 = vrsqrt.f32 %v2826_v54  ;;  %v2796_v51 = vmul.f32 0.03125, %v2748_v59  ;;  %v2885_v50 = vmul.f32 %v5047_v56, %v6935_v6  ;;  %v2959_v29 = vadd.f32 %v7078_v24, %v2921_v30 }
 0x8f4   : > { %v2797_v9 = vmul.f32 0.03125, %v2751_v3  ;;  %5058 = vrsqrt.f32 %v2827_v13  ;;  %v2983_v63 = vpack.c.bf16 %v2958_v22, %v2957_v53  ;;  %v2922_v49 = vmul.f32 %v7071_v2, %v2884_v27 }
 0x8f5   : > { %v5049_v42 = vpop.eup %5048  ;;  %v2828_v32 = vadd.f32 1e-05, %v2796_v51  ;;  %v2923_v4 = vmul.f32 %v7071_v2, %v2885_v50 }
 0x8f6   : > { %v2829_v18 = vadd.f32 1e-05, %v2797_v9  ;;  %v5051_v58 = vpop.eup %5050  ;;  %v2754_v25 = vpop.xlane.xlu1 %2753  ;;  %4521 = vmatprep.mubr.msk.bf16.mxu0 %vm829_vm2, %v2983_v63  ;;  %v2960_v55 = vadd.f32 %v7078_v24, %v2922_v49  ;;  %v2886_v35 = vmul.f32 %v5049_v42, %v6938_v61 }
 0x8f7   : > { %v2757_v23 = vpop.xlane.xlu0 %2756  ;;  %5060 = vrsqrt.f32 %v2828_v32  ;;  %v2798_v47 = vmul.f32 0.03125, %v2754_v25  ;;  %v2887_v6 = vmul.f32 %v5051_v58, %v6947_v28  ;;  %v2961_v61 = vadd.f32 %v7078_v24, %v2923_v4 }
 0x8f8   : > { %v2799_v52 = vmul.f32 0.03125, %v2757_v23  ;;  %5062 = vrsqrt.f32 %v2829_v18  ;;  %v2984_v38 = vpack.c.bf16 %v2960_v55, %v2959_v29  ;;  %v2924_v20 = vmul.f32 %v7071_v2, %v2886_v35 }
 0x8f9   : > { %v5053_v19 = vpop.eup %5052  ;;  %v2830_v14 = vadd.f32 1e-05, %v2798_v47  ;;  %v2925_v28 = vmul.f32 %v7071_v2, %v2887_v6 }
 0x8fa   : > { %v2831_v31 = vadd.f32 1e-05, %v2799_v52  ;;  %v5055_v0 = vpop.eup %5054  ;;  %v2760_v12 = vpop.xlane.xlu1 %2759  ;;  %4522 = vmatmul.mubr.msk.bf16.gmra.mrb[12].mxu0 %vm829_vm2, %v2984_v38  ;;  %v2962_v26 = vadd.f32 %v7078_v24, %v2924_v20  ;;  %v2888_v44 = vmul.f32 %v5053_v19, %v6950_v36 }
 0x8fb   : > { %v2763_v45 = vpop.xlane.xlu0 %2762  ;;  %5064 = vrsqrt.f32 %v2830_v14  ;;  %v2800_v17 = vmul.f32 0.03125, %v2760_v12  ;;  %v2889_v13 = vmul.f32 %v5055_v0, %v6959_v39  ;;  %v2963_v36 = vadd.f32 %v7078_v24, %v2925_v28 }
 0x8fc   : > { %v2801_v7 = vmul.f32 0.03125, %v2763_v45  ;;  %5066 = vrsqrt.f32 %v2831_v31  ;;  %v2985_v62 = vpack.c.bf16 %v2962_v26, %v2961_v61  ;;  %v2926_v54 = vmul.f32 %v7071_v2, %v2888_v44 }
 0x8fd   : > { %v5057_v56 = vpop.eup %5056  ;;  %v2832_v59 = vadd.f32 1e-05, %v2800_v17  ;;  %v2927_v9 = vmul.f32 %v7071_v2, %v2889_v13 }
 0x8fe   : > { %v2833_v3 = vadd.f32 1e-05, %v2801_v7  ;;  %v5059_v53 = vpop.eup %5058  ;;  %v2766_v22 = vpop.xlane.xlu1 %2765  ;;  %4525 = vmatprep.mubr.msk.bf16.mxu0 %vm829_vm2, %v2985_v62  ;;  %v2964_v30 = vadd.f32 %v7078_v24, %v2926_v54  ;;  %v2890_v51 = vmul.f32 %v5057_v56, %v6962_v48 }
 0x8ff   : > { %v2769_v27 = vpop.xlane.xlu0 %2768  ;;  %5068 = vrsqrt.f32 %v2832_v59  ;;  %v2802_v63 = vmul.f32 0.03125, %v2766_v22  ;;  %v2891_v39 = vmul.f32 %v5059_v53, %v6974_v1  ;;  %v2965_v48 = vadd.f32 %v7078_v24, %v2927_v9 }
 0x900   : > { %v2803_v49 = vmul.f32 0.03125, %v2769_v27  ;;  %5070 = vrsqrt.f32 %v2833_v3  ;;  %v2986_v50 = vpack.c.bf16 %v2964_v30, %v2963_v36  ;;  %v2928_v42 = vmul.f32 %v7071_v2, %v2890_v51 }
 0x901   : > { %v5061_v32 = vpop.eup %5060  ;;  %v2834_v18 = vadd.f32 1e-05, %v2802_v63  ;;  %v2929_v35 = vmul.f32 %v7071_v2, %v2891_v39  ;;  %v5008_v39 = vld [vmem:[%s7707_s11 + $0x20] sm:$0xff]  }
 0x902   : > { %v2835_v58 = vadd.f32 1e-05, %v2803_v49  ;;  %v5063_v25 = vpop.eup %5062  ;;  %v2772_v23 = vpop.xlane.xlu1 %2771  ;;  %4526 = vmatmul.mubr.msk.bf16.gmra.mrb[16].mxu0 %vm829_vm2, %v2986_v50  ;;  %v2966_v29 = vadd.f32 %v7078_v24, %v2928_v42  ;;  %v2892_v55 = vmul.f32 %v5061_v32, %v6977_v33  ;;  %4549 = vmatprep.subr.bf16.mxu0 %v5008_v39  ;;  %v7211_v50 = vld [vmem:[%s7706_s10] ss:$0 sm:$0xff] }
 0x903   : > { %5072 = vrsqrt.f32 %v2834_v18  ;;  %v2804_v1 = vmul.f32 0.03125, %v2772_v23  ;;  %v2893_v4 = vmul.f32 %v5063_v25, %v6989_v10  ;;  %v2967_v19 = vadd.f32 %v7078_v24, %v2929_v35  ;;  %4607 = vmatprep.subr.bf16.mxu1 %v5008_v39  ;;  %4550 = vmatpush3.bf16.msra.mxu0 %v5008_v39 }
 0x904   : > { %5074 = vrsqrt.f32 %v2835_v58  ;;  %v2987_v47 = vpack.c.bf16 %v2966_v29, %v2965_v48  ;;  %v2930_v52 = vmul.f32 %v7071_v2, %v2892_v55  ;;  %4615 = vmatpush3.bf16.msra.mxu1 %v5008_v39 }
 0x905   : > { %v5065_v6 = vpop.eup %5064  ;;  %v2836_v38 = vadd.f32 1e-05, %v2804_v1  ;;  %v2931_v31 = vmul.f32 %v7071_v2, %v2893_v4 }
 0x906   : > { %v5067_v20 = vpop.eup %5066  ;;  %4529 = vmatprep.mubr.msk.bf16.mxu0 %vm829_vm2, %v2987_v47  ;;  %v2968_v14 = vadd.f32 %v7078_v24, %v2930_v52  ;;  %v2894_v33 = vmul.f32 %v5065_v6, %v6992_v34 }
 0x907   : > { %5076 = vrsqrt.f32 %v2836_v38  ;;  %v2895_v10 = vmul.f32 %v5067_v20, %v7001_v5  ;;  %v2969_v26 = vadd.f32 %v7078_v24, %v2931_v31 }
 0x908   : > { %v2988_v0 = vpack.c.bf16 %v2968_v14, %v2967_v19  ;;  %v2932_v12 = vmul.f32 %v7071_v2, %v2894_v33 }
 0x909   : > { %v5069_v45 = vpop.eup %5068  ;;  %v2933_v34 = vmul.f32 %v7071_v2, %v2895_v10 }
 0x90a   : > { %v5071_v61 = vpop.eup %5070  ;;  %4530 = vmatmul.mubr.msk.bf16.gmra.mrb[20].mxu0 %vm829_vm2, %v2988_v0  ;;  %v2970_v44 = vadd.f32 %v7078_v24, %v2932_v12  ;;  %v2896_v28 = vmul.f32 %v5069_v45, %v7004_v16 }
 0x90b   : > { %v2897_v17 = vmul.f32 %v5071_v61, %v7013_v41  ;;  %v2971_v13 = vadd.f32 %v7078_v24, %v2933_v34 }
 0x90c   : > { %v2989_v7 = vpack.c.bf16 %v2970_v44, %v2969_v26  ;;  %v2934_v5 = vmul.f32 %v7071_v2, %v2896_v28 }
 0x90d   : > { %v5073_v62 = vpop.eup %5072  ;;  %v2935_v3 = vmul.f32 %v7071_v2, %v2897_v17 }
 0x90e   : > { %v5075_v54 = vpop.eup %5074  ;;  %4533 = vmatprep.mubr.msk.bf16.mxu0 %vm829_vm2, %v2989_v7  ;;  %v2972_v56 = vadd.f32 %v7078_v24, %v2934_v5  ;;  %v2898_v59 = vmul.f32 %v5073_v62, %v7016_v46 }
 0x90f   : > { %v2899_v16 = vmul.f32 %v5075_v54, %v7025_v11  ;;  %v2973_v27 = vadd.f32 %v7078_v24, %v2935_v3 }
 0x910   : > { %v2990_v53 = vpack.c.bf16 %v2972_v56, %v2971_v13  ;;  %v2936_v41 = vmul.f32 %v7071_v2, %v2898_v59 }
 0x911   : > { %v5077_v22 = vpop.eup %5076  ;;  %v2937_v51 = vmul.f32 %v7071_v2, %v2899_v16 }
 0x912   : > { %4534 = vmatmul.mubr.msk.bf16.gmra.mrb[24].mxu0 %vm829_vm2, %v2990_v53  ;;  %v2974_v36 = vadd.f32 %v7078_v24, %v2936_v41  ;;  %v2900_v30 = vmul.f32 %v5077_v22, %v7028_v57  ;;  %v5009_v57 = vld [vmem:[%s7707_s11 + $0x28] sm:$0xff]  }
 0x913   : > { %v2975_v11 = vadd.f32 %v7078_v24, %v2937_v51  ;;  %4551 = vmatprep.subr.bf16.mxu0 %v5009_v57  ;;  %4608 = vmatprep.subr.bf16.mxu1 %v5009_v57 }
 0x914   : > { %v2991_v9 = vpack.c.bf16 %v2974_v36, %v2973_v27  ;;  %v2938_v46 = vmul.f32 %v7071_v2, %v2900_v30  ;;  %4552 = vmatpush3.bf16.msra.mxu0 %v5009_v57  ;;  %4616 = vmatpush3.bf16.msra.mxu1 %v5009_v57  ;;  %v5010_v2 = vld [vmem:[%s7707_s11 + $0x30] sm:$0xff]  }
 0x915   : > { %4553 = vmatprep.subr.bf16.mxu0 %v5010_v2  ;;  %4609 = vmatprep.subr.bf16.mxu1 %v5010_v2 }
 0x916   : > { %4537 = vmatprep.mubr.msk.bf16.mxu0 %vm829_vm2, %v2991_v9  ;;  %v2976_v63 = vadd.f32 %v7078_v24, %v2938_v46  ;;  %v5011_v24 = vld [vmem:[%s7707_s11 + $0x38] sm:$0xff]  }
 0x918   : > { %v2992_v49 = vpack.c.bf16 %v2976_v63, %v2975_v11  ;;  %4554 = vmatpush3.bf16.msra.mxu0 %v5010_v2  ;;  %4617 = vmatpush3.bf16.msra.mxu1 %v5010_v2 }
 0x919   : > { %4555 = vmatprep.subr.bf16.mxu0 %v5011_v24  ;;  %4610 = vmatprep.subr.bf16.mxu1 %v5011_v24 }
 0x91a   : > { %4538 = vmatmul.mubr.msk.bf16.gmra.mrb[28].mxu0 %vm829_vm2, %v2992_v49 }
 0x91c   : > { %4556 = vmatpush3.bf16.msra.mxu0 %v5011_v24  ;;  %4618 = vmatpush3.bf16.msra.mxu1 %v5011_v24 }
 0x9b5   : > { %v4511_v42 = vpop.f32.mrb[0].mxu0 }
 0x9b6   : > { %v7214_v32 = vadd.f32 %v4511_v42, %v7211_v50  ;;  %v3098_v18 = vpop.f32.mrb[1].mxu0 }
 0x9b7   : > { %v7217_v58 = vadd.f32 %v7211_v50, %v3098_v18  ;;  %v4512_v25 = vpop.f32.mrb[2].mxu0 }
 0x9b8   : > { %v3227_v23 = vmul.f32 %v7214_v32, %v7214_v32  ;;  %v7222_v48 = vadd.f32 %v4512_v25, %v7211_v50  ;;  %v3101_v29 = vpop.f32.mrb[3].mxu0 }
 0x9b9   : > { %v3225_v55 = vmul.f32 %v7217_v58, %v7217_v58  ;;  %v7227_v35 = vadd.f32 %v7211_v50, %v3101_v29 }
 0x9ba   : > { %v3259_v1 = vmul.f32 %v3227_v23, %v7214_v32  ;;  %v3228_v4 = vmul.f32 %v7222_v48, %v7222_v48 }
 0x9bb   : > { %v3257_v47 = vmul.f32 %v3225_v55, %v7217_v58  ;;  %v3226_v52 = vmul.f32 %v7227_v35, %v7227_v35 }
 0x9bc   : > { %v3291_v6 = vmul.f32 0.044715, %v3259_v1  ;;  %v3260_v38 = vmul.f32 %v3228_v4, %v7222_v48 }
 0x9bd   : > { %v3289_v20 = vmul.f32 0.044715, %v3257_v47  ;;  %v3258_v19 = vmul.f32 %v3226_v52, %v7227_v35  ;;  %v4515_v14 = vpop.f32.mrb[4].mxu0 }
 0x9be   : > { %v3323_v33 = vadd.f32 %v3291_v6, %v7214_v32  ;;  %v3292_v31 = vmul.f32 0.044715, %v3260_v38  ;;  %v7239_v10 = vadd.f32 %v4515_v14, %v7211_v50  ;;  %v3114_v0 = vpop.f32.mrb[5].mxu0 }
 0x9bf   : > { %v3321_v12 = vadd.f32 %v3289_v20, %v7217_v58  ;;  %v3290_v45 = vmul.f32 0.044715, %v3258_v19  ;;  %v7243_v61 = vadd.f32 %v7211_v50, %v3114_v0  ;;  %v4516_v26 = vpop.f32.mrb[6].mxu0 }
 0x9c0   : > { %v3355_v44 = vmul.f32 0.7978846, %v3323_v33  ;;  %v3324_v28 = vadd.f32 %v3292_v31, %v7222_v48  ;;  %v3231_v34 = vmul.f32 %v7239_v10, %v7239_v10  ;;  %v7249_v17 = vadd.f32 %v4516_v26, %v7211_v50  ;;  %v3117_v7 = vpop.f32.mrb[7].mxu0 }
 0x9c1   : > { %v3353_v5 = vmul.f32 0.7978846, %v3321_v12  ;;  %v3322_v62 = vadd.f32 %v3290_v45, %v7227_v35  ;;  %v3229_v54 = vmul.f32 %v7243_v61, %v7243_v61  ;;  %v7255_v13 = vadd.f32 %v7211_v50, %v3117_v7 }
 0x9c2   : > { %5078 = vtanh.f32 %v3355_v44  ;;  %v3356_v56 = vmul.f32 0.7978846, %v3324_v28  ;;  %v3263_v59 = vmul.f32 %v3231_v34, %v7239_v10  ;;  %v3232_v3 = vmul.f32 %v7249_v17, %v7249_v17 }
 0x9c3   : > { %5080 = vtanh.f32 %v3353_v5  ;;  %v3354_v16 = vmul.f32 0.7978846, %v3322_v62  ;;  %v3261_v53 = vmul.f32 %v3229_v54, %v7243_v61  ;;  %v3230_v41 = vmul.f32 %v7255_v13, %v7255_v13 }
 0x9c4   : > { %5082 = vtanh.f32 %v3356_v56  ;;  %v3295_v22 = vmul.f32 0.044715, %v3263_v59  ;;  %v3264_v27 = vmul.f32 %v3232_v3, %v7249_v17 }
 0x9c5   : > { %v3293_v36 = vmul.f32 0.044715, %v3261_v53  ;;  %v3262_v30 = vmul.f32 %v3230_v41, %v7255_v13  ;;  %v4519_v51 = vpop.f32.mrb[8].mxu0  ;;  %5084 = vtanh.f32 %v3354_v16 }
 0x9c6   : > { %v3327_v9 = vadd.f32 %v3295_v22, %v7239_v10  ;;  %v3296_v46 = vmul.f32 0.044715, %v3264_v27  ;;  %v7267_v11 = vadd.f32 %v4519_v51, %v7211_v50  ;;  %v3130_v63 = vpop.f32.mrb[9].mxu0 }
 0x9c7   : > { %v3294_v49 = vmul.f32 0.044715, %v3262_v30  ;;  %v7270_v39 = vadd.f32 %v7211_v50, %v3130_v63  ;;  %v4520_v57 = vpop.f32.mrb[10].mxu0  ;;  %v3325_v2 = vadd.f32 %v3293_v36, %v7243_v61 }
 0x9c8   : > { %v3359_v24 = vmul.f32 0.7978846, %v3327_v9  ;;  %v3328_v42 = vadd.f32 %v3296_v46, %v7249_v17  ;;  %v3235_v18 = vmul.f32 %v7267_v11, %v7267_v11  ;;  %v7277_v25 = vadd.f32 %v4520_v57, %v7211_v50  ;;  %v3133_v23 = vpop.f32.mrb[11].mxu0 }
 0x9c9   : > { %v3233_v29 = vmul.f32 %v7270_v39, %v7270_v39  ;;  %v7282_v55 = vadd.f32 %v7211_v50, %v3133_v23  ;;  %v3326_v1 = vadd.f32 %v3294_v49, %v7255_v13  ;;  %v3357_v4 = vmul.f32 0.7978846, %v3325_v2 }
 0x9ca   : > { %5086 = vtanh.f32 %v3359_v24  ;;  %v3360_v47 = vmul.f32 0.7978846, %v3328_v42  ;;  %v3267_v52 = vmul.f32 %v3235_v18, %v7267_v11  ;;  %v3236_v6 = vmul.f32 %v7277_v25, %v7277_v25 }
 0x9cb   : > { %v3265_v38 = vmul.f32 %v3233_v29, %v7270_v39  ;;  %v3234_v20 = vmul.f32 %v7282_v55, %v7282_v55  ;;  %v3358_v19 = vmul.f32 0.7978846, %v3326_v1  ;;  %5088 = vtanh.f32 %v3357_v4 }
 0x9cc   : > { %v5079_v14 = vpop.eup %5078  ;;  %5090 = vtanh.f32 %v3360_v47  ;;  %v3299_v33 = vmul.f32 0.044715, %v3267_v52  ;;  %v3268_v31 = vmul.f32 %v3236_v6, %v7277_v25 }
 0x9cd   : > { %v5081_v0 = vpop.eup %5080  ;;  %v3419_v12 = vadd.f32 1.0, %v5079_v14  ;;  %v3297_v45 = vmul.f32 0.044715, %v3265_v38  ;;  %v3266_v26 = vmul.f32 %v3234_v20, %v7282_v55  ;;  %v4523_v44 = vpop.f32.mrb[12].mxu0  ;;  %5092 = vtanh.f32 %v3358_v19 }
 0x9ce   : > { %v5083_v28 = vpop.eup %5082  ;;  %v3331_v34 = vadd.f32 %v3299_v33, %v7267_v11  ;;  %v3300_v7 = vmul.f32 0.044715, %v3268_v31  ;;  %v7295_v5 = vadd.f32 %v4523_v44, %v7211_v50  ;;  %v3146_v62 = vpop.f32.mrb[13].mxu0  ;;  %v3417_v54 = vadd.f32 1.0, %v5081_v0 }
 0x9cf   : > { %v3451_v56 = vmul.f32 0.5, %v3419_v12  ;;  %v3420_v59 = vadd.f32 1.0, %v5083_v28  ;;  %v3329_v3 = vadd.f32 %v3297_v45, %v7270_v39  ;;  %v3298_v16 = vmul.f32 0.044715, %v3266_v26  ;;  %v4524_v53 = vpop.f32.mrb[14].mxu0  ;;  %v5085_v51 = vpop.eup %5084 }
 0x9d0   : > { %v3363_v41 = vmul.f32 0.7978846, %v3331_v34  ;;  %v3332_v22 = vadd.f32 %v3300_v7, %v7277_v25  ;;  %v3239_v27 = vmul.f32 %v7295_v5, %v7295_v5  ;;  %v7302_v36 = vadd.f32 %v7211_v50, %v3146_v62  ;;  %v3149_v30 = vpop.f32.mrb[15].mxu0 }
 0x9d1   : > { %v7305_v9 = vmul.f32 %v3451_v56, %v7214_v32  ;;  %v3452_v46 = vmul.f32 0.5, %v3420_v59  ;;  %v3361_v63 = vmul.f32 0.7978846, %v3329_v3  ;;  %v3330_v49 = vadd.f32 %v3298_v16, %v7282_v55 }
 0x9d2   : > { %5094 = vtanh.f32 %v3363_v41  ;;  %v3364_v57 = vmul.f32 0.7978846, %v3332_v22  ;;  %v3271_v2 = vmul.f32 %v3239_v27, %v7295_v5  ;;  %v3237_v24 = vmul.f32 %v7302_v36, %v7302_v36 }
 0x9d3   : > { %v7312_v42 = vmul.f32 %v3452_v46, %v7222_v48  ;;  %5096 = vtanh.f32 %v3361_v63  ;;  %v3362_v18 = vmul.f32 0.7978846, %v3330_v49  ;;  %v7315_v23 = vadd.f32 %v4524_v53, %v7211_v50 }
 0x9d4   : > { %v7317_v32 = vpop.eup %5086  ;;  %5098 = vtanh.f32 %v3364_v57  ;;  %v3303_v29 = vmul.f32 0.044715, %v3271_v2  ;;  %v3269_v1 = vmul.f32 %v3237_v24, %v7302_v36  ;;  %v7321_v4 = vadd.f32 %v7211_v50, %v3149_v30 }
 0x9d5   : > { %v7323_v47 = vpop.eup %5088  ;;  %v3514_v48 = vpack.c.bf16 %v7312_v42, %v7305_v9  ;;  %5100 = vtanh.f32 %v3362_v18  ;;  %v3240_v52 = vmul.f32 %v7315_v23, %v7315_v23  ;;  %v4527_v6 = vpop.f32.mrb[16].mxu0  ;;  %v3418_v38 = vadd.f32 1.0, %v5085_v51 }
 0x9d6   : > { %v7329_v20 = vpop.eup %5090  ;;  %v3335_v19 = vadd.f32 %v3303_v29, %v7295_v5  ;;  %v3301_v14 = vmul.f32 0.044715, %v3269_v1  ;;  %v3238_v33 = vmul.f32 %v7321_v4, %v7321_v4  ;;  %v7335_v31 = vadd.f32 %v4527_v6, %v7211_v50  ;;  %v3162_v0 = vpop.f32.mrb[17].mxu0 }
 0x9d7   : > { %v7337_v12 = vpop.eup %5092  ;;  %v3272_v45 = vmul.f32 %v3240_v52, %v7315_v23  ;;  %v7341_v26 = vadd.f32 %v7211_v50, %v3162_v0  ;;  %v4528_v44 = vpop.f32.mrb[18].mxu0  ;;  %v3449_v28 = vmul.f32 0.5, %v3417_v54  ;;  %v3450_v34 = vmul.f32 0.5, %v3418_v38 }
 0x9d8   : > { %v3367_v7 = vmul.f32 0.7978846, %v3335_v19  ;;  %v3333_v62 = vadd.f32 %v3301_v14, %v7302_v36  ;;  %v3270_v56 = vmul.f32 %v3238_v33, %v7321_v4  ;;  %v3243_v59 = vmul.f32 %v7335_v31, %v7335_v31  ;;  %v3165_v3 = vpop.f32.mrb[19].mxu0 }
 0x9d9   : > { %v3304_v16 = vmul.f32 0.044715, %v3272_v45  ;;  %v3241_v53 = vmul.f32 %v7341_v26, %v7341_v26  ;;  %v7350_v41 = vadd.f32 %v4528_v44, %v7211_v50  ;;  %v7353_v22 = vadd.f32 %v7211_v50, %v3165_v3 }
 0x9da   : > { %5102 = vtanh.f32 %v3367_v7  ;;  %v3365_v54 = vmul.f32 0.7978846, %v3333_v62  ;;  %v3302_v27 = vmul.f32 0.044715, %v3270_v56  ;;  %v3275_v30 = vmul.f32 %v3243_v59, %v7335_v31 }
 0x9db   : > { %v3336_v51 = vadd.f32 %v3304_v16, %v7315_v23  ;;  %v3273_v46 = vmul.f32 %v3241_v53, %v7341_v26  ;;  %v3244_v63 = vmul.f32 %v7350_v41, %v7350_v41  ;;  %v3242_v49 = vmul.f32 %v7353_v22, %v7353_v22 }
 0x9dc   : > { %v7362_v57 = vpop.eup %5094  ;;  %5104 = vtanh.f32 %v3365_v54  ;;  %v3334_v2 = vadd.f32 %v3302_v27, %v7321_v4  ;;  %v3307_v24 = vmul.f32 0.044715, %v3275_v30  ;;  %v3481_v18 = vmul.f32 %v3449_v28, %v7217_v58 }
 0x9dd   : > { %v7366_v29 = vpop.eup %5096  ;;  %v3368_v1 = vmul.f32 0.7978846, %v3336_v51  ;;  %v3305_v52 = vmul.f32 0.044715, %v3273_v46  ;;  %v3276_v6 = vmul.f32 %v3244_v63, %v7350_v41  ;;  %v3274_v38 = vmul.f32 %v3242_v49, %v7353_v22  ;;  %v4531_v19 = vpop.f32.mrb[20].mxu0 }
 0x9de   : > { %v7370_v14 = vpop.eup %5098  ;;  %v3366_v33 = vmul.f32 0.7978846, %v3334_v2  ;;  %v3339_v0 = vadd.f32 %v3307_v24, %v7335_v31  ;;  %v3482_v45 = vmul.f32 %v3450_v34, %v7227_v35  ;;  %v7375_v44 = vadd.f32 %v4531_v19, %v7211_v50  ;;  %v3178_v58 = vpop.f32.mrb[21].mxu0 }
 0x9df   : > { %v7377_v28 = vpop.eup %5100  ;;  %5106 = vtanh.f32 %v3368_v1  ;;  %v3337_v7 = vadd.f32 %v3305_v52, %v7341_v26  ;;  %v3308_v62 = vmul.f32 0.044715, %v3276_v6  ;;  %v3306_v56 = vmul.f32 0.044715, %v3274_v38  ;;  %v4532_v59 = vpop.f32.mrb[22].mxu0 }
 0x9e0   : > { %5108 = vtanh.f32 %v3366_v33  ;;  %v3371_v3 = vmul.f32 0.7978846, %v3339_v0  ;;  %v3513_v16 = vpack.c.bf16 %v3482_v45, %v3481_v18  ;;  %v3247_v53 = vmul.f32 %v7375_v44, %v7375_v44  ;;  %v3181_v54 = vpop.f32.mrb[23].mxu0 }
 0x9e1   : > { %v3369_v35 = vmul.f32 0.7978846, %v3337_v7  ;;  %v3340_v34 = vadd.f32 %v3308_v62, %v7350_v41  ;;  %v3338_v27 = vadd.f32 %v3306_v56, %v7353_v22  ;;  %v7385_v30 = vadd.f32 %v7211_v50, %v3178_v58 }
 0x9e2   : > { %5110 = vtanh.f32 %v3371_v3  ;;  %4557 = vmatprep.mubr.bf16.mxu0 %v3513_v16  ;;  %v3279_v51 = vmul.f32 %v3247_v53, %v7375_v44  ;;  %v7389_v46 = vadd.f32 %v4532_v59, %v7211_v50  ;;  %v7392_v63 = vadd.f32 %v7211_v50, %v3181_v54 }
 0x9e3   : > { %5112 = vtanh.f32 %v3369_v35  ;;  %v3372_v49 = vmul.f32 0.7978846, %v3340_v34  ;;  %v3370_v2 = vmul.f32 0.7978846, %v3338_v27  ;;  %4558 = vmatmul.mubr.bf16.vlgmr.msra.gmra.mrb[32].mxu0 %v3514_v48  ;;  %v3245_v24 = vmul.f32 %v7385_v30, %v7385_v30 }
 0x9e4   : > { %v7399_v18 = vpop.eup %5102  ;;  %v3311_v1 = vmul.f32 0.044715, %v3279_v51  ;;  %v3248_v52 = vmul.f32 %v7389_v46, %v7389_v46  ;;  %v3246_v6 = vmul.f32 %v7392_v63, %v7392_v63  ;;  %v3421_v38 = vadd.f32 1.0, %v7323_v47 }
 0x9e5   : > { %5114 = vtanh.f32 %v3372_v49  ;;  %v3277_v19 = vmul.f32 %v3245_v24, %v7385_v30  ;;  %v3422_v9 = vadd.f32 1.0, %v7337_v12  ;;  %v3423_v42 = vadd.f32 1.0, %v7317_v32  ;;  %v4535_v48 = vpop.f32.mrb[24].mxu0 }
 0x9e6   : > { %v7409_v33 = vpop.eup %5104  ;;  %5116 = vtanh.f32 %v3370_v2  ;;  %v3343_v0 = vadd.f32 %v3311_v1, %v7375_v44  ;;  %v3280_v45 = vmul.f32 %v3248_v52, %v7389_v46  ;;  %v3278_v58 = vmul.f32 %v3246_v6, %v7392_v63  ;;  %v3194_v7 = vpop.f32.mrb[25].mxu0 }
 0x9e7   : > { %v3309_v62 = vmul.f32 0.044715, %v3277_v19  ;;  %v3453_v47 = vmul.f32 0.5, %v3421_v38  ;;  %v3454_v56 = vmul.f32 0.5, %v3422_v9  ;;  %v3424_v59 = vadd.f32 1.0, %v7329_v20  ;;  %v4536_v3 = vpop.f32.mrb[26].mxu0 }
 0x9e8   : > { %v3375_v12 = vmul.f32 0.7978846, %v3343_v0  ;;  %v3312_v16 = vmul.f32 0.044715, %v3280_v45  ;;  %v3310_v32 = vmul.f32 0.044715, %v3278_v58  ;;  %v7416_v53 = vadd.f32 %v4535_v48, %v7211_v50 }
 0x9e9   : > { %v7418_v54 = vpop.eup %5106  ;;  %v3341_v35 = vadd.f32 %v3309_v62, %v7385_v30  ;;  %v3485_v34 = vmul.f32 %v3453_v47, %v7243_v61  ;;  %v3486_v27 = vmul.f32 %v3454_v56, %v7255_v13  ;;  %v3455_v51 = vmul.f32 0.5, %v3423_v42  ;;  %v3197_v49 = vpop.f32.mrb[27].mxu0 }
 0x9ea   : > { %v7423_v2 = vpop.eup %5108  ;;  %5118 = vtanh.f32 %v3375_v12  ;;  %v3344_v20 = vadd.f32 %v3312_v16, %v7389_v46  ;;  %v3342_v24 = vadd.f32 %v3310_v32, %v7392_v63  ;;  %v3456_v1 = vmul.f32 0.5, %v3424_v59 }
 0x9eb   : > { %v3373_v52 = vmul.f32 0.7978846, %v3341_v35  ;;  %v3515_v6 = vpack.c.bf16 %v3486_v27, %v3485_v34  ;;  %v3487_v38 = vmul.f32 %v3455_v51, %v7239_v10  ;;  %v3251_v19 = vmul.f32 %v7416_v53, %v7416_v53 }
 0x9ec   : > { %v7430_v61 = vpop.eup %5110  ;;  %v3376_v13 = vmul.f32 0.7978846, %v3344_v20  ;;  %v3374_v9 = vmul.f32 0.7978846, %v3342_v24  ;;  %v3488_v42 = vmul.f32 %v3456_v1, %v7249_v17  ;;  %v7434_v48 = vadd.f32 %v7211_v50, %v3194_v7 }
 0x9ed   : > { %v7436_v0 = vpop.eup %5112  ;;  %5120 = vtanh.f32 %v3373_v52  ;;  %4561 = vmatprep.mubr.bf16.mxu1 %v3515_v6  ;;  %v3283_v45 = vmul.f32 %v3251_v19, %v7416_v53  ;;  %v7440_v10 = vadd.f32 %v4536_v3, %v7211_v50  ;;  %v7443_v58 = vadd.f32 %v7211_v50, %v3197_v49  ;;  %v4539_v62 = vpop.f32.mrb[28].mxu0 }
 0x9ee   : > { %5122 = vtanh.f32 %v3376_v13  ;;  %v3516_v47 = vpack.c.bf16 %v3488_v42, %v3487_v38  ;;  %v3249_v17 = vmul.f32 %v7434_v48, %v7434_v48  ;;  %v3425_v7 = vadd.f32 1.0, %v7366_v29  ;;  %v3210_v56 = vpop.f32.mrb[29].mxu0 }
 0x9ef   : > { %v7448_v59 = vpop.eup %5114  ;;  %5124 = vtanh.f32 %v3374_v9  ;;  %v3315_v12 = vmul.f32 0.044715, %v3283_v45  ;;  %v3252_v3 = vmul.f32 %v7440_v10, %v7440_v10  ;;  %v3250_v16 = vmul.f32 %v7443_v58, %v7443_v58  ;;  %v4540_v32 = vpop.f32.mrb[30].mxu0 }
 0x9f0   : > { %v7454_v35 = vpop.eup %5116  ;;  %4562 = vmatmul.mubr.bf16.vlgmr.msra.gmra.mrb[0].mxu1 %v3516_v47  ;;  %v3281_v34 = vmul.f32 %v3249_v17, %v7434_v48  ;;  %v3426_v27 = vadd.f32 1.0, %v7377_v28  ;;  %v3457_v29 = vmul.f32 0.5, %v3425_v7  ;;  %v3427_v51 = vadd.f32 1.0, %v7362_v57  ;;  %v3213_v49 = vpop.f32.mrb[31].mxu0 }
 0x9f1   : > { %v3347_v20 = vadd.f32 %v3315_v12, %v7416_v53  ;;  %v3284_v24 = vmul.f32 %v3252_v3, %v7440_v10  ;;  %v3282_v1 = vmul.f32 %v3250_v16, %v7443_v58  ;;  %v3428_v52 = vadd.f32 1.0, %v7370_v14 }
 0x9f2   : > { %v3313_v6 = vmul.f32 0.044715, %v3281_v34  ;;  %v3458_v38 = vmul.f32 0.5, %v3426_v27  ;;  %v3489_v19 = vmul.f32 %v3457_v29, %v7270_v39  ;;  %v3459_v13 = vmul.f32 0.5, %v3427_v51 }
 0x9f3   : > { %v3379_v9 = vmul.f32 0.7978846, %v3347_v20  ;;  %v3316_v42 = vmul.f32 0.044715, %v3284_v24  ;;  %v3314_v28 = vmul.f32 0.044715, %v3282_v1  ;;  %v7465_v45 = vadd.f32 %v4539_v62, %v7211_v50 }
 0x9f4   : > { %v7467_v57 = vpop.eup %5118  ;;  %v3345_v47 = vadd.f32 %v3313_v6, %v7434_v48  ;;  %v3490_v17 = vmul.f32 %v3458_v38, %v7282_v55  ;;  %v3460_v7 = vmul.f32 0.5, %v3428_v52  ;;  %v3491_v14 = vmul.f32 %v3459_v13, %v7267_v11 }
 0x9f5   : > { %5126 = vtanh.f32 %v3379_v9  ;;  %v3348_v12 = vadd.f32 %v3316_v42, %v7440_v10  ;;  %v3346_v39 = vadd.f32 %v3314_v28, %v7443_v58  ;;  %v3255_v3 = vmul.f32 %v7465_v45, %v7465_v45 }
 0x9f6   : > { %v3377_v16 = vmul.f32 0.7978846, %v3345_v47  ;;  %v3517_v62 = vpack.c.bf16 %v3490_v17, %v3489_v19  ;;  %v3492_v34 = vmul.f32 %v3460_v7, %v7277_v25  ;;  %v7478_v27 = vadd.f32 %v7211_v50, %v3210_v56 }
 0x9f7   : > { %v7480_v29 = vpop.eup %5120  ;;  %v3380_v55 = vmul.f32 0.7978846, %v3348_v12  ;;  %v3378_v51 = vmul.f32 0.7978846, %v3346_v39  ;;  %v3287_v11 = vmul.f32 %v3255_v3, %v7465_v45  ;;  %v7484_v20 = vadd.f32 %v4540_v32, %v7211_v50 }
 0x9f8   : > { %v7486_v24 = vpop.eup %5122  ;;  %5128 = vtanh.f32 %v3377_v16  ;;  %4565 = vmatprep.mubr.bf16.mxu1 %v3517_v62  ;;  %v3518_v1 = vpack.c.bf16 %v3492_v34, %v3491_v14  ;;  %v3253_v25 = vmul.f32 %v7478_v27, %v7478_v27  ;;  %v7491_v56 = vadd.f32 %v7211_v50, %v3213_v49 }
 0x9f9   : > { %v5125_v52 = vpop.eup %5124  ;;  %5130 = vtanh.f32 %v3380_v55  ;;  %v3319_v6 = vmul.f32 0.044715, %v3287_v11  ;;  %v3256_v38 = vmul.f32 %v7484_v20, %v7484_v20  ;;  %v3429_v32 = vadd.f32 1.0, %v7409_v33 }
 0x9fa   : > { %5132 = vtanh.f32 %v3378_v51  ;;  %4566 = vmatmul.mubr.bf16.gmra.mrb[4].mxu1 %v3518_v1  ;;  %v3285_v19 = vmul.f32 %v3253_v25, %v7478_v27  ;;  %v3254_v13 = vmul.f32 %v7491_v56, %v7491_v56  ;;  %v3430_v9 = vadd.f32 1.0, %v7423_v2 }
 0x9fb   : > { %v3351_v50 = vadd.f32 %v3319_v6, %v7465_v45  ;;  %v3288_v49 = vmul.f32 %v3256_v38, %v7484_v20  ;;  %v3461_v42 = vmul.f32 0.5, %v3429_v32  ;;  %v3431_v28 = vadd.f32 1.0, %v7399_v18 }
 0x9fc   : > { %v3317_v47 = vmul.f32 0.044715, %v3285_v19  ;;  %v3286_v17 = vmul.f32 %v3254_v13, %v7491_v56  ;;  %v3462_v33 = vmul.f32 0.5, %v3430_v9  ;;  %v3432_v7 = vadd.f32 1.0, %v7418_v54 }
 0x9fd   : > { %v3383_v14 = vmul.f32 0.7978846, %v3351_v50  ;;  %v3320_v12 = vmul.f32 0.044715, %v3288_v49  ;;  %v3493_v39 = vmul.f32 %v3461_v42, %v7302_v36  ;;  %v3463_v3 = vmul.f32 0.5, %v3431_v28 }
 0x9fe   : > { %v3349_v2 = vadd.f32 %v3317_v47, %v7478_v27  ;;  %v3318_v16 = vmul.f32 0.044715, %v3286_v17  ;;  %v3494_v62 = vmul.f32 %v3462_v33, %v7321_v4  ;;  %v3464_v34 = vmul.f32 0.5, %v3432_v7 }
 0x9ff   : > { %v5127_v55 = vpop.eup %5126  ;;  %5134 = vtanh.f32 %v3383_v14  ;;  %v3352_v18 = vadd.f32 %v3320_v12, %v7484_v20  ;;  %v3495_v51 = vmul.f32 %v3463_v3, %v7295_v5  ;;  %v3433_v11 = vadd.f32 1.0, %v7436_v0 }
 0xa00   : > { %v3381_v54 = vmul.f32 0.7978846, %v3349_v2  ;;  %v3350_v1 = vadd.f32 %v3318_v16, %v7491_v56  ;;  %v3519_v25 = vpack.c.bf16 %v3494_v62, %v3493_v39  ;;  %v3496_v36 = vmul.f32 %v3464_v34, %v7315_v23 }
 0xa01   : > { %v3384_v6 = vmul.f32 0.7978846, %v3352_v18  ;;  %v3434_v38 = vadd.f32 1.0, %v7454_v35  ;;  %v3465_v32 = vmul.f32 0.5, %v3433_v11  ;;  %v3435_v4 = vadd.f32 1.0, %v7430_v61 }
 0xa02   : > { %v5129_v19 = vpop.eup %5128  ;;  %5136 = vtanh.f32 %v3381_v54  ;;  %v3382_v13 = vmul.f32 0.7978846, %v3350_v1  ;;  %4569 = vmatprep.mubr.bf16.mxu1 %v3519_v25  ;;  %v3520_v9 = vpack.c.bf16 %v3496_v36, %v3495_v51  ;;  %v3436_v5 = vadd.f32 1.0, %v7448_v59 }
 0xa03   : > { %v5131_v0 = vpop.eup %5130  ;;  %5138 = vtanh.f32 %v3384_v6  ;;  %v3466_v50 = vmul.f32 0.5, %v3434_v38  ;;  %v3497_v49 = vmul.f32 %v3465_v32, %v7341_v26  ;;  %v3467_v42 = vmul.f32 0.5, %v3435_v4 }
 0xa04   : > { %v5133_v23 = vpop.eup %5132  ;;  %5140 = vtanh.f32 %v3382_v13  ;;  %4570 = vmatmul.mubr.bf16.gmra.mrb[8].mxu1 %v3520_v9  ;;  %v3468_v35 = vmul.f32 0.5, %v3436_v5  ;;  %v3437_v28 = vadd.f32 1.0, %v7480_v29  ;;  %v3438_v61 = vadd.f32 1.0, %v5125_v52 }
 0xa05   : > { %v3498_v47 = vmul.f32 %v3466_v50, %v7353_v22  ;;  %v3499_v17 = vmul.f32 %v3467_v42, %v7335_v31  ;;  %v3439_v33 = vadd.f32 1.0, %v7467_v57  ;;  %v3440_v59 = vadd.f32 1.0, %v7486_v24 }
 0xa06   : > { %v3500_v7 = vmul.f32 %v3468_v35, %v7350_v41  ;;  %v3469_v14 = vmul.f32 0.5, %v3437_v28  ;;  %v3470_v26 = vmul.f32 0.5, %v3438_v61  ;;  %v3441_v12 = vadd.f32 1.0, %v5129_v19 }
 0xa07   : > { %v3521_v39 = vpack.c.bf16 %v3498_v47, %v3497_v49  ;;  %v3471_v3 = vmul.f32 0.5, %v3439_v33  ;;  %v3472_v2 = vmul.f32 0.5, %v3440_v59  ;;  %v3442_v16 = vadd.f32 1.0, %v5133_v23 }
 0xa08   : > { %v3522_v62 = vpack.c.bf16 %v3500_v7, %v3499_v17  ;;  %v3501_v29 = vmul.f32 %v3469_v14, %v7385_v30  ;;  %v3502_v22 = vmul.f32 %v3470_v26, %v7392_v63  ;;  %v3473_v52 = vmul.f32 0.5, %v3441_v12 }
 0xa09   : > { %v5135_v31 = vpop.eup %5134  ;;  %4573 = vmatprep.mubr.bf16.mxu1 %v3521_v39  ;;  %v3503_v57 = vmul.f32 %v3471_v3, %v7375_v44  ;;  %v3504_v24 = vmul.f32 %v3472_v2, %v7389_v46  ;;  %v3474_v41 = vmul.f32 0.5, %v3442_v16  ;;  %v3443_v34 = vadd.f32 1.0, %v5127_v55 }
 0xa0a   : > { %v3523_v18 = vpack.c.bf16 %v3502_v22, %v3501_v29  ;;  %v3444_v51 = vadd.f32 1.0, %v5131_v0  ;;  %v3447_v11 = vadd.f32 1.0, %v5135_v31  ;;  %v3505_v1 = vmul.f32 %v3473_v52, %v7434_v48 }
 0xa0b   : > { %v3524_v54 = vpack.c.bf16 %v3504_v24, %v3503_v57  ;;  %v3506_v25 = vmul.f32 %v3474_v41, %v7443_v58  ;;  %v3475_v30 = vmul.f32 0.5, %v3443_v34  ;;  %v5358_v35 = vmov 0.0   ;;  %v7949_v41 = vld [vmem:[#allocation40_spill] sm:$0xff] }
 0xa0c   : > { %v5137_v36 = vpop.eup %5136  ;;  %4574 = vmatmul.mubr.bf16.gmra.mrb[12].mxu1 %v3522_v62  ;;  %v3476_v63 = vmul.f32 0.5, %v3444_v51  ;;  %v3479_v19 = vmul.f32 0.5, %v3447_v11  ;;  %4589 = vmatprep.subr.bf16.mxu0 %v5358_v35 }
 0xa0d   : > { %v5139_v6 = vpop.eup %5138  ;;  %4577 = vmatprep.mubr.bf16.mxu1 %v3523_v18  ;;  %v3525_v38 = vpack.c.bf16 %v3506_v25, %v3505_v1  ;;  %v3445_v44 = vadd.f32 1.0, %v5137_v36  ;;  %v3507_v46 = vmul.f32 %v3475_v30, %v7416_v53  ;;  %4593 = vmatprep.mubr.msk.bf16.mxu0 %vm5359_vm3, %v5358_v35 }
 0xa0e   : > { %v5141_v32 = vpop.eup %5140  ;;  %v3508_v55 = vmul.f32 %v3476_v63, %v7440_v10  ;;  %v3448_v4 = vadd.f32 1.0, %v5139_v6  ;;  %v3511_v0 = vmul.f32 %v3479_v19, %v7465_v45  ;;  %v5012_v10 = vld [vmem:[%s7709_s13] sm:$0xff]   ;;  %v5013_v45 = vld [vmem:[%s7709_s13 + $0x8] sm:$0xff]  }
 0xa0f   : > { %v3446_v13 = vadd.f32 1.0, %v5141_v32  ;;  %v3477_v9 = vmul.f32 0.5, %v3445_v44  ;;  %4590 = vmatpush3.bf16.msra.mxu0 %v5012_v10  ;;  %v7950_v6 = vld [vmem:[#allocation43_spill] sm:$0xff]  ;;  %v7951_v44 = vld [vmem:[#allocation41_spill] sm:$0xff] }
 0xa10   : > { %v3526_v48 = vpack.c.bf16 %v3508_v55, %v3507_v46  ;;  %v3480_v5 = vmul.f32 0.5, %v3448_v4  ;;  %4591 = vmatprep.subr.bf16.mxu0 %v5358_v35 }
 0xa11   : > { %v3478_v58 = vmul.f32 0.5, %v3446_v13  ;;  %v3509_v49 = vmul.f32 %v3477_v9, %v7478_v27  ;;  %v7952_v13 = vld [vmem:[#allocation44_spill] sm:$0xff] }
 0xa12   : > { %v3512_v50 = vmul.f32 %v3480_v5, %v7484_v20  ;;  %v7544_v20 = vld [vmem:[%s7708_s12] ss:$0 sm:$0xff] }
 0xa13   : > { %v3510_v42 = vmul.f32 %v3478_v58, %v7491_v56  ;;  %4592 = vmatpush3.bf16.msra.mxu0 %v5013_v45 }
 0xa14   : > { %4578 = vmatmul.mubr.bf16.gmra.mrb[16].mxu1 %v3524_v54  ;;  %v3528_v23 = vpack.c.bf16 %v3512_v50, %v3511_v0 }
 0xa15   : > { %4581 = vmatprep.mubr.bf16.mxu1 %v3525_v38  ;;  %v3527_v53 = vpack.c.bf16 %v3510_v42, %v3509_v49 }
 0xa1c   : > { %4582 = vmatmul.mubr.bf16.gmra.mrb[20].mxu1 %v3526_v48  ;;  %v7953_v48 = vld [vmem:[#allocation42_spill] sm:$0xff] }
 0xa1d   : > { %4585 = vmatprep.mubr.bf16.mxu1 %v3527_v53 }
 0xa24   : > { %4586 = vmatmul.mubr.bf16.gmra.mrb[24].mxu1 %v3528_v23 }
 0xab6   : > { %v4559_v27 = vpop.f32.mrb[32].mxu0 }
 0xab7   : > { %v3627_v56 = vpop.f32.mrb[33].mxu0  ;;  %v3756_v28 = vadd.f32 %v4559_v27, %v6684_v21 }
 0xab8   : > { %v3754_v61 = vadd.f32 %v3627_v56, %v6681_v37  ;;  %v4560_v47 = vpop.f32.mrb[34].mxu0 }
 0xab9   : > { %v3630_v17 = vpop.f32.mrb[35].mxu0  ;;  %v3757_v59 = vadd.f32 %v4560_v47, %v6690_v8  ;;  %v3795_v14 = vadd.f32 %v7544_v20, %v3756_v28  ;;  %v7954_v28 = vld [vmem:[#allocation47_spill] sm:$0xff]  ;;  %v7955_v47 = vld [vmem:[#allocation45_spill] sm:$0xff] }
 0xaba   : > { %v3793_v33 = vadd.f32 %v7544_v20, %v3754_v61  ;;  %v3755_v7 = vadd.f32 %v3630_v17, %v6687_v40 }
 0xabb   : > { %v3796_v39 = vadd.f32 %v7544_v20, %v3757_v59  ;;  %v3828_v37 = vsel %vm829_vm2, %v3795_v14, 0.0 }
 0xabc   : > { %v3794_v26 = vadd.f32 %v7544_v20, %v3755_v7  ;;  %v3825_v12 = vsel %vm829_vm2, %v3793_v33, 0.0 }
 0xabd   : > { %v3830_v16 = vsel %vm829_vm2, %v3796_v39, 0.0  ;;  %v7957_v39 = vld [vmem:[#allocation46_spill] sm:$0xff] }
 0xabe   : > { %v3826_v21 = vsel %vm829_vm2, %v3794_v26, 0.0  ;;  %v7956_v26 = vld [vmem:[#allocation48_spill] sm:$0xff] }
 0xabf   : > { %v3827_v3 = vadd.f32 %v3826_v21, %v3825_v12 }
 0xac1   : > { %v3829_v2 = vadd.f32 %v3828_v37, %v3827_v3 }
 0xac3   : > { %v4563_v62 = vpop.f32.mrb[0].mxu1  ;;  %v3831_v8 = vadd.f32 %v3830_v16, %v3829_v2 }
 0xac4   : > { %v3643_v29 = vpop.f32.mrb[1].mxu1  ;;  %v3760_v40 = vadd.f32 %v4563_v62, %v6711_v43 }
 0xac5   : > { %v3758_v22 = vadd.f32 %v3643_v29, %v6701_v15  ;;  %v4564_v52 = vpop.f32.mrb[2].mxu1 }
 0xac6   : > { %v3646_v31 = vpop.f32.mrb[3].mxu1  ;;  %v3761_v24 = vadd.f32 %v4564_v52, %v6714_v60  ;;  %v3799_v18 = vadd.f32 %v7544_v20, %v3760_v40 }
 0xac7   : > { %v3797_v57 = vadd.f32 %v7544_v20, %v3758_v22  ;;  %v3759_v34 = vadd.f32 %v3646_v31, %v7949_v41  ;;  %v7958_v31 = vld [vmem:[#allocation51_spill] sm:$0xff] }
 0xac8   : > { %v3800_v1 = vadd.f32 %v7544_v20, %v3761_v24  ;;  %v3836_v25 = vsel %vm829_vm2, %v3799_v18, 0.0  ;;  %v7959_v24 = vld [vmem:[#allocation49_spill] sm:$0xff] }
 0xac9   : > { %v3832_v51 = vsel %vm829_vm2, %v3797_v57, 0.0  ;;  %v3798_v11 = vadd.f32 %v7544_v20, %v3759_v34 }
 0xaca   : > { %v3833_v54 = vadd.f32 %v3832_v51, %v3831_v8  ;;  %v3838_v60 = vsel %vm829_vm2, %v3800_v1, 0.0  ;;  %v7960_v1 = vld [vmem:[#allocation52_spill] sm:$0xff] }
 0xacb   : > { %v3834_v43 = vsel %vm829_vm2, %v3798_v11, 0.0 }
 0xacc   : > { %v3835_v15 = vadd.f32 %v3834_v43, %v3833_v54 }
 0xacd   : > { %v4567_v30 = vpop.f32.mrb[4].mxu1 }
 0xace   : > { %v3837_v36 = vadd.f32 %v3836_v25, %v3835_v15  ;;  %v3659_v63 = vpop.f32.mrb[5].mxu1  ;;  %v3764_v38 = vadd.f32 %v4567_v30, %v7950_v6  ;;  %v7961_v15 = vld [vmem:[#allocation50_spill] sm:$0xff] }
 0xacf   : > { %v3762_v32 = vadd.f32 %v3659_v63, %v7951_v44  ;;  %v4568_v46 = vpop.f32.mrb[6].mxu1 }
 0xad0   : > { %v3839_v55 = vadd.f32 %v3838_v60, %v3837_v36  ;;  %v3662_v4 = vpop.f32.mrb[7].mxu1  ;;  %v3765_v9 = vadd.f32 %v4568_v46, %v7952_v13  ;;  %v3803_v58 = vadd.f32 %v7544_v20, %v3764_v38 }
 0xad1   : > { %v3801_v19 = vadd.f32 %v7544_v20, %v3762_v32  ;;  %v3763_v5 = vadd.f32 %v3662_v4, %v7953_v48 }
 0xad2   : > { %v3804_v42 = vadd.f32 %v7544_v20, %v3765_v9  ;;  %v3844_v10 = vsel %vm829_vm2, %v3803_v58, 0.0  ;;  %v7963_v9 = vld [vmem:[#allocation53_spill] sm:$0xff] }
 0xad3   : > { %v3840_v0 = vsel %vm829_vm2, %v3801_v19, 0.0  ;;  %v3802_v50 = vadd.f32 %v7544_v20, %v3763_v5  ;;  %v7962_v19 = vld [vmem:[#allocation55_spill] sm:$0xff] }
 0xad4   : > { %v3841_v49 = vadd.f32 %v3840_v0, %v3839_v55  ;;  %v3846_v56 = vsel %vm829_vm2, %v3804_v42, 0.0  ;;  %v7964_v42 = vld [vmem:[#allocation15_spill] sm:$0xff] }
 0xad5   : > { %v3842_v23 = vsel %vm829_vm2, %v3802_v50, 0.0 }
 0xad6   : > { %v3843_v53 = vadd.f32 %v3842_v23, %v3841_v49 }
 0xad7   : > { %v4571_v35 = vpop.f32.mrb[8].mxu1 }
 0xad8   : > { %v3845_v45 = vadd.f32 %v3844_v10, %v3843_v53  ;;  %v3675_v27 = vpop.f32.mrb[9].mxu1  ;;  %v3768_v61 = vadd.f32 %v4571_v35, %v7954_v28  ;;  %v7965_v53 = vld [vmem:[#allocation54_spill] sm:$0xff] }
 0xad9   : > { %v3766_v17 = vadd.f32 %v3675_v27, %v7955_v47  ;;  %v4572_v33 = vpop.f32.mrb[10].mxu1 }
 0xada   : > { %v3847_v59 = vadd.f32 %v3846_v56, %v3845_v45  ;;  %v3678_v7 = vpop.f32.mrb[11].mxu1  ;;  %v3769_v12 = vadd.f32 %v4572_v33, %v7956_v26  ;;  %v3807_v3 = vadd.f32 %v7544_v20, %v3768_v61 }
 0xadb   : > { %v3805_v14 = vadd.f32 %v7544_v20, %v3766_v17  ;;  %v3767_v21 = vadd.f32 %v3678_v7, %v7957_v39 }
 0xadc   : > { %v3808_v62 = vadd.f32 %v7544_v20, %v3769_v12  ;;  %v3852_v52 = vsel %vm829_vm2, %v3807_v3, 0.0  ;;  %v7967_v12 = vld [vmem:[#allocation11_spill] sm:$0xff] }
 0xadd   : > { %v3848_v37 = vsel %vm829_vm2, %v3805_v14, 0.0  ;;  %v3806_v2 = vadd.f32 %v7544_v20, %v3767_v21  ;;  %v7966_v14 = vld [vmem:[#allocation20_spill] sm:$0xff] }
 0xade   : > { %v3849_v16 = vadd.f32 %v3848_v37, %v3847_v59  ;;  %v3854_v11 = vsel %vm829_vm2, %v3808_v62, 0.0  ;;  %v7968_v62 = vld [vmem:[#allocation17_spill] sm:$0xff] }
 0xadf   : > { %v3850_v8 = vsel %vm829_vm2, %v3806_v2, 0.0  ;;  %v4575_v29 = vpop.f32.mrb[12].mxu1 }
 0xae0   : > { %v3851_v40 = vadd.f32 %v3850_v8, %v3849_v16  ;;  %v3691_v22 = vpop.f32.mrb[13].mxu1  ;;  %v3772_v57 = vadd.f32 %v4575_v29, %v7958_v31  ;;  %v7969_v29 = vld [vmem:[#allocation21_spill] sm:$0xff] }
 0xae1   : > { %v3770_v41 = vadd.f32 %v3691_v22, %v7959_v24  ;;  %v4576_v34 = vpop.f32.mrb[14].mxu1 }
 0xae2   : > { %v3853_v18 = vadd.f32 %v3852_v52, %v3851_v40  ;;  %v3694_v51 = vpop.f32.mrb[15].mxu1  ;;  %v3773_v43 = vadd.f32 %v4576_v34, %v7960_v1  ;;  %v3811_v36 = vadd.f32 %v7544_v20, %v3772_v57  ;;  %v7970_v1 = vld [vmem:[#allocation28_spill] sm:$0xff] }
 0xae3   : > { %v3809_v54 = vadd.f32 %v7544_v20, %v3770_v41  ;;  %v3771_v25 = vadd.f32 %v3694_v51, %v7961_v15  ;;  %v7971_v15 = vld [vmem:[#allocation16_spill] sm:$0xff] }
 0xae4   : > { %v3855_v30 = vadd.f32 %v3854_v11, %v3853_v18  ;;  %v3812_v38 = vadd.f32 %v7544_v20, %v3773_v43  ;;  %v3860_v4 = vsel %vm829_vm2, %v3811_v36, 0.0 }
 0xae5   : > { %v3856_v63 = vsel %vm829_vm2, %v3809_v54, 0.0  ;;  %v3810_v60 = vadd.f32 %v7544_v20, %v3771_v25 }
 0xae6   : > { %v3857_v6 = vadd.f32 %v3856_v63, %v3855_v30  ;;  %v3862_v50 = vsel %vm829_vm2, %v3812_v38, 0.0  ;;  %v7972_v38 = vld [vmem:[#allocation25_spill] sm:$0xff] }
 0xae7   : > { %v3858_v44 = vsel %vm829_vm2, %v3810_v60, 0.0  ;;  %v4579_v32 = vpop.f32.mrb[16].mxu1 }
 0xae8   : > { %v3859_v46 = vadd.f32 %v3858_v44, %v3857_v6  ;;  %v3707_v55 = vpop.f32.mrb[17].mxu1  ;;  %v3776_v13 = vadd.f32 %v4579_v32, %v7962_v19  ;;  %v7973_v32 = vld [vmem:[#allocation29_spill] sm:$0xff] }
 0xae9   : > { %v3774_v48 = vadd.f32 %v3707_v55, %v7963_v9  ;;  %v4580_v5 = vpop.f32.mrb[18].mxu1 }
 0xaea   : > { %v3861_v58 = vadd.f32 %v3860_v4, %v3859_v46  ;;  %v3710_v0 = vpop.f32.mrb[19].mxu1  ;;  %v3777_v23 = vadd.f32 %v4580_v5, %v7964_v42  ;;  %v3815_v45 = vadd.f32 %v7544_v20, %v3776_v13 }
 0xaeb   : > { %v3813_v49 = vadd.f32 %v7544_v20, %v3774_v48  ;;  %v3775_v10 = vadd.f32 %v3710_v0, %v7965_v53 }
 0xaec   : > { %v3863_v35 = vadd.f32 %v3862_v50, %v3861_v58  ;;  %v3816_v61 = vadd.f32 %v7544_v20, %v3777_v23  ;;  %v3868_v7 = vsel %vm829_vm2, %v3815_v45, 0.0 }
 0xaed   : > { %v3864_v27 = vsel %vm829_vm2, %v3813_v49, 0.0  ;;  %v3814_v56 = vadd.f32 %v7544_v20, %v3775_v10 }
 0xaee   : > { %v3865_v28 = vadd.f32 %v3864_v27, %v3863_v35  ;;  %v3870_v2 = vsel %vm829_vm2, %v3816_v61, 0.0 }
 0xaef   : > { %v3866_v47 = vsel %vm829_vm2, %v3814_v56, 0.0  ;;  %v4583_v17 = vpop.f32.mrb[20].mxu1 }
 0xaf0   : > { %v3867_v33 = vadd.f32 %v3866_v47, %v3865_v28  ;;  %v3723_v59 = vpop.f32.mrb[21].mxu1  ;;  %v3780_v26 = vadd.f32 %v4583_v17, %v7966_v14  ;;  %v3901_v28 = vld [vmem:[%s7710_s14] sm:$0x1] }
 0xaf1   : > { %v3778_v39 = vadd.f32 %v3723_v59, %v7967_v12  ;;  %v4584_v21 = vpop.f32.mrb[22].mxu1 }
 0xaf2   : > { %v3869_v3 = vadd.f32 %v3868_v7, %v3867_v33  ;;  %v3726_v37 = vpop.f32.mrb[23].mxu1  ;;  %v3781_v8 = vadd.f32 %v4584_v21, %v7968_v62  ;;  %v3819_v52 = vadd.f32 %v7544_v20, %v3780_v26 }
 0xaf3   : > { %v3817_v16 = vadd.f32 %v7544_v20, %v3778_v39  ;;  %v3779_v40 = vadd.f32 %v3726_v37, %v7969_v29 }
 0xaf4   : > { %v3871_v22 = vadd.f32 %v3870_v2, %v3869_v3  ;;  %v3820_v41 = vadd.f32 %v7544_v20, %v3781_v8  ;;  %v3876_v54 = vsel %vm829_vm2, %v3819_v52, 0.0 }
 0xaf5   : > { %v3872_v31 = vsel %vm829_vm2, %v3817_v16, 0.0  ;;  %v3818_v57 = vadd.f32 %v7544_v20, %v3779_v40 }
 0xaf6   : > { %v3873_v24 = vadd.f32 %v3872_v31, %v3871_v22  ;;  %v3878_v60 = vsel %vm829_vm2, %v3820_v41, 0.0 }
 0xaf7   : > { %v3874_v34 = vsel %vm829_vm2, %v3818_v57, 0.0  ;;  %v4587_v18 = vpop.f32.mrb[24].mxu1 }
 0xaf8   : > { %v3875_v51 = vadd.f32 %v3874_v34, %v3873_v24  ;;  %v3739_v11 = vpop.f32.mrb[25].mxu1  ;;  %v3784_v43 = vadd.f32 %v4587_v18, %v7970_v1 }
 0xaf9   : > { %v3782_v25 = vadd.f32 %v3739_v11, %v7971_v15  ;;  %v4588_v30 = vpop.f32.mrb[26].mxu1 }
 0xafa   : > { %v3877_v36 = vadd.f32 %v3876_v54, %v3875_v51  ;;  %v3742_v63 = vpop.f32.mrb[27].mxu1  ;;  %v3785_v44 = vadd.f32 %v4588_v30, %v7972_v38  ;;  %v3823_v4 = vadd.f32 %v7544_v20, %v3784_v43 }
 0xafb   : > { %v3821_v6 = vadd.f32 %v7544_v20, %v3782_v25  ;;  %v3783_v46 = vadd.f32 %v3742_v63, %v7973_v32 }
 0xafc   : > { %v3879_v55 = vadd.f32 %v3878_v60, %v3877_v36  ;;  %v3824_v48 = vadd.f32 %v7544_v20, %v3785_v44  ;;  %v3884_v0 = vsel %vm829_vm2, %v3823_v4, 0.0 }
 0xafd   : > { %v3880_v19 = vsel %vm829_vm2, %v3821_v6, 0.0  ;;  %v3822_v13 = vadd.f32 %v7544_v20, %v3783_v46 }
 0xafe   : > { %v3881_v9 = vadd.f32 %v3880_v19, %v3879_v55  ;;  %v3886_v49 = vsel %vm829_vm2, %v3824_v48, 0.0 }
 0xaff   : > { %v3882_v5 = vsel %vm829_vm2, %v3822_v13, 0.0 }
 0xb00   : > { %v3883_v58 = vadd.f32 %v3882_v5, %v3881_v9 }
 0xb02   : > { %v3885_v50 = vadd.f32 %v3884_v0, %v3883_v58 }
 0xb04   : > { %v3887_v42 = vadd.f32 %v3886_v49, %v3885_v50 }
 0xb06   : > { %v3888_v23 = vrot.slane %v3887_v42, 4 }
 0xb08   : > { %v3889_v53 = vadd.f32 %v3888_v23, %v3887_v42 }
 0xb0a   : > { %v3890_v10 = vrot.slane %v3889_v53, 2 }
 0xb0c   : > { %v3891_v35 = vadd.f32 %v3890_v10, %v3889_v53 }
 0xb0e   : > { %v3892_v45 = vrot.slane %v3891_v35, 1 }
 0xb10   : > { %v3893_v27 = vadd.f32 %v3892_v45, %v3891_v35 }
 0xb12   : > { %v3895_v20 = vmul.f32 0.00390625, %v3893_v27 }
 0xb14   : > { %v3896_v56 = vpack.c.bf16 %v3895_v20, %v3895_v20 }
 0xb16   : > { %4594 = vmatmul.mubr.msk.bf16.vlgmr.msra.gmra.mrb[36].mxu0 %vm829_vm2, %v3896_v56 }
 0xbe9   : > { %v3951_v61 = vpop.f32.mrb[36].mxu0 }
 0xbea   : > { %v3952_v47 = vadd.f32 %v3951_v61, %v3901_v28  ;;  %v4595_v17 = vpop.f32.mrb[37].mxu0 }
 0xbeb   : > { %v3954_v33 = vpop.f32.mrb[38].mxu0 }
 0xbec   : > { %3957 = vst [vmem:[%s6045_s26] sm:$0x1] %v3952_v47  ;;  %v4596_v59 = vpop.f32.mrb[39].mxu0 }
 0xbed   : > { %5155 = shalt.err (!%p5152_p8)
}
 0xbee   : > { %s5156_s26 = scalar_lea.hbm %s7651_s30, 16  ;;  %s5160_s0 = scalar_lea.hbm %s7711_s15, 32 }
 0xbef   : > { %p5157_p9 = scmp.ne.s32.totalorder %s7651_s30, %s5156_s26  ;;  %p5161_p12 = scmp.lt.u32.totalorder %s7651_s30, %s7711_s15 }
 0xbf0   : > { %p5162_p13 = scmp.lt.u32.totalorder %s5160_s0, %s5156_s26  ;;  %p5164_p1 = scmp.lt.u32.totalorder %s5156_s26, %s7651_s30 }
 0xbf1   : > { %p5158_p10 = pnand %p5157_p9, %p5479_p5 }
 0xbf2   : > { %p5163_p0 = por %p5162_p13, %p5161_p12 }
 0xbf3   : > { %p5159_p11 = pneg %p5158_p10 }
 0xbf4   : > { %p5165_p2 = por %p5164_p1, %p5163_p0 }
 0xbf6   : > { %p5166_p3 = pnand %p5165_p2, %p5159_p11 }
 0xbf8   : > { %5169 = shalt.err (!%p5166_p3)
}
 0xbf9   : > { %4629 = dma.vmem_to_hbm [thread:$0]  (%p5479_p5), %s7653_s20, 16, %s7651_s30, %s3959_s25  }
 0xbfa PF: > { %p4635_p4 = scmp.ge.s32.totalorder %s5280_s21, 2  ;;  %s3983_s22 = sand.u32 1, %s5268_s18  }
 0xbfb   : > { %s3984_s16 = scalar_lea.sflag [#allocation6], %s3983_s22 }
 0xbfc   : > { %p4632_p7 = pnand %p4635_p4, %p5483_p6 }
 0xbfe   : > { %5263 = dma.done.wait (!%p4632_p7), %s3984_s16, 16  }
 0xbff   : > { %5265 = vsyncadd (!%p4632_p7), %s3984_s16, 4294967280  ;;  %s7975_s26 = sld [smem:[#allocation8_spill]]  ;;  %s7976_s20 = sld [smem:[#allocation9_spill]] }
 0xc00   : > { %p25_p8 = scmp.ge.s32.totalorder %s5466_s24, 4   ;;  %s7977_s18 = smov %s5272_s19 }
 0xc01   : > { %s7979_s21 = smov %s5466_s24 }
 0xc02   :  { %27 = sbr.rel (!%p25_p8) target bundleno = 6 (0x6), region = 175 }
 0xc05   : > { %s7978_s19 = smov %s7975_s26 }
 0xc09   :  { %3988 = vsyncpa [#allocation6], 1 }
 0xc0a   :  { %3990 = vsyncpa [#allocation6 + $0x1], 1 }

</bundles_post_ra>
